<compile_context>
chip_gen: v6e
topology: v6e:2x2x1
jax: 0.10.0
libtpu: 0.0.40
codegen_flags: <defaults>
</compile_context>

<pallas_src>
import functools

import jax
import jax.numpy as jnp
from jax.experimental import pallas as pl
from jax.experimental.pallas import tpu as pltpu


LAYER_KEYS = (
    "in_w_t", "in_b",        # qkv in_proj   [E, 3E], [1, 3E]
    "out_w_t", "out_b",      # attn out_proj [E, E],  [1, E]
    "ln1_w", "ln1_b",        # layernorm 1   [1, E]
    "lin1_w_t", "lin1_b",    # ffn linear1   [E, FF], [1, FF]
    "lin2_w_t", "lin2_b",    # ffn linear2   [FF, E], [1, E]
    "ln2_w", "ln2_b",        # layernorm 2   [1, E]
)
REFS_PER_LAYER = len(LAYER_KEYS)  # 12


def _layer_norm(x, w, b, eps=1e-5):
    mu = jnp.mean(x, axis=-1, keepdims=True)
    var = jnp.mean((x - mu) ** 2, axis=-1, keepdims=True)
    return (x - mu) * jax.lax.rsqrt(var + eps) * w + b


# ------------------------------ fused kernel --------------------------------


def fused_forward_kernel(num_layers, num_heads, x_ref, *args):
    """Single-step kernel: all encoder layers + last-token + head + softmax."""
    n_layer_refs = num_layers * REFS_PER_LAYER
    layer_refs = args[:n_layer_refs]
    head_w_ref = args[n_layer_refs]
    head_b_ref = args[n_layer_refs + 1]
    o_ref = args[n_layer_refs + 2]

    x = x_ref[...].astype(jnp.float32)          # [B, S, E]
    B, S, E = x.shape
    H = num_heads
    Dh = E // H
    scale = 1.0 / (Dh ** 0.5)

    x2d = x.reshape(B * S, E)                   # tokens on sublanes, E on lanes

    for l in range(num_layers):
        (in_w, in_b, out_w, out_b, ln1_w, ln1_b,
         lin1_w, lin1_b, lin2_w, lin2_b, ln2_w, ln2_b) = (
            layer_refs[l * REFS_PER_LAYER:(l + 1) * REFS_PER_LAYER])

        # ---------------- multi-head self attention (post-norm) ----------------
        qkv = jnp.dot(x2d.astype(jnp.bfloat16), in_w[...],
                      preferred_element_type=jnp.float32) + in_b[...]    # [B*S, 3E]

        ctx_heads = []
        for h in range(H):
            q_h = (qkv[:, h * Dh:(h + 1) * Dh] * scale).reshape(B, S, Dh)
            k_h = qkv[:, E + h * Dh:E + (h + 1) * Dh].reshape(B, S, Dh)
            v_h = qkv[:, 2 * E + h * Dh:2 * E + (h + 1) * Dh].reshape(B, S, Dh)
            s = jnp.einsum('bqd,bkd->bqk',
                           q_h.astype(jnp.bfloat16), k_h.astype(jnp.bfloat16),
                           preferred_element_type=jnp.float32)           # [B, S, S]
            s = s - jnp.max(s, axis=-1, keepdims=True)
            p = jnp.exp(s)
            p = p * pl.reciprocal(jnp.sum(p, axis=-1, keepdims=True), approx=True)
            ctx_heads.append(
                jnp.einsum('bqk,bkd->bqd',
                           p.astype(jnp.bfloat16), v_h.astype(jnp.bfloat16),
                           preferred_element_type=jnp.float32))          # [B, S, Dh]

        attn = jnp.concatenate(ctx_heads, axis=-1).reshape(B * S, E)     # [B*S, E]
        attn = jnp.dot(attn.astype(jnp.bfloat16), out_w[...],
                       preferred_element_type=jnp.float32) + out_b[...]

        x1 = _layer_norm(x2d + attn, ln1_w[...], ln1_b[...])             # [B*S, E]

        # Only the last token of each batch element feeds the head: after the
        # last layer's attention, drop all other rows before the (FLOP-dominant) FFN.
        if l == num_layers - 1:
            x1 = x1.reshape(B, S, E)[:, S - 1, :]                        # [B, E]

        # ---------------------------- feed forward -----------------------------
        hdn = jnp.dot(x1.astype(jnp.bfloat16), lin1_w[...],
                      preferred_element_type=jnp.float32) + lin1_b[...]  # [.., FF]
        hdn = jnp.maximum(hdn, 0.0)
        ff = jnp.dot(hdn.astype(jnp.bfloat16), lin2_w[...],
                     preferred_element_type=jnp.float32) + lin2_b[...]   # [.., E]

        x2d = _layer_norm(x1 + ff, ln2_w[...], ln2_b[...])

    # --------------------- classification head + softmax -----------------------
    enc_last = x2d                                                       # [B, E]
    z = jnp.dot(enc_last.astype(jnp.bfloat16), head_w_ref[...],
                preferred_element_type=jnp.float32) + head_b_ref[...]    # [B, O]
    z = z - jnp.max(z, axis=-1, keepdims=True)
    e = jnp.exp(z)
    o_ref[...] = (e / jnp.sum(e, axis=-1, keepdims=True)).astype(o_ref.dtype)


# ------------------------------ host wrapper ---------------------------------


def transformer_net_forward(params, text, num_heads, num_layers):
    """text: [seq_len, batch] int32 -> [batch, output_dim] float32."""
    # TODO(synk): embedding gather is data-dependent; kept in plain JAX glue
    # (a manual-DMA gather kernel is possible but not worth it at this size).
    embed = jnp.take(params["embedding"], text, axis=0)        # [S, B, E]
    x = jnp.transpose(embed, (1, 0, 2)).astype(jnp.float32)    # [B, S, E]
    B, S, E = x.shape
    O = params["head_w_t"].shape[1]

    flat_inputs = [x]
    for lp in params["layers"]:
        flat_inputs += [lp[k] for k in LAYER_KEYS]
    flat_inputs += [params["head_w_t"], params["head_b"]]

    vmem = pl.BlockSpec(memory_space=pltpu.MemorySpace.VMEM)
    return pl.pallas_call(
        functools.partial(fused_forward_kernel, num_layers, num_heads),
        out_shape=jax.ShapeDtypeStruct((B, O), jnp.float32),
        in_specs=[vmem] * len(flat_inputs),
        out_specs=vmem,
    )(*flat_inputs)


# ---------------------------- parameter creation ------------------------------


def init_params(key, vocab_size, embedding_dim, num_heads, num_layers,
                output_dim, pad_idx, dim_feedforward=2048):
    E, FF = embedding_dim, dim_feedforward
    keys = jax.random.split(key, 2 + 6 * num_layers)
    kit = iter(keys)

    def nrm(k, shape, scale=0.02):
        return (scale * jax.random.normal(k, shape)).astype(jnp.float32)

    emb = nrm(next(kit), (vocab_size, E))
    emb = emb.at[pad_idx].set(0.0)             # padding_idx row is zero

    layers = []
    for _ in range(num_layers):
        in_w = nrm(next(kit), (3 * E, E))
        out_w = nrm(next(kit), (E, E))
        lin1_w = nrm(next(kit), (FF, E))
        lin2_w = nrm(next(kit), (E, FF))
        layers.append(dict(
            in_w_t=in_w.T.astype(jnp.bfloat16),       # [E, 3E]  pre-transposed
            in_b=jnp.zeros((1, 3 * E), jnp.float32),
            out_w_t=out_w.T.astype(jnp.bfloat16),     # [E, E]
            out_b=jnp.zeros((1, E), jnp.float32),
            ln1_w=jnp.ones((1, E), jnp.float32),
            ln1_b=jnp.zeros((1, E), jnp.float32),
            lin1_w_t=lin1_w.T.astype(jnp.bfloat16),   # [E, FF]
            lin1_b=jnp.zeros((1, FF), jnp.float32),
            lin2_w_t=lin2_w.T.astype(jnp.bfloat16),   # [FF, E]
            lin2_b=jnp.zeros((1, E), jnp.float32),
            ln2_w=jnp.ones((1, E), jnp.float32),
            ln2_b=jnp.zeros((1, E), jnp.float32),
        ))
        next(kit); next(kit)  # keep key consumption deterministic/stable

    head_w = nrm(next(kit), (output_dim, E))
    return dict(
        embedding=emb,
        layers=layers,
        head_w_t=head_w.T.astype(jnp.bfloat16),       # [E, O]
        head_b=jnp.zeros((1, output_dim), jnp.float32),
    )


# ----------------------------------- main -------------------------------------


if __name__ == "__main__":
    vocab_size = 16
    embedding_dim = 32
    num_heads = 4
    num_encoder_layers = 2
    output_dim = 4
    pad_idx = 0
    seq_len = 8
    batch = 2

    key = jax.random.PRNGKey(0)
    pkey, tkey = jax.random.split(key)
    params = init_params(pkey, vocab_size, embedding_dim, num_heads,
                         num_encoder_layers, output_dim, pad_idx)

    text = jax.random.randint(tkey, (seq_len, batch), 0, vocab_size, dtype=jnp.int32)

    fwd = jax.jit(functools.partial(transformer_net_forward,
                                    num_heads=num_heads,
                                    num_layers=num_encoder_layers))
    out = fwd(params, text)
    out = jax.block_until_ready(out)

    assert out.shape == (batch, output_dim)
    # rows of softmax output must sum to 1
    assert bool(jnp.all(jnp.abs(jnp.sum(out, axis=1) - 1.0) < 1e-4))
    print("KERNEL_OK")
</pallas_src>

<mosaic_0001>
module attributes {stable_mosaic.version = 11 : i64} {
  func.func @fused_forward_kernel(%arg0: memref<2x8x32xf32, #tpu.memory_space<vmem>>, %arg1: memref<32x96xbf16, #tpu.memory_space<vmem>>, %arg2: memref<1x96xf32, #tpu.memory_space<vmem>>, %arg3: memref<32x32xbf16, #tpu.memory_space<vmem>>, %arg4: memref<1x32xf32, #tpu.memory_space<vmem>>, %arg5: memref<1x32xf32, #tpu.memory_space<vmem>>, %arg6: memref<1x32xf32, #tpu.memory_space<vmem>>, %arg7: memref<32x2048xbf16, #tpu.memory_space<vmem>>, %arg8: memref<1x2048xf32, #tpu.memory_space<vmem>>, %arg9: memref<2048x32xbf16, #tpu.memory_space<vmem>>, %arg10: memref<1x32xf32, #tpu.memory_space<vmem>>, %arg11: memref<1x32xf32, #tpu.memory_space<vmem>>, %arg12: memref<1x32xf32, #tpu.memory_space<vmem>>, %arg13: memref<32x96xbf16, #tpu.memory_space<vmem>>, %arg14: memref<1x96xf32, #tpu.memory_space<vmem>>, %arg15: memref<32x32xbf16, #tpu.memory_space<vmem>>, %arg16: memref<1x32xf32, #tpu.memory_space<vmem>>, %arg17: memref<1x32xf32, #tpu.memory_space<vmem>>, %arg18: memref<1x32xf32, #tpu.memory_space<vmem>>, %arg19: memref<32x2048xbf16, #tpu.memory_space<vmem>>, %arg20: memref<1x2048xf32, #tpu.memory_space<vmem>>, %arg21: memref<2048x32xbf16, #tpu.memory_space<vmem>>, %arg22: memref<1x32xf32, #tpu.memory_space<vmem>>, %arg23: memref<1x32xf32, #tpu.memory_space<vmem>>, %arg24: memref<1x32xf32, #tpu.memory_space<vmem>>, %arg25: memref<32x4xbf16, #tpu.memory_space<vmem>>, %arg26: memref<1x4xf32, #tpu.memory_space<vmem>>, %arg27: memref<2x4xf32, #tpu.memory_space<vmem>>) attributes {dimension_semantics = [], scalar_prefetch = 0 : i64, scratch_operands = 0 : i64, tpu.core_type = #tpu.core_type<tc>} {
    %c0 = arith.constant 0 : index
    %c0_0 = arith.constant 0 : index
    %c0_1 = arith.constant 0 : index
    %0 = vector.load %arg0[%c0, %c0_0, %c0_1] : memref<2x8x32xf32, #tpu.memory_space<vmem>>, vector<2x8x32xf32>
    %1 = vector.shape_cast %0 : vector<2x8x32xf32> to vector<16x32xf32>
    %2 = arith.truncf %1 : vector<16x32xf32> to vector<16x32xbf16>
    %c0_2 = arith.constant 0 : index
    %c0_3 = arith.constant 0 : index
    %3 = vector.load %arg1[%c0_2, %c0_3] : memref<32x96xbf16, #tpu.memory_space<vmem>>, vector<32x96xbf16>
    %cst = arith.constant dense<0.000000e+00> : vector<16x96xf32>
    %4 = tpu.matmul %2, %3, %cst {dimension_numbers = #tpu.dot_dimension_numbers<[1], [0], [0], [1], [0, 0, 1, 1], [], []>} : vector<16x32xbf16>, vector<32x96xbf16>, vector<16x96xf32> -> vector<16x96xf32>
    %c0_4 = arith.constant 0 : index
    %c0_5 = arith.constant 0 : index
    %5 = vector.load %arg2[%c0_4, %c0_5] : memref<1x96xf32, #tpu.memory_space<vmem>>, vector<1x96xf32>
    %6 = vector.broadcast %5 : vector<1x96xf32> to vector<16x96xf32>
    %7 = arith.addf %4, %6 : vector<16x96xf32>
    %8 = vector.extract_strided_slice %7 {offsets = [0, 0], sizes = [16, 8], strides = [1, 1]} : vector<16x96xf32> to vector<16x8xf32>
    %cst_6 = arith.constant 0.353553385 : f32
    %9 = vector.broadcast %cst_6 : f32 to vector<16x8xf32>
    %10 = arith.mulf %8, %9 : vector<16x8xf32>
    %11 = vector.shape_cast %10 : vector<16x8xf32> to vector<2x8x8xf32>
    %12 = vector.extract_strided_slice %7 {offsets = [0, 32], sizes = [16, 8], strides = [1, 1]} : vector<16x96xf32> to vector<16x8xf32>
    %13 = vector.shape_cast %12 : vector<16x8xf32> to vector<2x8x8xf32>
    %14 = vector.extract_strided_slice %7 {offsets = [0, 64], sizes = [16, 8], strides = [1, 1]} : vector<16x96xf32> to vector<16x8xf32>
    %15 = vector.shape_cast %14 : vector<16x8xf32> to vector<2x8x8xf32>
    %16 = arith.truncf %11 : vector<2x8x8xf32> to vector<2x8x8xbf16>
    %17 = arith.truncf %13 : vector<2x8x8xf32> to vector<2x8x8xbf16>
    "tpu.trace_start"() <{level = 10 : i32, message = "bqd,bkd->bqk"}> : () -> ()
    %cst_7 = arith.constant dense<0.000000e+00> : vector<2x8x8xf32>
    %18 = tpu.matmul %16, %17, %cst_7 {dimension_numbers = #tpu.dot_dimension_numbers<[2], [2], [1], [1], [0, 0, 0, 1, 1, 1], [0], [0]>} : vector<2x8x8xbf16>, vector<2x8x8xbf16>, vector<2x8x8xf32> -> vector<2x8x8xf32>
    "tpu.trace_stop"() : () -> ()
    %cst_8 = arith.constant dense<0xFF800000> : vector<2x8xf32>
    %19 = vector.multi_reduction <maximumf>, %18, %cst_8 [2] : vector<2x8x8xf32> to vector<2x8xf32>
    %20 = vector.shape_cast %19 : vector<2x8xf32> to vector<2x8x1xf32>
    %21 = vector.broadcast %20 : vector<2x8x1xf32> to vector<2x8x8xf32>
    %22 = arith.subf %18, %21 : vector<2x8x8xf32>
    %23 = math.exp %22 : vector<2x8x8xf32>
    %cst_9 = arith.constant dense<0.000000e+00> : vector<2x8xf32>
    %24 = vector.multi_reduction <add>, %23, %cst_9 [2] : vector<2x8x8xf32> to vector<2x8xf32>
    %25 = vector.shape_cast %24 : vector<2x8xf32> to vector<2x8x1xf32>
    %26 = tpu.reciprocal %25 {approx = true} : vector<2x8x1xf32> -> vector<2x8x1xf32>
    %27 = vector.broadcast %26 : vector<2x8x1xf32> to vector<2x8x8xf32>
    %28 = arith.mulf %23, %27 : vector<2x8x8xf32>
    %29 = arith.truncf %28 : vector<2x8x8xf32> to vector<2x8x8xbf16>
    %30 = arith.truncf %15 : vector<2x8x8xf32> to vector<2x8x8xbf16>
    "tpu.trace_start"() <{level = 10 : i32, message = "bqk,bkd->bqd"}> : () -> ()
    %cst_10 = arith.constant dense<0.000000e+00> : vector<2x8x8xf32>
    %31 = tpu.matmul %29, %30, %cst_10 {dimension_numbers = #tpu.dot_dimension_numbers<[2], [1], [1], [2], [0, 0, 0, 1, 1, 2], [0], [0]>} : vector<2x8x8xbf16>, vector<2x8x8xbf16>, vector<2x8x8xf32> -> vector<2x8x8xf32>
    "tpu.trace_stop"() : () -> ()
    %32 = vector.extract_strided_slice %7 {offsets = [0, 8], sizes = [16, 8], strides = [1, 1]} : vector<16x96xf32> to vector<16x8xf32>
    %cst_11 = arith.constant 0.353553385 : f32
    %33 = vector.broadcast %cst_11 : f32 to vector<16x8xf32>
    %34 = arith.mulf %32, %33 : vector<16x8xf32>
    %35 = vector.shape_cast %34 : vector<16x8xf32> to vector<2x8x8xf32>
    %36 = vector.extract_strided_slice %7 {offsets = [0, 40], sizes = [16, 8], strides = [1, 1]} : vector<16x96xf32> to vector<16x8xf32>
    %37 = vector.shape_cast %36 : vector<16x8xf32> to vector<2x8x8xf32>
    %38 = vector.extract_strided_slice %7 {offsets = [0, 72], sizes = [16, 8], strides = [1, 1]} : vector<16x96xf32> to vector<16x8xf32>
    %39 = vector.shape_cast %38 : vector<16x8xf32> to vector<2x8x8xf32>
    %40 = arith.truncf %35 : vector<2x8x8xf32> to vector<2x8x8xbf16>
    %41 = arith.truncf %37 : vector<2x8x8xf32> to vector<2x8x8xbf16>
    "tpu.trace_start"() <{level = 10 : i32, message = "bqd,bkd->bqk"}> : () -> ()
    %cst_12 = arith.constant dense<0.000000e+00> : vector<2x8x8xf32>
    %42 = tpu.matmul %40, %41, %cst_12 {dimension_numbers = #tpu.dot_dimension_numbers<[2], [2], [1], [1], [0, 0, 0, 1, 1, 1], [0], [0]>} : vector<2x8x8xbf16>, vector<2x8x8xbf16>, vector<2x8x8xf32> -> vector<2x8x8xf32>
    "tpu.trace_stop"() : () -> ()
    %cst_13 = arith.constant dense<0xFF800000> : vector<2x8xf32>
    %43 = vector.multi_reduction <maximumf>, %42, %cst_13 [2] : vector<2x8x8xf32> to vector<2x8xf32>
    %44 = vector.shape_cast %43 : vector<2x8xf32> to vector<2x8x1xf32>
    %45 = vector.broadcast %44 : vector<2x8x1xf32> to vector<2x8x8xf32>
    %46 = arith.subf %42, %45 : vector<2x8x8xf32>
    %47 = math.exp %46 : vector<2x8x8xf32>
    %cst_14 = arith.constant dense<0.000000e+00> : vector<2x8xf32>
    %48 = vector.multi_reduction <add>, %47, %cst_14 [2] : vector<2x8x8xf32> to vector<2x8xf32>
    %49 = vector.shape_cast %48 : vector<2x8xf32> to vector<2x8x1xf32>
    %50 = tpu.reciprocal %49 {approx = true} : vector<2x8x1xf32> -> vector<2x8x1xf32>
    %51 = vector.broadcast %50 : vector<2x8x1xf32> to vector<2x8x8xf32>
    %52 = arith.mulf %47, %51 : vector<2x8x8xf32>
    %53 = arith.truncf %52 : vector<2x8x8xf32> to vector<2x8x8xbf16>
    %54 = arith.truncf %39 : vector<2x8x8xf32> to vector<2x8x8xbf16>
    "tpu.trace_start"() <{level = 10 : i32, message = "bqk,bkd->bqd"}> : () -> ()
    %cst_15 = arith.constant dense<0.000000e+00> : vector<2x8x8xf32>
    %55 = tpu.matmul %53, %54, %cst_15 {dimension_numbers = #tpu.dot_dimension_numbers<[2], [1], [1], [2], [0, 0, 0, 1, 1, 2], [0], [0]>} : vector<2x8x8xbf16>, vector<2x8x8xbf16>, vector<2x8x8xf32> -> vector<2x8x8xf32>
    "tpu.trace_stop"() : () -> ()
    %56 = vector.extract_strided_slice %7 {offsets = [0, 16], sizes = [16, 8], strides = [1, 1]} : vector<16x96xf32> to vector<16x8xf32>
    %cst_16 = arith.constant 0.353553385 : f32
    %57 = vector.broadcast %cst_16 : f32 to vector<16x8xf32>
    %58 = arith.mulf %56, %57 : vector<16x8xf32>
    %59 = vector.shape_cast %58 : vector<16x8xf32> to vector<2x8x8xf32>
    %60 = vector.extract_strided_slice %7 {offsets = [0, 48], sizes = [16, 8], strides = [1, 1]} : vector<16x96xf32> to vector<16x8xf32>
    %61 = vector.shape_cast %60 : vector<16x8xf32> to vector<2x8x8xf32>
    %62 = vector.extract_strided_slice %7 {offsets = [0, 80], sizes = [16, 8], strides = [1, 1]} : vector<16x96xf32> to vector<16x8xf32>
    %63 = vector.shape_cast %62 : vector<16x8xf32> to vector<2x8x8xf32>
    %64 = arith.truncf %59 : vector<2x8x8xf32> to vector<2x8x8xbf16>
    %65 = arith.truncf %61 : vector<2x8x8xf32> to vector<2x8x8xbf16>
    "tpu.trace_start"() <{level = 10 : i32, message = "bqd,bkd->bqk"}> : () -> ()
    %cst_17 = arith.constant dense<0.000000e+00> : vector<2x8x8xf32>
    %66 = tpu.matmul %64, %65, %cst_17 {dimension_numbers = #tpu.dot_dimension_numbers<[2], [2], [1], [1], [0, 0, 0, 1, 1, 1], [0], [0]>} : vector<2x8x8xbf16>, vector<2x8x8xbf16>, vector<2x8x8xf32> -> vector<2x8x8xf32>
    "tpu.trace_stop"() : () -> ()
    %cst_18 = arith.constant dense<0xFF800000> : vector<2x8xf32>
    %67 = vector.multi_reduction <maximumf>, %66, %cst_18 [2] : vector<2x8x8xf32> to vector<2x8xf32>
    %68 = vector.shape_cast %67 : vector<2x8xf32> to vector<2x8x1xf32>
    %69 = vector.broadcast %68 : vector<2x8x1xf32> to vector<2x8x8xf32>
    %70 = arith.subf %66, %69 : vector<2x8x8xf32>
    %71 = math.exp %70 : vector<2x8x8xf32>
    %cst_19 = arith.constant dense<0.000000e+00> : vector<2x8xf32>
    %72 = vector.multi_reduction <add>, %71, %cst_19 [2] : vector<2x8x8xf32> to vector<2x8xf32>
    %73 = vector.shape_cast %72 : vector<2x8xf32> to vector<2x8x1xf32>
    %74 = tpu.reciprocal %73 {approx = true} : vector<2x8x1xf32> -> vector<2x8x1xf32>
    %75 = vector.broadcast %74 : vector<2x8x1xf32> to vector<2x8x8xf32>
    %76 = arith.mulf %71, %75 : vector<2x8x8xf32>
    %77 = arith.truncf %76 : vector<2x8x8xf32> to vector<2x8x8xbf16>
    %78 = arith.truncf %63 : vector<2x8x8xf32> to vector<2x8x8xbf16>
    "tpu.trace_start"() <{level = 10 : i32, message = "bqk,bkd->bqd"}> : () -> ()
    %cst_20 = arith.constant dense<0.000000e+00> : vector<2x8x8xf32>
    %79 = tpu.matmul %77, %78, %cst_20 {dimension_numbers = #tpu.dot_dimension_numbers<[2], [1], [1], [2], [0, 0, 0, 1, 1, 2], [0], [0]>} : vector<2x8x8xbf16>, vector<2x8x8xbf16>, vector<2x8x8xf32> -> vector<2x8x8xf32>
    "tpu.trace_stop"() : () -> ()
    %80 = vector.extract_strided_slice %7 {offsets = [0, 24], sizes = [16, 8], strides = [1, 1]} : vector<16x96xf32> to vector<16x8xf32>
    %cst_21 = arith.constant 0.353553385 : f32
    %81 = vector.broadcast %cst_21 : f32 to vector<16x8xf32>
    %82 = arith.mulf %80, %81 : vector<16x8xf32>
    %83 = vector.shape_cast %82 : vector<16x8xf32> to vector<2x8x8xf32>
    %84 = vector.extract_strided_slice %7 {offsets = [0, 56], sizes = [16, 8], strides = [1, 1]} : vector<16x96xf32> to vector<16x8xf32>
    %85 = vector.shape_cast %84 : vector<16x8xf32> to vector<2x8x8xf32>
    %86 = vector.extract_strided_slice %7 {offsets = [0, 88], sizes = [16, 8], strides = [1, 1]} : vector<16x96xf32> to vector<16x8xf32>
    %87 = vector.shape_cast %86 : vector<16x8xf32> to vector<2x8x8xf32>
    %88 = arith.truncf %83 : vector<2x8x8xf32> to vector<2x8x8xbf16>
    %89 = arith.truncf %85 : vector<2x8x8xf32> to vector<2x8x8xbf16>
    "tpu.trace_start"() <{level = 10 : i32, message = "bqd,bkd->bqk"}> : () -> ()
    %cst_22 = arith.constant dense<0.000000e+00> : vector<2x8x8xf32>
    %90 = tpu.matmul %88, %89, %cst_22 {dimension_numbers = #tpu.dot_dimension_numbers<[2], [2], [1], [1], [0, 0, 0, 1, 1, 1], [0], [0]>} : vector<2x8x8xbf16>, vector<2x8x8xbf16>, vector<2x8x8xf32> -> vector<2x8x8xf32>
    "tpu.trace_stop"() : () -> ()
    %cst_23 = arith.constant dense<0xFF800000> : vector<2x8xf32>
    %91 = vector.multi_reduction <maximumf>, %90, %cst_23 [2] : vector<2x8x8xf32> to vector<2x8xf32>
    %92 = vector.shape_cast %91 : vector<2x8xf32> to vector<2x8x1xf32>
    %93 = vector.broadcast %92 : vector<2x8x1xf32> to vector<2x8x8xf32>
    %94 = arith.subf %90, %93 : vector<2x8x8xf32>
    %95 = math.exp %94 : vector<2x8x8xf32>
    %cst_24 = arith.constant dense<0.000000e+00> : vector<2x8xf32>
    %96 = vector.multi_reduction <add>, %95, %cst_24 [2] : vector<2x8x8xf32> to vector<2x8xf32>
    %97 = vector.shape_cast %96 : vector<2x8xf32> to vector<2x8x1xf32>
    %98 = tpu.reciprocal %97 {approx = true} : vector<2x8x1xf32> -> vector<2x8x1xf32>
    %99 = vector.broadcast %98 : vector<2x8x1xf32> to vector<2x8x8xf32>
    %100 = arith.mulf %95, %99 : vector<2x8x8xf32>
    %101 = arith.truncf %100 : vector<2x8x8xf32> to vector<2x8x8xbf16>
    %102 = arith.truncf %87 : vector<2x8x8xf32> to vector<2x8x8xbf16>
    "tpu.trace_start"() <{level = 10 : i32, message = "bqk,bkd->bqd"}> : () -> ()
    %cst_25 = arith.constant dense<0.000000e+00> : vector<2x8x8xf32>
    %103 = tpu.matmul %101, %102, %cst_25 {dimension_numbers = #tpu.dot_dimension_numbers<[2], [1], [1], [2], [0, 0, 0, 1, 1, 2], [0], [0]>} : vector<2x8x8xbf16>, vector<2x8x8xbf16>, vector<2x8x8xf32> -> vector<2x8x8xf32>
    "tpu.trace_stop"() : () -> ()
    %104 = tpu.concatenate %31, %55, %79, %103 in 2 : vector<2x8x8xf32>, vector<2x8x8xf32>, vector<2x8x8xf32>, vector<2x8x8xf32> -> vector<2x8x32xf32>
    %105 = vector.shape_cast %104 : vector<2x8x32xf32> to vector<16x32xf32>
    %106 = arith.truncf %105 : vector<16x32xf32> to vector<16x32xbf16>
    %c0_26 = arith.constant 0 : index
    %c0_27 = arith.constant 0 : index
    %107 = vector.load %arg3[%c0_26, %c0_27] : memref<32x32xbf16, #tpu.memory_space<vmem>>, vector<32x32xbf16>
    %cst_28 = arith.constant dense<0.000000e+00> : vector<16x32xf32>
    %108 = tpu.matmul %106, %107, %cst_28 {dimension_numbers = #tpu.dot_dimension_numbers<[1], [0], [0], [1], [0, 0, 1, 1], [], []>} : vector<16x32xbf16>, vector<32x32xbf16>, vector<16x32xf32> -> vector<16x32xf32>
    %c0_29 = arith.constant 0 : index
    %c0_30 = arith.constant 0 : index
    %109 = vector.load %arg4[%c0_29, %c0_30] : memref<1x32xf32, #tpu.memory_space<vmem>>, vector<1x32xf32>
    %110 = vector.broadcast %109 : vector<1x32xf32> to vector<16x32xf32>
    %111 = arith.addf %108, %110 : vector<16x32xf32>
    %112 = arith.addf %1, %111 : vector<16x32xf32>
    %c0_31 = arith.constant 0 : index
    %c0_32 = arith.constant 0 : index
    %113 = vector.load %arg5[%c0_31, %c0_32] : memref<1x32xf32, #tpu.memory_space<vmem>>, vector<1x32xf32>
    %c0_33 = arith.constant 0 : index
    %c0_34 = arith.constant 0 : index
    %114 = vector.load %arg6[%c0_33, %c0_34] : memref<1x32xf32, #tpu.memory_space<vmem>>, vector<1x32xf32>
    %cst_35 = arith.constant dense<0.000000e+00> : vector<16xf32>
    %115 = vector.multi_reduction <add>, %112, %cst_35 [1] : vector<16x32xf32> to vector<16xf32>
    %116 = vector.shape_cast %115 : vector<16xf32> to vector<16x1xf32>
    %cst_36 = arith.constant 3.200000e+01 : f32
    %117 = vector.broadcast %cst_36 : f32 to vector<16x1xf32>
    %118 = arith.divf %116, %117 : vector<16x1xf32>
    %119 = vector.broadcast %118 : vector<16x1xf32> to vector<16x32xf32>
    %120 = arith.subf %112, %119 : vector<16x32xf32>
    %121 = arith.mulf %120, %120 : vector<16x32xf32>
    %cst_37 = arith.constant dense<0.000000e+00> : vector<16xf32>
    %122 = vector.multi_reduction <add>, %121, %cst_37 [1] : vector<16x32xf32> to vector<16xf32>
    %123 = vector.shape_cast %122 : vector<16xf32> to vector<16x1xf32>
    %cst_38 = arith.constant 3.200000e+01 : f32
    %124 = vector.broadcast %cst_38 : f32 to vector<16x1xf32>
    %125 = arith.divf %123, %124 : vector<16x1xf32>
    %126 = vector.broadcast %118 : vector<16x1xf32> to vector<16x32xf32>
    %127 = arith.subf %112, %126 : vector<16x32xf32>
    %cst_39 = arith.constant 9.99999974E-6 : f32
    %128 = vector.broadcast %cst_39 : f32 to vector<16x1xf32>
    %129 = arith.addf %125, %128 : vector<16x1xf32>
    %130 = math.rsqrt %129 : vector<16x1xf32>
    %131 = vector.broadcast %130 : vector<16x1xf32> to vector<16x32xf32>
    %132 = arith.mulf %127, %131 : vector<16x32xf32>
    %133 = vector.broadcast %113 : vector<1x32xf32> to vector<16x32xf32>
    %134 = arith.mulf %132, %133 : vector<16x32xf32>
    %135 = vector.broadcast %114 : vector<1x32xf32> to vector<16x32xf32>
    %136 = arith.addf %134, %135 : vector<16x32xf32>
    %137 = arith.truncf %136 : vector<16x32xf32> to vector<16x32xbf16>
    %c0_40 = arith.constant 0 : index
    %c0_41 = arith.constant 0 : index
    %138 = vector.load %arg7[%c0_40, %c0_41] : memref<32x2048xbf16, #tpu.memory_space<vmem>>, vector<32x2048xbf16>
    %cst_42 = arith.constant dense<0.000000e+00> : vector<16x2048xf32>
    %139 = tpu.matmul %137, %138, %cst_42 {dimension_numbers = #tpu.dot_dimension_numbers<[1], [0], [0], [1], [0, 0, 1, 1], [], []>} : vector<16x32xbf16>, vector<32x2048xbf16>, vector<16x2048xf32> -> vector<16x2048xf32>
    %c0_43 = arith.constant 0 : index
    %c0_44 = arith.constant 0 : index
    %140 = vector.load %arg8[%c0_43, %c0_44] : memref<1x2048xf32, #tpu.memory_space<vmem>>, vector<1x2048xf32>
    %141 = vector.broadcast %140 : vector<1x2048xf32> to vector<16x2048xf32>
    %142 = arith.addf %139, %141 : vector<16x2048xf32>
    %cst_45 = arith.constant 0.000000e+00 : f32
    %143 = vector.broadcast %cst_45 : f32 to vector<16x2048xf32>
    %144 = arith.maximumf %142, %143 : vector<16x2048xf32>
    %145 = arith.truncf %144 : vector<16x2048xf32> to vector<16x2048xbf16>
    %c0_46 = arith.constant 0 : index
    %c0_47 = arith.constant 0 : index
    %146 = vector.load %arg9[%c0_46, %c0_47] : memref<2048x32xbf16, #tpu.memory_space<vmem>>, vector<2048x32xbf16>
    %cst_48 = arith.constant dense<0.000000e+00> : vector<16x32xf32>
    %147 = tpu.matmul %145, %146, %cst_48 {dimension_numbers = #tpu.dot_dimension_numbers<[1], [0], [0], [1], [0, 0, 1, 1], [], []>} : vector<16x2048xbf16>, vector<2048x32xbf16>, vector<16x32xf32> -> vector<16x32xf32>
    %c0_49 = arith.constant 0 : index
    %c0_50 = arith.constant 0 : index
    %148 = vector.load %arg10[%c0_49, %c0_50] : memref<1x32xf32, #tpu.memory_space<vmem>>, vector<1x32xf32>
    %149 = vector.broadcast %148 : vector<1x32xf32> to vector<16x32xf32>
    %150 = arith.addf %147, %149 : vector<16x32xf32>
    %151 = arith.addf %136, %150 : vector<16x32xf32>
    %c0_51 = arith.constant 0 : index
    %c0_52 = arith.constant 0 : index
    %152 = vector.load %arg11[%c0_51, %c0_52] : memref<1x32xf32, #tpu.memory_space<vmem>>, vector<1x32xf32>
    %c0_53 = arith.constant 0 : index
    %c0_54 = arith.constant 0 : index
    %153 = vector.load %arg12[%c0_53, %c0_54] : memref<1x32xf32, #tpu.memory_space<vmem>>, vector<1x32xf32>
    %cst_55 = arith.constant dense<0.000000e+00> : vector<16xf32>
    %154 = vector.multi_reduction <add>, %151, %cst_55 [1] : vector<16x32xf32> to vector<16xf32>
    %155 = vector.shape_cast %154 : vector<16xf32> to vector<16x1xf32>
    %cst_56 = arith.constant 3.200000e+01 : f32
    %156 = vector.broadcast %cst_56 : f32 to vector<16x1xf32>
    %157 = arith.divf %155, %156 : vector<16x1xf32>
    %158 = vector.broadcast %157 : vector<16x1xf32> to vector<16x32xf32>
    %159 = arith.subf %151, %158 : vector<16x32xf32>
    %160 = arith.mulf %159, %159 : vector<16x32xf32>
    %cst_57 = arith.constant dense<0.000000e+00> : vector<16xf32>
    %161 = vector.multi_reduction <add>, %160, %cst_57 [1] : vector<16x32xf32> to vector<16xf32>
    %162 = vector.shape_cast %161 : vector<16xf32> to vector<16x1xf32>
    %cst_58 = arith.constant 3.200000e+01 : f32
    %163 = vector.broadcast %cst_58 : f32 to vector<16x1xf32>
    %164 = arith.divf %162, %163 : vector<16x1xf32>
    %165 = vector.broadcast %157 : vector<16x1xf32> to vector<16x32xf32>
    %166 = arith.subf %151, %165 : vector<16x32xf32>
    %cst_59 = arith.constant 9.99999974E-6 : f32
    %167 = vector.broadcast %cst_59 : f32 to vector<16x1xf32>
    %168 = arith.addf %164, %167 : vector<16x1xf32>
    %169 = math.rsqrt %168 : vector<16x1xf32>
    %170 = vector.broadcast %169 : vector<16x1xf32> to vector<16x32xf32>
    %171 = arith.mulf %166, %170 : vector<16x32xf32>
    %172 = vector.broadcast %152 : vector<1x32xf32> to vector<16x32xf32>
    %173 = arith.mulf %171, %172 : vector<16x32xf32>
    %174 = vector.broadcast %153 : vector<1x32xf32> to vector<16x32xf32>
    %175 = arith.addf %173, %174 : vector<16x32xf32>
    %176 = arith.truncf %175 : vector<16x32xf32> to vector<16x32xbf16>
    %c0_60 = arith.constant 0 : index
    %c0_61 = arith.constant 0 : index
    %177 = vector.load %arg13[%c0_60, %c0_61] : memref<32x96xbf16, #tpu.memory_space<vmem>>, vector<32x96xbf16>
    %cst_62 = arith.constant dense<0.000000e+00> : vector<16x96xf32>
    %178 = tpu.matmul %176, %177, %cst_62 {dimension_numbers = #tpu.dot_dimension_numbers<[1], [0], [0], [1], [0, 0, 1, 1], [], []>} : vector<16x32xbf16>, vector<32x96xbf16>, vector<16x96xf32> -> vector<16x96xf32>
    %c0_63 = arith.constant 0 : index
    %c0_64 = arith.constant 0 : index
    %179 = vector.load %arg14[%c0_63, %c0_64] : memref<1x96xf32, #tpu.memory_space<vmem>>, vector<1x96xf32>
    %180 = vector.broadcast %179 : vector<1x96xf32> to vector<16x96xf32>
    %181 = arith.addf %178, %180 : vector<16x96xf32>
    %182 = vector.extract_strided_slice %181 {offsets = [0, 0], sizes = [16, 8], strides = [1, 1]} : vector<16x96xf32> to vector<16x8xf32>
    %cst_65 = arith.constant 0.353553385 : f32
    %183 = vector.broadcast %cst_65 : f32 to vector<16x8xf32>
    %184 = arith.mulf %182, %183 : vector<16x8xf32>
    %185 = vector.shape_cast %184 : vector<16x8xf32> to vector<2x8x8xf32>
    %186 = vector.extract_strided_slice %181 {offsets = [0, 32], sizes = [16, 8], strides = [1, 1]} : vector<16x96xf32> to vector<16x8xf32>
    %187 = vector.shape_cast %186 : vector<16x8xf32> to vector<2x8x8xf32>
    %188 = vector.extract_strided_slice %181 {offsets = [0, 64], sizes = [16, 8], strides = [1, 1]} : vector<16x96xf32> to vector<16x8xf32>
    %189 = vector.shape_cast %188 : vector<16x8xf32> to vector<2x8x8xf32>
    %190 = arith.truncf %185 : vector<2x8x8xf32> to vector<2x8x8xbf16>
    %191 = arith.truncf %187 : vector<2x8x8xf32> to vector<2x8x8xbf16>
    "tpu.trace_start"() <{level = 10 : i32, message = "bqd,bkd->bqk"}> : () -> ()
    %cst_66 = arith.constant dense<0.000000e+00> : vector<2x8x8xf32>
    %192 = tpu.matmul %190, %191, %cst_66 {dimension_numbers = #tpu.dot_dimension_numbers<[2], [2], [1], [1], [0, 0, 0, 1, 1, 1], [0], [0]>} : vector<2x8x8xbf16>, vector<2x8x8xbf16>, vector<2x8x8xf32> -> vector<2x8x8xf32>
    "tpu.trace_stop"() : () -> ()
    %cst_67 = arith.constant dense<0xFF800000> : vector<2x8xf32>
    %193 = vector.multi_reduction <maximumf>, %192, %cst_67 [2] : vector<2x8x8xf32> to vector<2x8xf32>
    %194 = vector.shape_cast %193 : vector<2x8xf32> to vector<2x8x1xf32>
    %195 = vector.broadcast %194 : vector<2x8x1xf32> to vector<2x8x8xf32>
    %196 = arith.subf %192, %195 : vector<2x8x8xf32>
    %197 = math.exp %196 : vector<2x8x8xf32>
    %cst_68 = arith.constant dense<0.000000e+00> : vector<2x8xf32>
    %198 = vector.multi_reduction <add>, %197, %cst_68 [2] : vector<2x8x8xf32> to vector<2x8xf32>
    %199 = vector.shape_cast %198 : vector<2x8xf32> to vector<2x8x1xf32>
    %200 = tpu.reciprocal %199 {approx = true} : vector<2x8x1xf32> -> vector<2x8x1xf32>
    %201 = vector.broadcast %200 : vector<2x8x1xf32> to vector<2x8x8xf32>
    %202 = arith.mulf %197, %201 : vector<2x8x8xf32>
    %203 = arith.truncf %202 : vector<2x8x8xf32> to vector<2x8x8xbf16>
    %204 = arith.truncf %189 : vector<2x8x8xf32> to vector<2x8x8xbf16>
    "tpu.trace_start"() <{level = 10 : i32, message = "bqk,bkd->bqd"}> : () -> ()
    %cst_69 = arith.constant dense<0.000000e+00> : vector<2x8x8xf32>
    %205 = tpu.matmul %203, %204, %cst_69 {dimension_numbers = #tpu.dot_dimension_numbers<[2], [1], [1], [2], [0, 0, 0, 1, 1, 2], [0], [0]>} : vector<2x8x8xbf16>, vector<2x8x8xbf16>, vector<2x8x8xf32> -> vector<2x8x8xf32>
    "tpu.trace_stop"() : () -> ()
    %206 = vector.extract_strided_slice %181 {offsets = [0, 8], sizes = [16, 8], strides = [1, 1]} : vector<16x96xf32> to vector<16x8xf32>
    %cst_70 = arith.constant 0.353553385 : f32
    %207 = vector.broadcast %cst_70 : f32 to vector<16x8xf32>
    %208 = arith.mulf %206, %207 : vector<16x8xf32>
    %209 = vector.shape_cast %208 : vector<16x8xf32> to vector<2x8x8xf32>
    %210 = vector.extract_strided_slice %181 {offsets = [0, 40], sizes = [16, 8], strides = [1, 1]} : vector<16x96xf32> to vector<16x8xf32>
    %211 = vector.shape_cast %210 : vector<16x8xf32> to vector<2x8x8xf32>
    %212 = vector.extract_strided_slice %181 {offsets = [0, 72], sizes = [16, 8], strides = [1, 1]} : vector<16x96xf32> to vector<16x8xf32>
    %213 = vector.shape_cast %212 : vector<16x8xf32> to vector<2x8x8xf32>
    %214 = arith.truncf %209 : vector<2x8x8xf32> to vector<2x8x8xbf16>
    %215 = arith.truncf %211 : vector<2x8x8xf32> to vector<2x8x8xbf16>
    "tpu.trace_start"() <{level = 10 : i32, message = "bqd,bkd->bqk"}> : () -> ()
    %cst_71 = arith.constant dense<0.000000e+00> : vector<2x8x8xf32>
    %216 = tpu.matmul %214, %215, %cst_71 {dimension_numbers = #tpu.dot_dimension_numbers<[2], [2], [1], [1], [0, 0, 0, 1, 1, 1], [0], [0]>} : vector<2x8x8xbf16>, vector<2x8x8xbf16>, vector<2x8x8xf32> -> vector<2x8x8xf32>
    "tpu.trace_stop"() : () -> ()
    %cst_72 = arith.constant dense<0xFF800000> : vector<2x8xf32>
    %217 = vector.multi_reduction <maximumf>, %216, %cst_72 [2] : vector<2x8x8xf32> to vector<2x8xf32>
    %218 = vector.shape_cast %217 : vector<2x8xf32> to vector<2x8x1xf32>
    %219 = vector.broadcast %218 : vector<2x8x1xf32> to vector<2x8x8xf32>
    %220 = arith.subf %216, %219 : vector<2x8x8xf32>
    %221 = math.exp %220 : vector<2x8x8xf32>
    %cst_73 = arith.constant dense<0.000000e+00> : vector<2x8xf32>
    %222 = vector.multi_reduction <add>, %221, %cst_73 [2] : vector<2x8x8xf32> to vector<2x8xf32>
    %223 = vector.shape_cast %222 : vector<2x8xf32> to vector<2x8x1xf32>
    %224 = tpu.reciprocal %223 {approx = true} : vector<2x8x1xf32> -> vector<2x8x1xf32>
    %225 = vector.broadcast %224 : vector<2x8x1xf32> to vector<2x8x8xf32>
    %226 = arith.mulf %221, %225 : vector<2x8x8xf32>
    %227 = arith.truncf %226 : vector<2x8x8xf32> to vector<2x8x8xbf16>
    %228 = arith.truncf %213 : vector<2x8x8xf32> to vector<2x8x8xbf16>
    "tpu.trace_start"() <{level = 10 : i32, message = "bqk,bkd->bqd"}> : () -> ()
    %cst_74 = arith.constant dense<0.000000e+00> : vector<2x8x8xf32>
    %229 = tpu.matmul %227, %228, %cst_74 {dimension_numbers = #tpu.dot_dimension_numbers<[2], [1], [1], [2], [0, 0, 0, 1, 1, 2], [0], [0]>} : vector<2x8x8xbf16>, vector<2x8x8xbf16>, vector<2x8x8xf32> -> vector<2x8x8xf32>
    "tpu.trace_stop"() : () -> ()
    %230 = vector.extract_strided_slice %181 {offsets = [0, 16], sizes = [16, 8], strides = [1, 1]} : vector<16x96xf32> to vector<16x8xf32>
    %cst_75 = arith.constant 0.353553385 : f32
    %231 = vector.broadcast %cst_75 : f32 to vector<16x8xf32>
    %232 = arith.mulf %230, %231 : vector<16x8xf32>
    %233 = vector.shape_cast %232 : vector<16x8xf32> to vector<2x8x8xf32>
    %234 = vector.extract_strided_slice %181 {offsets = [0, 48], sizes = [16, 8], strides = [1, 1]} : vector<16x96xf32> to vector<16x8xf32>
    %235 = vector.shape_cast %234 : vector<16x8xf32> to vector<2x8x8xf32>
    %236 = vector.extract_strided_slice %181 {offsets = [0, 80], sizes = [16, 8], strides = [1, 1]} : vector<16x96xf32> to vector<16x8xf32>
    %237 = vector.shape_cast %236 : vector<16x8xf32> to vector<2x8x8xf32>
    %238 = arith.truncf %233 : vector<2x8x8xf32> to vector<2x8x8xbf16>
    %239 = arith.truncf %235 : vector<2x8x8xf32> to vector<2x8x8xbf16>
    "tpu.trace_start"() <{level = 10 : i32, message = "bqd,bkd->bqk"}> : () -> ()
    %cst_76 = arith.constant dense<0.000000e+00> : vector<2x8x8xf32>
    %240 = tpu.matmul %238, %239, %cst_76 {dimension_numbers = #tpu.dot_dimension_numbers<[2], [2], [1], [1], [0, 0, 0, 1, 1, 1], [0], [0]>} : vector<2x8x8xbf16>, vector<2x8x8xbf16>, vector<2x8x8xf32> -> vector<2x8x8xf32>
    "tpu.trace_stop"() : () -> ()
    %cst_77 = arith.constant dense<0xFF800000> : vector<2x8xf32>
    %241 = vector.multi_reduction <maximumf>, %240, %cst_77 [2] : vector<2x8x8xf32> to vector<2x8xf32>
    %242 = vector.shape_cast %241 : vector<2x8xf32> to vector<2x8x1xf32>
    %243 = vector.broadcast %242 : vector<2x8x1xf32> to vector<2x8x8xf32>
    %244 = arith.subf %240, %243 : vector<2x8x8xf32>
    %245 = math.exp %244 : vector<2x8x8xf32>
    %cst_78 = arith.constant dense<0.000000e+00> : vector<2x8xf32>
    %246 = vector.multi_reduction <add>, %245, %cst_78 [2] : vector<2x8x8xf32> to vector<2x8xf32>
    %247 = vector.shape_cast %246 : vector<2x8xf32> to vector<2x8x1xf32>
    %248 = tpu.reciprocal %247 {approx = true} : vector<2x8x1xf32> -> vector<2x8x1xf32>
    %249 = vector.broadcast %248 : vector<2x8x1xf32> to vector<2x8x8xf32>
    %250 = arith.mulf %245, %249 : vector<2x8x8xf32>
    %251 = arith.truncf %250 : vector<2x8x8xf32> to vector<2x8x8xbf16>
    %252 = arith.truncf %237 : vector<2x8x8xf32> to vector<2x8x8xbf16>
    "tpu.trace_start"() <{level = 10 : i32, message = "bqk,bkd->bqd"}> : () -> ()
    %cst_79 = arith.constant dense<0.000000e+00> : vector<2x8x8xf32>
    %253 = tpu.matmul %251, %252, %cst_79 {dimension_numbers = #tpu.dot_dimension_numbers<[2], [1], [1], [2], [0, 0, 0, 1, 1, 2], [0], [0]>} : vector<2x8x8xbf16>, vector<2x8x8xbf16>, vector<2x8x8xf32> -> vector<2x8x8xf32>
    "tpu.trace_stop"() : () -> ()
    %254 = vector.extract_strided_slice %181 {offsets = [0, 24], sizes = [16, 8], strides = [1, 1]} : vector<16x96xf32> to vector<16x8xf32>
    %cst_80 = arith.constant 0.353553385 : f32
    %255 = vector.broadcast %cst_80 : f32 to vector<16x8xf32>
    %256 = arith.mulf %254, %255 : vector<16x8xf32>
    %257 = vector.shape_cast %256 : vector<16x8xf32> to vector<2x8x8xf32>
    %258 = vector.extract_strided_slice %181 {offsets = [0, 56], sizes = [16, 8], strides = [1, 1]} : vector<16x96xf32> to vector<16x8xf32>
    %259 = vector.shape_cast %258 : vector<16x8xf32> to vector<2x8x8xf32>
    %260 = vector.extract_strided_slice %181 {offsets = [0, 88], sizes = [16, 8], strides = [1, 1]} : vector<16x96xf32> to vector<16x8xf32>
    %261 = vector.shape_cast %260 : vector<16x8xf32> to vector<2x8x8xf32>
    %262 = arith.truncf %257 : vector<2x8x8xf32> to vector<2x8x8xbf16>
    %263 = arith.truncf %259 : vector<2x8x8xf32> to vector<2x8x8xbf16>
    "tpu.trace_start"() <{level = 10 : i32, message = "bqd,bkd->bqk"}> : () -> ()
    %cst_81 = arith.constant dense<0.000000e+00> : vector<2x8x8xf32>
    %264 = tpu.matmul %262, %263, %cst_81 {dimension_numbers = #tpu.dot_dimension_numbers<[2], [2], [1], [1], [0, 0, 0, 1, 1, 1], [0], [0]>} : vector<2x8x8xbf16>, vector<2x8x8xbf16>, vector<2x8x8xf32> -> vector<2x8x8xf32>
    "tpu.trace_stop"() : () -> ()
    %cst_82 = arith.constant dense<0xFF800000> : vector<2x8xf32>
    %265 = vector.multi_reduction <maximumf>, %264, %cst_82 [2] : vector<2x8x8xf32> to vector<2x8xf32>
    %266 = vector.shape_cast %265 : vector<2x8xf32> to vector<2x8x1xf32>
    %267 = vector.broadcast %266 : vector<2x8x1xf32> to vector<2x8x8xf32>
    %268 = arith.subf %264, %267 : vector<2x8x8xf32>
    %269 = math.exp %268 : vector<2x8x8xf32>
    %cst_83 = arith.constant dense<0.000000e+00> : vector<2x8xf32>
    %270 = vector.multi_reduction <add>, %269, %cst_83 [2] : vector<2x8x8xf32> to vector<2x8xf32>
    %271 = vector.shape_cast %270 : vector<2x8xf32> to vector<2x8x1xf32>
    %272 = tpu.reciprocal %271 {approx = true} : vector<2x8x1xf32> -> vector<2x8x1xf32>
    %273 = vector.broadcast %272 : vector<2x8x1xf32> to vector<2x8x8xf32>
    %274 = arith.mulf %269, %273 : vector<2x8x8xf32>
    %275 = arith.truncf %274 : vector<2x8x8xf32> to vector<2x8x8xbf16>
    %276 = arith.truncf %261 : vector<2x8x8xf32> to vector<2x8x8xbf16>
    "tpu.trace_start"() <{level = 10 : i32, message = "bqk,bkd->bqd"}> : () -> ()
    %cst_84 = arith.constant dense<0.000000e+00> : vector<2x8x8xf32>
    %277 = tpu.matmul %275, %276, %cst_84 {dimension_numbers = #tpu.dot_dimension_numbers<[2], [1], [1], [2], [0, 0, 0, 1, 1, 2], [0], [0]>} : vector<2x8x8xbf16>, vector<2x8x8xbf16>, vector<2x8x8xf32> -> vector<2x8x8xf32>
    "tpu.trace_stop"() : () -> ()
    %278 = tpu.concatenate %205, %229, %253, %277 in 2 : vector<2x8x8xf32>, vector<2x8x8xf32>, vector<2x8x8xf32>, vector<2x8x8xf32> -> vector<2x8x32xf32>
    %279 = vector.shape_cast %278 : vector<2x8x32xf32> to vector<16x32xf32>
    %280 = arith.truncf %279 : vector<16x32xf32> to vector<16x32xbf16>
    %c0_85 = arith.constant 0 : index
    %c0_86 = arith.constant 0 : index
    %281 = vector.load %arg15[%c0_85, %c0_86] : memref<32x32xbf16, #tpu.memory_space<vmem>>, vector<32x32xbf16>
    %cst_87 = arith.constant dense<0.000000e+00> : vector<16x32xf32>
    %282 = tpu.matmul %280, %281, %cst_87 {dimension_numbers = #tpu.dot_dimension_numbers<[1], [0], [0], [1], [0, 0, 1, 1], [], []>} : vector<16x32xbf16>, vector<32x32xbf16>, vector<16x32xf32> -> vector<16x32xf32>
    %c0_88 = arith.constant 0 : index
    %c0_89 = arith.constant 0 : index
    %283 = vector.load %arg16[%c0_88, %c0_89] : memref<1x32xf32, #tpu.memory_space<vmem>>, vector<1x32xf32>
    %284 = vector.broadcast %283 : vector<1x32xf32> to vector<16x32xf32>
    %285 = arith.addf %282, %284 : vector<16x32xf32>
    %286 = arith.addf %175, %285 : vector<16x32xf32>
    %c0_90 = arith.constant 0 : index
    %c0_91 = arith.constant 0 : index
    %287 = vector.load %arg17[%c0_90, %c0_91] : memref<1x32xf32, #tpu.memory_space<vmem>>, vector<1x32xf32>
    %c0_92 = arith.constant 0 : index
    %c0_93 = arith.constant 0 : index
    %288 = vector.load %arg18[%c0_92, %c0_93] : memref<1x32xf32, #tpu.memory_space<vmem>>, vector<1x32xf32>
    %cst_94 = arith.constant dense<0.000000e+00> : vector<16xf32>
    %289 = vector.multi_reduction <add>, %286, %cst_94 [1] : vector<16x32xf32> to vector<16xf32>
    %290 = vector.shape_cast %289 : vector<16xf32> to vector<16x1xf32>
    %cst_95 = arith.constant 3.200000e+01 : f32
    %291 = vector.broadcast %cst_95 : f32 to vector<16x1xf32>
    %292 = arith.divf %290, %291 : vector<16x1xf32>
    %293 = vector.broadcast %292 : vector<16x1xf32> to vector<16x32xf32>
    %294 = arith.subf %286, %293 : vector<16x32xf32>
    %295 = arith.mulf %294, %294 : vector<16x32xf32>
    %cst_96 = arith.constant dense<0.000000e+00> : vector<16xf32>
    %296 = vector.multi_reduction <add>, %295, %cst_96 [1] : vector<16x32xf32> to vector<16xf32>
    %297 = vector.shape_cast %296 : vector<16xf32> to vector<16x1xf32>
    %cst_97 = arith.constant 3.200000e+01 : f32
    %298 = vector.broadcast %cst_97 : f32 to vector<16x1xf32>
    %299 = arith.divf %297, %298 : vector<16x1xf32>
    %300 = vector.broadcast %292 : vector<16x1xf32> to vector<16x32xf32>
    %301 = arith.subf %286, %300 : vector<16x32xf32>
    %cst_98 = arith.constant 9.99999974E-6 : f32
    %302 = vector.broadcast %cst_98 : f32 to vector<16x1xf32>
    %303 = arith.addf %299, %302 : vector<16x1xf32>
    %304 = math.rsqrt %303 : vector<16x1xf32>
    %305 = vector.broadcast %304 : vector<16x1xf32> to vector<16x32xf32>
    %306 = arith.mulf %301, %305 : vector<16x32xf32>
    %307 = vector.broadcast %287 : vector<1x32xf32> to vector<16x32xf32>
    %308 = arith.mulf %306, %307 : vector<16x32xf32>
    %309 = vector.broadcast %288 : vector<1x32xf32> to vector<16x32xf32>
    %310 = arith.addf %308, %309 : vector<16x32xf32>
    %311 = vector.shape_cast %310 : vector<16x32xf32> to vector<2x8x32xf32>
    %312 = vector.extract_strided_slice %311 {offsets = [0, 7, 0], sizes = [2, 1, 32], strides = [1, 1, 1]} : vector<2x8x32xf32> to vector<2x1x32xf32>
    %313 = vector.shape_cast %312 : vector<2x1x32xf32> to vector<2x32xf32>
    %314 = arith.truncf %313 : vector<2x32xf32> to vector<2x32xbf16>
    %c0_99 = arith.constant 0 : index
    %c0_100 = arith.constant 0 : index
    %315 = vector.load %arg19[%c0_99, %c0_100] : memref<32x2048xbf16, #tpu.memory_space<vmem>>, vector<32x2048xbf16>
    %cst_101 = arith.constant dense<0.000000e+00> : vector<2x2048xf32>
    %316 = tpu.matmul %314, %315, %cst_101 {dimension_numbers = #tpu.dot_dimension_numbers<[1], [0], [0], [1], [0, 0, 1, 1], [], []>} : vector<2x32xbf16>, vector<32x2048xbf16>, vector<2x2048xf32> -> vector<2x2048xf32>
    %c0_102 = arith.constant 0 : index
    %c0_103 = arith.constant 0 : index
    %317 = vector.load %arg20[%c0_102, %c0_103] : memref<1x2048xf32, #tpu.memory_space<vmem>>, vector<1x2048xf32>
    %318 = vector.broadcast %317 : vector<1x2048xf32> to vector<2x2048xf32>
    %319 = arith.addf %316, %318 : vector<2x2048xf32>
    %cst_104 = arith.constant 0.000000e+00 : f32
    %320 = vector.broadcast %cst_104 : f32 to vector<2x2048xf32>
    %321 = arith.maximumf %319, %320 : vector<2x2048xf32>
    %322 = arith.truncf %321 : vector<2x2048xf32> to vector<2x2048xbf16>
    %c0_105 = arith.constant 0 : index
    %c0_106 = arith.constant 0 : index
    %323 = vector.load %arg21[%c0_105, %c0_106] : memref<2048x32xbf16, #tpu.memory_space<vmem>>, vector<2048x32xbf16>
    %cst_107 = arith.constant dense<0.000000e+00> : vector<2x32xf32>
    %324 = tpu.matmul %322, %323, %cst_107 {dimension_numbers = #tpu.dot_dimension_numbers<[1], [0], [0], [1], [0, 0, 1, 1], [], []>} : vector<2x2048xbf16>, vector<2048x32xbf16>, vector<2x32xf32> -> vector<2x32xf32>
    %c0_108 = arith.constant 0 : index
    %c0_109 = arith.constant 0 : index
    %325 = vector.load %arg22[%c0_108, %c0_109] : memref<1x32xf32, #tpu.memory_space<vmem>>, vector<1x32xf32>
    %326 = vector.broadcast %325 : vector<1x32xf32> to vector<2x32xf32>
    %327 = arith.addf %324, %326 : vector<2x32xf32>
    %328 = arith.addf %313, %327 : vector<2x32xf32>
    %c0_110 = arith.constant 0 : index
    %c0_111 = arith.constant 0 : index
    %329 = vector.load %arg23[%c0_110, %c0_111] : memref<1x32xf32, #tpu.memory_space<vmem>>, vector<1x32xf32>
    %c0_112 = arith.constant 0 : index
    %c0_113 = arith.constant 0 : index
    %330 = vector.load %arg24[%c0_112, %c0_113] : memref<1x32xf32, #tpu.memory_space<vmem>>, vector<1x32xf32>
    %cst_114 = arith.constant dense<0.000000e+00> : vector<2xf32>
    %331 = vector.multi_reduction <add>, %328, %cst_114 [1] : vector<2x32xf32> to vector<2xf32>
    %332 = vector.shape_cast %331 : vector<2xf32> to vector<2x1xf32>
    %cst_115 = arith.constant 3.200000e+01 : f32
    %333 = vector.broadcast %cst_115 : f32 to vector<2x1xf32>
    %334 = arith.divf %332, %333 : vector<2x1xf32>
    %335 = vector.broadcast %334 : vector<2x1xf32> to vector<2x32xf32>
    %336 = arith.subf %328, %335 : vector<2x32xf32>
    %337 = arith.mulf %336, %336 : vector<2x32xf32>
    %cst_116 = arith.constant dense<0.000000e+00> : vector<2xf32>
    %338 = vector.multi_reduction <add>, %337, %cst_116 [1] : vector<2x32xf32> to vector<2xf32>
    %339 = vector.shape_cast %338 : vector<2xf32> to vector<2x1xf32>
    %cst_117 = arith.constant 3.200000e+01 : f32
    %340 = vector.broadcast %cst_117 : f32 to vector<2x1xf32>
    %341 = arith.divf %339, %340 : vector<2x1xf32>
    %342 = vector.broadcast %334 : vector<2x1xf32> to vector<2x32xf32>
    %343 = arith.subf %328, %342 : vector<2x32xf32>
    %cst_118 = arith.constant 9.99999974E-6 : f32
    %344 = vector.broadcast %cst_118 : f32 to vector<2x1xf32>
    %345 = arith.addf %341, %344 : vector<2x1xf32>
    %346 = math.rsqrt %345 : vector<2x1xf32>
    %347 = vector.broadcast %346 : vector<2x1xf32> to vector<2x32xf32>
    %348 = arith.mulf %343, %347 : vector<2x32xf32>
    %349 = vector.broadcast %329 : vector<1x32xf32> to vector<2x32xf32>
    %350 = arith.mulf %348, %349 : vector<2x32xf32>
    %351 = vector.broadcast %330 : vector<1x32xf32> to vector<2x32xf32>
    %352 = arith.addf %350, %351 : vector<2x32xf32>
    %353 = arith.truncf %352 : vector<2x32xf32> to vector<2x32xbf16>
    %c0_119 = arith.constant 0 : index
    %c0_120 = arith.constant 0 : index
    %354 = vector.load %arg25[%c0_119, %c0_120] : memref<32x4xbf16, #tpu.memory_space<vmem>>, vector<32x4xbf16>
    %cst_121 = arith.constant dense<0.000000e+00> : vector<2x4xf32>
    %355 = tpu.matmul %353, %354, %cst_121 {dimension_numbers = #tpu.dot_dimension_numbers<[1], [0], [0], [1], [0, 0, 1, 1], [], []>} : vector<2x32xbf16>, vector<32x4xbf16>, vector<2x4xf32> -> vector<2x4xf32>
    %c0_122 = arith.constant 0 : index
    %c0_123 = arith.constant 0 : index
    %356 = vector.load %arg26[%c0_122, %c0_123] : memref<1x4xf32, #tpu.memory_space<vmem>>, vector<1x4xf32>
    %357 = vector.broadcast %356 : vector<1x4xf32> to vector<2x4xf32>
    %358 = arith.addf %355, %357 : vector<2x4xf32>
    %cst_124 = arith.constant dense<0xFF800000> : vector<2xf32>
    %359 = vector.multi_reduction <maximumf>, %358, %cst_124 [1] : vector<2x4xf32> to vector<2xf32>
    %360 = vector.shape_cast %359 : vector<2xf32> to vector<2x1xf32>
    %361 = vector.broadcast %360 : vector<2x1xf32> to vector<2x4xf32>
    %362 = arith.subf %358, %361 : vector<2x4xf32>
    %363 = math.exp %362 : vector<2x4xf32>
    %cst_125 = arith.constant dense<0.000000e+00> : vector<2xf32>
    %364 = vector.multi_reduction <add>, %363, %cst_125 [1] : vector<2x4xf32> to vector<2xf32>
    %365 = vector.shape_cast %364 : vector<2xf32> to vector<2x1xf32>
    %366 = vector.broadcast %365 : vector<2x1xf32> to vector<2x4xf32>
    %367 = arith.divf %363, %366 : vector<2x4xf32>
    %c0_126 = arith.constant 0 : index
    %c0_127 = arith.constant 0 : index
    %368 = vector.load %arg27[%c0_126, %c0_127] : memref<2x4xf32, #tpu.memory_space<vmem>>, vector<2x4xf32>
    tpu.vector_store %arg27[%c0_126, %c0_127], %367 {strides = array<i32>} : memref<2x4xf32, #tpu.memory_space<vmem>>, vector<2x4xf32>,
    return
  }
}

</mosaic_0001>

<bundles_post_ra>
// kernel: transformer_net_forward.1
= control target key start
LH: loop header
LB: loop body
LE: loop exit
PB: predicated region body
PF: predicated region fallthrough
CT: control target
= control target key end

     0   :  { %s9879_s0 = inlined_call_operand.vmem [shape: f32[2,8,32], index: 0, kind: input, shape index: {}]   ;;  %s9880_s1 = inlined_call_operand.vmem [shape: bf16[32,96], index: 1, kind: input, shape index: {}]   ;;  %s9881_s2 = inlined_call_operand.vmem [shape: f32[1,96], index: 2, kind: input, shape index: {}]   ;;  %s9882_s3 = inlined_call_operand.vmem [shape: bf16[32,32], index: 3, kind: input, shape index: {}]   ;;  %s9883_s4 = inlined_call_operand.vmem [shape: f32[1,32], index: 4, kind: input, shape index: {}]   ;;  %s9884_s5 = inlined_call_operand.vmem [shape: f32[1,32], index: 5, kind: input, shape index: {}]   ;;  %s9885_s6 = inlined_call_operand.vmem [shape: f32[1,32], index: 6, kind: input, shape index: {}]   ;;  %s9886_s7 = inlined_call_operand.vmem [shape: bf16[32,2048], index: 7, kind: input, shape index: {}]   ;;  %s9887_s8 = inlined_call_operand.vmem [shape: f32[1,2048], index: 8, kind: input, shape index: {}]   ;;  %s9888_s9 = inlined_call_operand.vmem [shape: bf16[2048,32], index: 9, kind: input, shape index: {}]   ;;  %s9889_s10 = inlined_call_operand.vmem [shape: f32[1,32], index: 10, kind: input, shape index: {}]   ;;  %s9890_s11 = inlined_call_operand.vmem [shape: f32[1,32], index: 11, kind: input, shape index: {}]   ;;  %s9891_s12 = inlined_call_operand.vmem [shape: f32[1,32], index: 12, kind: input, shape index: {}]   ;;  %s9892_s13 = inlined_call_operand.vmem [shape: bf16[32,96], index: 13, kind: input, shape index: {}]   ;;  %s9893_s14 = inlined_call_operand.vmem [shape: f32[1,96], index: 14, kind: input, shape index: {}]   ;;  %s9894_s15 = inlined_call_operand.vmem [shape: bf16[32,32], index: 15, kind: input, shape index: {}]   ;;  %s9895_s16 = inlined_call_operand.vmem [shape: f32[1,32], index: 16, kind: input, shape index: {}]   ;;  %s9896_s17 = inlined_call_operand.vmem [shape: f32[1,32], index: 17, kind: input, shape index: {}]   ;;  %s9897_s18 = inlined_call_operand.vmem [shape: f32[1,32], index: 18, kind: input, shape index: {}]   ;;  %s9898_s19 = inlined_call_operand.vmem [shape: bf16[32,2048], index: 19, kind: input, shape index: {}]   ;;  %s9899_s20 = inlined_call_operand.vmem [shape: f32[1,2048], index: 20, kind: input, shape index: {}]   ;;  %s9900_s21 = inlined_call_operand.vmem [shape: bf16[2048,32], index: 21, kind: input, shape index: {}]   ;;  %s9901_s22 = inlined_call_operand.vmem [shape: f32[1,32], index: 22, kind: input, shape index: {}]   ;;  %s9902_s23 = inlined_call_operand.vmem [shape: f32[1,32], index: 23, kind: input, shape index: {}]   ;;  %s9903_s24 = inlined_call_operand.vmem [shape: f32[1,32], index: 24, kind: input, shape index: {}]   ;;  %s9904_s25 = inlined_call_operand.vmem [shape: bf16[32,4], index: 25, kind: input, shape index: {}]   ;;  %s9905_s26 = inlined_call_operand.vmem [shape: f32[1,4], index: 26, kind: input, shape index: {}]   ;;  %s9906_s27 = inlined_call_operand.hbm [shape: f32[2,4], index: 27, kind: output, shape index: {}]  }
   0x1   :  { %9934 = sst [smem:[#allocation5_spill]] %s9879_s0 }
   0x2   :  { %9935 = sst [smem:[#allocation6_spill]] %s9880_s1 }
   0x3   :  { %9936 = sst [smem:[#allocation7_spill]] %s9881_s2 }
   0x4   :  { %9937 = sst [smem:[#allocation8_spill]] %s9882_s3 }
   0x5   :  { %9938 = sst [smem:[#allocation9_spill]] %s9883_s4 }
   0x6   :  { %9939 = sst [smem:[#allocation10_spill]] %s9884_s5 }
   0x7   :  { %9940 = sst [smem:[#allocation11_spill]] %s9885_s6 }
   0x8   :  { %9941 = sst [smem:[#allocation12_spill]] %s9886_s7 }
   0x9   :  { %9942 = sst [smem:[#allocation13_spill]] %s9887_s8 }
   0xa   :  { %9943 = sst [smem:[#allocation14_spill]] %s9888_s9 }
   0xb   :  { %9944 = sst [smem:[#allocation15_spill]] %s9889_s10 }
   0xc   :  { %9945 = sst [smem:[#allocation16_spill]] %s9890_s11 }
   0xd   :  { %s9946_s8 = sld [smem:[#allocation6_spill]]  ;;  %v8029_v1 = vmov 0.0   ;;  %vm8030_vm0 = vmmov 0   ;;  %vm114_vm1 = vcmask 261120  }
   0xe   :  { %7375 = vmatprep.subr.bf16.mxu0 %v8029_v1  ;;  %7383 = vmatprep.subr.bf16.mxu1 %v8029_v1  ;;  %s9947_s0 = sld [smem:[#allocation5_spill]] }
   0xf   :  { %7379 = vmatprep.mubr.msk.bf16.mxu0 %vm8030_vm0, %v8029_v1  ;;  %7385 = vmatprep.mubr.msk.bf16.mxu1 %vm8030_vm0, %v8029_v1 }
  0x13   :  { %v7655_v0 = vld [vmem:[%s9946_s8 + $0x8] sm:$0xff]   ;;  %v7656_v2 = vld [vmem:[%s9946_s8] sm:$0xff]  }
  0x14   :  { %7376 = vmatpush3.bf16.msra.mxu0 %v7655_v0  ;;  %v88_v3 = vld [vmem:[%s9947_s0] sm:$0xff]  ;;  %v89_v4 = vld [vmem:[%s9947_s0 + $0x8] sm:$0xff] }
  0x15   :  { %7377 = vmatprep.subr.bf16.mxu0 %v8029_v1  ;;  %v90_v5 = vpack.c.bf16 %v89_v4, %v88_v3 }
  0x18   :  { %7378 = vmatpush3.bf16.msra.mxu0 %v7656_v2 }
  0x19   :  { %7389 = vmatprep.subr.bf16.mxu0 %v8029_v1 }
  0x1b   :  { %7380 = vmatmul.mubr.msk.bf16.vlgmr.msra.gmra.mxu0 %vm114_vm1, %v90_v5 }
  0x1c   :  { %7391 = vmatprep.mubr.msk.bf16.mxu0 %vm8030_vm0, %v8029_v1 }
  0x1d   :  { %32 = vsyncpa [#allocation3], 0  ;;  %s9948_s11 = sld [smem:[#allocation7_spill]]  ;;  %s8031_s2 = smov 96   ;;  %vm168_vm2 = vcmask 64512   ;;  %vm293_vm3 = vcmask 1043456  }
  0x1e   :  { %s8032_s3 = smov 64   ;;  %s9932_s7 = smov 88   ;;  %vm1073_vm4 = vcmask 130048   ;;  %vm1076_vm5 = vcmask 195584   ;;  %vm4493_vm6 = vcmask 1041409   ;;  %vm6384_vm7 = vcmask 261127  }
  0x1f   :  { %s9930_s4 = smov 120   ;;  %s9928_s8 = smov 56   ;;  %vm6388_vm8 = vcmask 253952   ;;  %vm6519_vm9 = vcmask 25600  }
  0x20   :  { %s9926_s30 = smov 80   ;;  %s9924_s9 = smov 112  }
  0x21   :  { %s9922_s5 = smov 48   ;;  %s9919_s28 = smov 72  }
  0x22   :  { %s9917_s10 = smov 104   ;;  %s9915_s29 = smov 40  }
  0x23   :  { %v6546_v6 = vld [vmem:[%s9948_s11] ss:$0 sm:$0xff]  ;;  %s9914_s1 = smov 8   ;;  %s9913_s6 = smov 16  }
  0x24   :  { %s9954_s11 = sld [smem:[#allocation14_spill]] }
  0xdb   :  { %v152_v7 = vpop.f32.mrf.mxu0 }
  0xdc   :  { %v153_v8 = vadd.f32 %v6546_v6, %v152_v7 }
  0xdd   :  { %v7381_v9 = vpop.f32.mrf.mxu0 }
  0xde   :  { %v8213_v10 = vpack.c.bf16 %v153_v8, %v153_v8  ;;  %v159_v17 = vmul.f32 0.35355338, %v153_v8 }
  0xdf   :  { %v155_v11 = vpop.f32.mrf.mxu0 }
  0xe0   :  { %v156_v12 = vadd.f32 %v6546_v6, %v155_v11  ;;  %166 = vrot.lane.b32.xlu0 %v8213_v10, %s8031_s2  ;;  %v8224_v20 = vpack.c.bf16 %v159_v17, %v159_v17 }
  0xe1   :  { %v7382_v13 = vpop.f32.mrf.mxu0 }
  0xe2   :  { %v8217_v14 = vpack.c.bf16 %v156_v12, %v156_v12  ;;  %v160_v21 = vmul.f32 0.35355338, %v156_v12 }
  0xe4   :  { %216 = vrot.lane.b32.xlu0 %v8217_v14, %s8031_s2  ;;  %v8231_v22 = vpack.c.bf16 %v160_v21, %v160_v21 }
 0x152   :  { %v167_v15 = vpop.permute.xlu0 %166 }
 0x153   :  { %v173_v16 = vsel %vm168_vm2, %v167_v15, 0 }
 0x154   :  { %7384 = vmatpush3.bf16.xpose.msra.mxu1 %v173_v16 }
 0x155   :  { %7395 = vmatprep.subr.bf16.mxu1 %v8029_v1 }
 0x156   :  { %v217_v18 = vpop.permute.xlu0 %216 }
 0x157   :  { %v222_v19 = vsel %vm168_vm2, %v217_v18, 0 }
 0x158   :  { %7390 = vmatpush3.bf16.xpose.msra.mxu0 %v222_v19 }
 0x159   :  { %7401 = vmatprep.subr.bf16.mxu0 %v8029_v1 }
 0x15b   :  { %7386 = vmatmul.mubr.msk.bf16.vlgmr.msra.gmra.mxu1 %vm168_vm2, %v8224_v20 }
 0x15c   :  { %7397 = vmatprep.mubr.msk.bf16.mxu1 %vm8030_vm0, %v8029_v1 }
 0x15f   :  { %7392 = vmatmul.mubr.msk.bf16.vlgmr.msra.gmra.mxu0 %vm168_vm2, %v8231_v22 }
 0x160   :  { %7403 = vmatprep.mubr.msk.bf16.mxu0 %vm8030_vm0, %v8029_v1 }
 0x21b   :  { %v209_v23 = vpop.f32.mrf.mxu1 }
 0x21c   :  { %v264_v24 = vsel %vm168_vm2, %v209_v23, -inf }
 0x21d   :  { %265 = vmax.xlane.f32.xlu1 %v264_v24  ;;  %v7387_v25 = vpop.f32.mrf.mxu1 }
 0x21f   :  { %v212_v26 = vpop.f32.mrf.mxu1  ;;  %v258_v27 = vpop.f32.mrf.mxu0 }
 0x220   :  { %v267_v28 = vsel %vm168_vm2, %v258_v27, -inf }
 0x221   :  { %v7388_v29 = vpop.f32.mrf.mxu1  ;;  %268 = vmax.xlane.f32.xlu1 %v267_v28  ;;  %v7393_v30 = vpop.f32.mrf.mxu0 }
 0x223   :  { %v261_v31 = vpop.f32.mrf.mxu0 }
 0x225   :  { %v7394_v32 = vpop.f32.mrf.mxu0 }
 0x232   :  { %288 = vrot.lane.b32.xlu1 %v8213_v10, %s8032_s3 }
 0x236   :  { %337 = vrot.lane.b32.xlu1 %v8217_v14, %s8032_s3 }
 0x23a   :  { %388 = vrot.lane.b32.xlu1 %v8213_v10, %s9932_s7 }
 0x2a6   :  { %v266_v33 = vpop.xlane.xlu1 %265 }
 0x2a7   :  { %v270_v34 = vsub.f32 %v209_v23, %v266_v33 }
 0x2a9   :  { %v272_v35 = vmul.f32 1.442695, %v270_v34 }
 0x2aa   :  { %v269_v36 = vpop.xlane.xlu1 %268 }
 0x2ab   :  { %7921 = vpow2.f32 %v272_v35  ;;  %v271_v37 = vsub.f32 %v258_v27, %v269_v36 }
 0x2ad   :  { %v274_v38 = vmul.f32 1.442695, %v271_v37 }
 0x2ae   :  { %v289_v39 = vpop.permute.xlu1 %288 }
 0x2af   :  { %7923 = vpow2.f32 %v274_v38  ;;  %v295_v40 = vsel %vm293_vm3, %v289_v39, 0 }
 0x2b0   :  { %7396 = vmatpush3.bf16.msra.mxu1 %v295_v40 }
 0x2b1   :  { %7407 = vmatprep.subr.bf16.mxu1 %v8029_v1 }
 0x2b2   :  { %v338_v41 = vpop.permute.xlu1 %337 }
 0x2b3   :  { %v343_v42 = vsel %vm293_vm3, %v338_v41, 0 }
 0x2b4   :  { %7402 = vmatpush3.bf16.msra.mxu0 %v343_v42 }
 0x2b5   :  { %7413 = vmatprep.subr.bf16.mxu0 %v8029_v1 }
 0x2b6   :  { %v389_v47 = vpop.permute.xlu1 %388 }
 0x2b7   :  { %v394_v54 = vsel %vm168_vm2, %v389_v47, 0 }
 0x2b8   :  { %v7922_v43 = vpop.eup %7921 }
 0x2b9   :  { %v276_v44 = vsel %vm168_vm2, %v7922_v43, 0.0 }
 0x2ba   :  { %277 = vadd.xlane.f32.xlu0 %v276_v44 }
 0x2bc   :  { %v7924_v45 = vpop.eup %7923 }
 0x2bd   :  { %v279_v46 = vsel %vm168_vm2, %v7924_v45, 0.0 }
 0x2be   :  { %280 = vadd.xlane.f32.xlu1 %v279_v46 }
 0x2cf   :  { %439 = vrot.lane.b32.xlu1 %v8217_v14, %s9932_s7  ;;  %s9968_s7 = smov 16  }
 0x2d0   :  { %386 = vrot.lane.b32.xlu0 %v8224_v20, %s9930_s4 }
 0x2d3   :  { %437 = vrot.lane.b32.xlu1 %v8231_v22, %s9930_s4 }
 0x343   :  { %v278_v48 = vpop.xlane.xlu0 %277 }
 0x344   :  { %7925 = vrcp.f32 %v278_v48 }
 0x347   :  { %v281_v49 = vpop.xlane.xlu1 %280  ;;  %v387_v59 = vpop.permute.xlu0 %386 }
 0x348   :  { %7927 = vrcp.f32 %v281_v49 }
 0x34b   :  { %v440_v56 = vpop.permute.xlu1 %439 }
 0x34c   :  { %v445_v58 = vsel %vm168_vm2, %v440_v56, 0 }
 0x34f   :  { %v438_v60 = vpop.permute.xlu1 %437 }
 0x351   :  { %v7926_v50 = vpop.eup %7925 }
 0x352   :  { %v284_v51 = vmul.f32 %v7926_v50, %v7922_v43 }
 0x354   :  { %v286_v52 = vpack.c.bf16 %v284_v51, %v284_v51 }
 0x355   :  { %v7928_v53 = vpop.eup %7927 }
 0x356   :  { %7398 = vmatmul.mubr.msk.bf16.vlgmr.msra.gmra.mxu1 %vm168_vm2, %v286_v52  ;;  %v285_v55 = vmul.f32 %v7928_v53, %v7924_v45 }
 0x357   :  { %7408 = vmatpush3.bf16.xpose.msra.mxu1 %v394_v54  ;;  %7409 = vmatprep.mubr.msk.bf16.mxu1 %vm8030_vm0, %v8029_v1 }
 0x358   :  { %v287_v57 = vpack.c.bf16 %v285_v55, %v285_v55  ;;  %7419 = vmatprep.subr.bf16.mxu1 %v8029_v1 }
 0x35a   :  { %7404 = vmatmul.mubr.msk.bf16.vlgmr.msra.gmra.mxu0 %vm168_vm2, %v287_v57 }
 0x35b   :  { %7414 = vmatpush3.bf16.xpose.msra.mxu0 %v445_v58  ;;  %7415 = vmatprep.mubr.msk.bf16.mxu0 %vm8030_vm0, %v8029_v1 }
 0x35c   :  { %7425 = vmatprep.subr.bf16.mxu0 %v8029_v1 }
 0x35e   :  { %7410 = vmatmul.mubr.msk.bf16.vlgmr.msra.gmra.mxu1 %vm168_vm2, %v387_v59 }
 0x35f   :  { %7421 = vmatprep.mubr.msk.bf16.mxu1 %vm8030_vm0, %v8029_v1 }
 0x362   :  { %7416 = vmatmul.mubr.msk.bf16.vlgmr.msra.gmra.mxu0 %vm168_vm2, %v438_v60 }
 0x363   :  { %7427 = vmatprep.mubr.msk.bf16.mxu0 %vm8030_vm0, %v8029_v1 }
 0x416   :  { %v8273_v61 = vpop.f32.mrf.mxu1 }
 0x418   :  { %v7399_v62 = vpop.f32.mrf.mxu1 }
 0x41a   :  { %v334_v63 = vpop.f32.mrf.mxu1  ;;  %v8275_v0 = vpop.f32.mrf.mxu0 }
 0x41c   :  { %v7400_v2 = vpop.f32.mrf.mxu1  ;;  %v7405_v3 = vpop.f32.mrf.mxu0 }
 0x41e   :  { %v382_v4 = vpop.f32.mrf.mxu0  ;;  %v430_v5 = vpop.f32.mrf.mxu1 }
 0x41f   :  { %v487_v6 = vsel %vm168_vm2, %v430_v5, -inf }
 0x420   :  { %488 = vmax.xlane.f32.xlu1 %v487_v6  ;;  %v7406_v7 = vpop.f32.mrf.mxu0  ;;  %v7411_v8 = vpop.f32.mrf.mxu1 }
 0x422   :  { %v433_v9 = vpop.f32.mrf.mxu1  ;;  %v481_v11 = vpop.f32.mrf.mxu0 }
 0x423   :  { %v490_v12 = vsel %vm168_vm2, %v481_v11, -inf }
 0x424   :  { %v7412_v13 = vpop.f32.mrf.mxu1  ;;  %491 = vmax.xlane.f32.xlu0 %v490_v12  ;;  %v7417_v15 = vpop.f32.mrf.mxu0 }
 0x426   :  { %v484_v16 = vpop.f32.mrf.mxu0 }
 0x428   :  { %v7418_v17 = vpop.f32.mrf.mxu0 }
 0x431   :  { %511 = vrot.lane.b32.xlu1 %v8213_v10, %s9928_s8 }
 0x435   :  { %609 = vrot.lane.b32.xlu1 %v8213_v10, %s9926_s30 }
 0x43a   :  { %559 = vrot.lane.b32.xlu0 %v8217_v14, %s9928_s8  ;;  %s9966_s8 = smov 40  }
 0x43e   :  { %607 = vrot.lane.b32.xlu0 %v8224_v20, %s9924_s9 }
 0x4a9   :  { %v489_v18 = vpop.xlane.xlu1 %488 }
 0x4aa   :  { %v493_v19 = vsub.f32 %v430_v5, %v489_v18 }
 0x4ac   :  { %v495_v21 = vmul.f32 1.442695, %v493_v19 }
 0x4ad   :  { %v512_v23 = vpop.permute.xlu1 %511  ;;  %v492_v24 = vpop.xlane.xlu0 %491 }
 0x4ae   :  { %7929 = vpow2.f32 %v495_v21  ;;  %v517_v25 = vsel %vm293_vm3, %v512_v23, 0  ;;  %v494_v26 = vsub.f32 %v481_v11, %v492_v24 }
 0x4af   :  { %7420 = vmatpush3.bf16.msra.mxu1 %v517_v25 }
 0x4b0   :  { %v497_v27 = vmul.f32 1.442695, %v494_v26  ;;  %7431 = vmatprep.subr.bf16.mxu1 %v8029_v1 }
 0x4b1   :  { %v560_v28 = vpop.permute.xlu0 %559  ;;  %v610_v34 = vpop.permute.xlu1 %609 }
 0x4b2   :  { %7931 = vpow2.f32 %v497_v27  ;;  %v565_v29 = vsel %vm293_vm3, %v560_v28, 0  ;;  %v615_v41 = vsel %vm168_vm2, %v610_v34, 0 }
 0x4b3   :  { %7426 = vmatpush3.bf16.msra.mxu0 %v565_v29 }
 0x4b4   :  { %7437 = vmatprep.subr.bf16.mxu0 %v8029_v1 }
 0x4b5   :  { %v608_v46 = vpop.permute.xlu0 %607 }
 0x4bb   :  { %v7930_v30 = vpop.eup %7929 }
 0x4bc   :  { %v499_v31 = vsel %vm168_vm2, %v7930_v30, 0.0 }
 0x4bd   :  { %500 = vadd.xlane.f32.xlu1 %v499_v31 }
 0x4bf   :  { %v7932_v32 = vpop.eup %7931 }
 0x4c0   :  { %v502_v33 = vsel %vm168_vm2, %v7932_v32, 0.0 }
 0x4c1   :  { %503 = vadd.xlane.f32.xlu1 %v502_v33 }
 0x4d2   :  { %659 = vrot.lane.b32.xlu1 %v8217_v14, %s9926_s30  ;;  %s9967_s30 = smov 8  }
 0x4d6   :  { %657 = vrot.lane.b32.xlu1 %v8231_v22, %s9924_s9  ;;  %s9963_s9 = smov 48  }
 0x546   :  { %v501_v35 = vpop.xlane.xlu1 %500 }
 0x547   :  { %7933 = vrcp.f32 %v501_v35 }
 0x54a   :  { %v504_v36 = vpop.xlane.xlu1 %503 }
 0x54b   :  { %7935 = vrcp.f32 %v504_v36 }
 0x54e   :  { %v660_v43 = vpop.permute.xlu1 %659 }
 0x54f   :  { %v665_v45 = vsel %vm168_vm2, %v660_v43, 0 }
 0x552   :  { %v658_v47 = vpop.permute.xlu1 %657 }
 0x554   :  { %v7934_v37 = vpop.eup %7933 }
 0x555   :  { %v507_v38 = vmul.f32 %v7934_v37, %v7930_v30 }
 0x557   :  { %v509_v39 = vpack.c.bf16 %v507_v38, %v507_v38 }
 0x558   :  { %v7936_v40 = vpop.eup %7935 }
 0x559   :  { %7422 = vmatmul.mubr.msk.bf16.vlgmr.msra.gmra.mxu1 %vm168_vm2, %v509_v39  ;;  %v508_v42 = vmul.f32 %v7936_v40, %v7932_v32 }
 0x55a   :  { %7432 = vmatpush3.bf16.xpose.msra.mxu1 %v615_v41  ;;  %7433 = vmatprep.mubr.msk.bf16.mxu1 %vm8030_vm0, %v8029_v1 }
 0x55b   :  { %v510_v44 = vpack.c.bf16 %v508_v42, %v508_v42  ;;  %7443 = vmatprep.subr.bf16.mxu1 %v8029_v1 }
 0x55d   :  { %7428 = vmatmul.mubr.msk.bf16.vlgmr.msra.gmra.mxu0 %vm168_vm2, %v510_v44 }
 0x55e   :  { %7438 = vmatpush3.bf16.xpose.msra.mxu0 %v665_v45  ;;  %7439 = vmatprep.mubr.msk.bf16.mxu0 %vm8030_vm0, %v8029_v1 }
 0x55f   :  { %7449 = vmatprep.subr.bf16.mxu0 %v8029_v1 }
 0x561   :  { %7434 = vmatmul.mubr.msk.bf16.vlgmr.msra.gmra.mxu1 %vm168_vm2, %v608_v46 }
 0x562   :  { %7445 = vmatprep.mubr.msk.bf16.mxu1 %vm8030_vm0, %v8029_v1 }
 0x565   :  { %7440 = vmatmul.mubr.msk.bf16.vlgmr.msra.gmra.mxu0 %vm168_vm2, %v658_v47 }
 0x566   :  { %7451 = vmatprep.mubr.msk.bf16.mxu0 %vm8030_vm0, %v8029_v1 }
 0x619   :  { %v8313_v48 = vpop.f32.mrf.mxu1 }
 0x61b   :  { %v7423_v49 = vpop.f32.mrf.mxu1 }
 0x61d   :  { %v556_v50 = vpop.f32.mrf.mxu1  ;;  %v8315_v51 = vpop.f32.mrf.mxu0 }
 0x61e   :  { %v7625_v52 = vpack.i.bf16 %v8315_v51, %v8313_v48 }
 0x61f   :  { %v7424_v53 = vpop.f32.mrf.mxu1  ;;  %v7429_v54 = vpop.f32.mrf.mxu0 }
 0x621   :  { %v604_v55 = vpop.f32.mrf.mxu0  ;;  %v651_v56 = vpop.f32.mrf.mxu1 }
 0x622   :  { %v707_v57 = vsel %vm168_vm2, %v651_v56, -inf }
 0x623   :  { %708 = vmax.xlane.f32.xlu0 %v707_v57  ;;  %v7430_v58 = vpop.f32.mrf.mxu0  ;;  %v7435_v59 = vpop.f32.mrf.mxu1 }
 0x625   :  { %v654_v60 = vpop.f32.mrf.mxu1  ;;  %v701_v62 = vpop.f32.mrf.mxu0 }
 0x626   :  { %v710_v63 = vsel %vm168_vm2, %v701_v62, -inf }
 0x627   :  { %v7436_v2 = vpop.f32.mrf.mxu1  ;;  %711 = vmax.xlane.f32.xlu1 %v710_v63  ;;  %v7441_v3 = vpop.f32.mrf.mxu0 }
 0x629   :  { %v704_v4 = vpop.f32.mrf.mxu0 }
 0x62b   :  { %v7442_v5 = vpop.f32.mrf.mxu0 }
 0x638   :  { %731 = vrot.lane.b32.xlu1 %v8213_v10, %s9922_s5 }
 0x63c   :  { %829 = vrot.lane.b32.xlu1 %v8213_v10, %s9919_s28 }
 0x640   :  { %879 = vrot.lane.b32.xlu1 %v8217_v14, %s9919_s28  ;;  %s9921_s28 = smov 24  }
 0x644   :  { %877 = vrot.lane.b32.xlu1 %v8231_v22, %s9917_s10 }
 0x6ac   :  { %v709_v6 = vpop.xlane.xlu0 %708 }
 0x6ad   :  { %v713_v7 = vsub.f32 %v651_v56, %v709_v6 }
 0x6af   :  { %v715_v8 = vmul.f32 1.442695, %v713_v7 }
 0x6b0   :  { %v712_v9 = vpop.xlane.xlu1 %711 }
 0x6b1   :  { %7937 = vpow2.f32 %v715_v8  ;;  %v714_v11 = vsub.f32 %v701_v62, %v712_v9 }
 0x6b3   :  { %v717_v12 = vmul.f32 1.442695, %v714_v11 }
 0x6b4   :  { %v732_v13 = vpop.permute.xlu1 %731 }
 0x6b5   :  { %7939 = vpow2.f32 %v717_v12  ;;  %v737_v15 = vsel %vm293_vm3, %v732_v13, 0 }
 0x6b6   :  { %7444 = vmatpush3.bf16.msra.mxu1 %v737_v15 }
 0x6b7   :  { %7455 = vmatprep.subr.bf16.mxu1 %v8029_v1 }
 0x6b8   :  { %v830_v26 = vpop.permute.xlu1 %829 }
 0x6b9   :  { %v835_v30 = vsel %vm168_vm2, %v830_v26, 0 }
 0x6bc   :  { %v880_v31 = vpop.permute.xlu1 %879 }
 0x6bd   :  { %v885_v33 = vsel %vm168_vm2, %v880_v31, 0 }
 0x6be   :  { %v7938_v16 = vpop.eup %7937 }
 0x6bf   :  { %v719_v17 = vsel %vm168_vm2, %v7938_v16, 0.0 }
 0x6c0   :  { %720 = vadd.xlane.f32.xlu0 %v719_v17  ;;  %v878_v35 = vpop.permute.xlu1 %877 }
 0x6c2   :  { %v7940_v18 = vpop.eup %7939 }
 0x6c3   :  { %v722_v22 = vsel %vm168_vm2, %v7940_v18, 0.0 }
 0x6c4   :  { %723 = vadd.xlane.f32.xlu0 %v722_v22 }
 0x6da   :  { %779 = vrot.lane.b32.xlu0 %v8217_v14, %s9922_s5  ;;  %s9956_s5 = sld [smem:[#allocation15_spill]] }
 0x6de   :  { %827 = vrot.lane.b32.xlu0 %v8224_v20, %s9917_s10  ;;  %s9952_s10 = sld [smem:[#allocation10_spill]] }
 0x749   :  { %v721_v19 = vpop.xlane.xlu0 %720 }
 0x74a   :  { %7941 = vrcp.f32 %v721_v19 }
 0x74d   :  { %v724_v21 = vpop.xlane.xlu0 %723 }
 0x74e   :  { %7943 = vrcp.f32 %v724_v21 }
 0x751   :  { %v780_v23 = vpop.permute.xlu0 %779 }
 0x752   :  { %v785_v24 = vsel %vm293_vm3, %v780_v23, 0 }
 0x753   :  { %7450 = vmatpush3.bf16.msra.mxu0 %v785_v24 }
 0x754   :  { %7461 = vmatprep.subr.bf16.mxu0 %v8029_v1 }
 0x755   :  { %v828_v34 = vpop.permute.xlu0 %827 }
 0x757   :  { %v7942_v25 = vpop.eup %7941 }
 0x758   :  { %v727_v27 = vmul.f32 %v7942_v25, %v7938_v16 }
 0x75a   :  { %v729_v28 = vpack.c.bf16 %v727_v27, %v727_v27 }
 0x75b   :  { %v7944_v29 = vpop.eup %7943 }
 0x75c   :  { %7446 = vmatmul.mubr.msk.bf16.vlgmr.msra.gmra.mxu1 %vm168_vm2, %v729_v28  ;;  %v728_v20 = vmul.f32 %v7944_v29, %v7940_v18 }
 0x75d   :  { %7456 = vmatpush3.bf16.xpose.msra.mxu1 %v835_v30  ;;  %7457 = vmatprep.mubr.msk.bf16.mxu1 %vm8030_vm0, %v8029_v1 }
 0x75e   :  { %v730_v32 = vpack.c.bf16 %v728_v20, %v728_v20  ;;  %7467 = vmatprep.subr.bf16.mxu1 %v8029_v1 }
 0x760   :  { %7452 = vmatmul.mubr.msk.bf16.vlgmr.msra.gmra.mxu0 %vm168_vm2, %v730_v32 }
 0x761   :  { %7462 = vmatpush3.bf16.xpose.msra.mxu0 %v885_v33  ;;  %7463 = vmatprep.mubr.msk.bf16.mxu0 %vm8030_vm0, %v8029_v1 }
 0x762   :  { %7473 = vmatprep.subr.bf16.mxu0 %v8029_v1 }
 0x764   :  { %7458 = vmatmul.mubr.msk.bf16.vlgmr.msra.gmra.mxu1 %vm168_vm2, %v828_v34 }
 0x765   :  { %7469 = vmatprep.mubr.msk.bf16.mxu1 %vm8030_vm0, %v8029_v1 }
 0x768   :  { %7464 = vmatmul.mubr.msk.bf16.vlgmr.msra.gmra.mxu0 %vm168_vm2, %v878_v35 }
 0x769   :  { %7475 = vmatprep.mubr.msk.bf16.mxu0 %vm8030_vm0, %v8029_v1 }
 0x81c   :  { %v773_v36 = vpop.f32.mrf.mxu1 }
 0x81e   :  { %v7447_v37 = vpop.f32.mrf.mxu1 }
 0x820   :  { %v776_v38 = vpop.f32.mrf.mxu1  ;;  %v821_v39 = vpop.f32.mrf.mxu0 }
 0x821   :  { %v7630_v57 = vpack.i.bf16 %v821_v39, %v773_v36 }
 0x822   :  { %v7448_v40 = vpop.f32.mrf.mxu1  ;;  %v7453_v41 = vpop.f32.mrf.mxu0 }
 0x824   :  { %v824_v42 = vpop.f32.mrf.mxu0  ;;  %v871_v43 = vpop.f32.mrf.mxu1 }
 0x825   :  { %v927_v44 = vsel %vm168_vm2, %v871_v43, -inf }
 0x826   :  { %928 = vmax.xlane.f32.xlu0 %v927_v44  ;;  %v7454_v45 = vpop.f32.mrf.mxu0  ;;  %v7459_v46 = vpop.f32.mrf.mxu1 }
 0x827   :  { %v8005_v45 = vld [vmem:[%s9947_s0] sm:$0xff] }
 0x828   :  { %v874_v47 = vpop.f32.mrf.mxu1  ;;  %v921_v49 = vpop.f32.mrf.mxu0 }
 0x829   :  { %v930_v50 = vsel %vm168_vm2, %v921_v49, -inf }
 0x82a   :  { %v7460_v53 = vpop.f32.mrf.mxu1  ;;  %931 = vmax.xlane.f32.xlu1 %v930_v50  ;;  %v7465_v54 = vpop.f32.mrf.mxu0 }
 0x82b   :  { %v8006_v54 = vld [vmem:[%s9947_s0 + $0x8] sm:$0xff]  ;;  %s9965_s0 = smov 104  }
 0x82c   :  { %v924_v55 = vpop.f32.mrf.mxu0 }
 0x82e   :  { %v7466_v56 = vpop.f32.mrf.mxu0 }
 0x83b   :  { %951 = vrot.lane.b32.xlu1 %v8213_v10, %s9915_s29 }
 0x83f   :  { %7626 = vrot.lane.b32.xlu1 %v7625_v52, %s9914_s1  ;;  %s9949_s1 = sld [smem:[#allocation8_spill]] }
 0x843   :  { %7631 = vrot.lane.b32.xlu1 %v7630_v57, %s9913_s6  ;;  %s9953_s6 = sld [smem:[#allocation11_spill]] }
 0x845   :  { %v7658_v17 = vld [vmem:[%s9949_s1] sm:$0xff]  }
 0x8af   :  { %v929_v58 = vpop.xlane.xlu0 %928 }
 0x8b0   :  { %v933_v59 = vsub.f32 %v871_v43, %v929_v58 }
 0x8b2   :  { %v935_v60 = vmul.f32 1.442695, %v933_v59 }
 0x8b3   :  { %v932_v62 = vpop.xlane.xlu1 %931 }
 0x8b4   :  { %7945 = vpow2.f32 %v935_v60  ;;  %v934_v63 = vsub.f32 %v921_v49, %v932_v62 }
 0x8b6   :  { %v937_v2 = vmul.f32 1.442695, %v934_v63 }
 0x8b7   :  { %v952_v3 = vpop.permute.xlu1 %951 }
 0x8b8   :  { %7947 = vpow2.f32 %v937_v2  ;;  %v957_v10 = vsel %vm293_vm3, %v952_v3, 0 }
 0x8b9   :  { %7468 = vmatpush3.bf16.msra.mxu1 %v957_v10 }
 0x8ba   :  { %7479 = vmatprep.subr.bf16.mxu1 %v8029_v1 }
 0x8bb   :  { %v7627_v28 = vpop.permute.xlu1 %7626 }
 0x8bc   :  { %v7629_v30 = vunpack.i.h.bf16 %v7627_v28  ;;  %v7628_v20 = vunpack.i.l.bf16 %v7627_v28 }
 0x8be   :  { %v1072_v34 = vsel %vm168_vm2, %v8275_v0, %v7629_v30  ;;  %v1071_v35 = vsel %vm168_vm2, %v8273_v61, %v7628_v20 }
 0x8bf   :  { %v7632_v29 = vpop.permute.xlu1 %7631 }
 0x8c0   :  { %v7634_v31 = vunpack.i.h.bf16 %v7632_v29  ;;  %v7633_v32 = vunpack.i.l.bf16 %v7632_v29 }
 0x8c1   :  { %v7946_v48 = vpop.eup %7945 }
 0x8c2   :  { %v939_v51 = vsel %vm168_vm2, %v7946_v48, 0.0  ;;  %v1074_v38 = vsel %vm1073_vm4, %v1071_v35, %v7633_v32  ;;  %v1075_v39 = vsel %vm1073_vm4, %v1072_v34, %v7634_v31 }
 0x8c3   :  { %940 = vadd.xlane.f32.xlu0 %v939_v51 }
 0x8c5   :  { %v7948_v52 = vpop.eup %7947 }
 0x8c6   :  { %v942_v4 = vsel %vm168_vm2, %v7948_v52, 0.0 }
 0x8c7   :  { %943 = vadd.xlane.f32.xlu0 %v942_v4 }
 0x8dd   :  { %999 = vrot.lane.b32.xlu0 %v8217_v14, %s9915_s29  ;;  %v7657_v14 = vld [vmem:[%s9949_s1 + $0x8] sm:$0xff]   ;;  %s9950_s1 = sld [smem:[#allocation9_spill]]  ;;  %s9969_s29 = smov 24  }
 0x8e3   :  { %v6566_v0 = vld [vmem:[%s9950_s1] ss:$0 sm:$0xff]  ;;  %s9955_s1 = sld [smem:[#allocation13_spill]] }
 0x94c   :  { %v941_v5 = vpop.xlane.xlu0 %940 }
 0x94d   :  { %7949 = vrcp.f32 %v941_v5 }
 0x950   :  { %v944_v6 = vpop.xlane.xlu0 %943 }
 0x951   :  { %7951 = vrcp.f32 %v944_v6 }
 0x954   :  { %v1000_v7 = vpop.permute.xlu0 %999 }
 0x955   :  { %v1005_v8 = vsel %vm293_vm3, %v1000_v7, 0 }
 0x956   :  { %7474 = vmatpush3.bf16.msra.mxu0 %v1005_v8 }
 0x95a   :  { %v7950_v9 = vpop.eup %7949 }
 0x95b   :  { %v947_v11 = vmul.f32 %v7950_v9, %v7946_v48 }
 0x95d   :  { %v949_v12 = vpack.c.bf16 %v947_v11, %v947_v11 }
 0x95e   :  { %v7952_v13 = vpop.eup %7951 }
 0x95f   :  { %7470 = vmatmul.mubr.msk.bf16.vlgmr.msra.gmra.mxu1 %vm168_vm2, %v949_v12  ;;  %v948_v15 = vmul.f32 %v7952_v13, %v7948_v52 }
 0x960   :  { %7483 = vmatprep.mubr.msk.bf16.mxu1 %vm8030_vm0, %v8029_v1  ;;  %7480 = vmatpush3.bf16.msra.mxu1 %v7657_v14 }
 0x961   :  { %v950_v16 = vpack.c.bf16 %v948_v15, %v948_v15  ;;  %7481 = vmatprep.subr.bf16.mxu1 %v8029_v1 }
 0x963   :  { %7476 = vmatmul.mubr.msk.bf16.vlgmr.msra.gmra.mxu0 %vm168_vm2, %v950_v16 }
 0x964   :  { %7482 = vmatpush3.bf16.msra.mxu1 %v7658_v17 }
 0xa1f   :  { %v993_v18 = vpop.f32.mrf.mxu1 }
 0xa21   :  { %v7471_v22 = vpop.f32.mrf.mxu1 }
 0xa23   :  { %v996_v19 = vpop.f32.mrf.mxu1  ;;  %v1041_v21 = vpop.f32.mrf.mxu0 }
 0xa24   :  { %v7635_v23 = vpack.i.bf16 %v1041_v21, %v993_v18 }
 0xa25   :  { %v7472_v24 = vpop.f32.mrf.mxu1  ;;  %v7477_v25 = vpop.f32.mrf.mxu0 }
 0xa26   :  { %7636 = vrot.lane.b32.xlu0 %v7635_v23, %s9921_s28  ;;  %s9951_s28 = sld [smem:[#allocation12_spill]]  ;;  %v8045_v23 = vmov 0  }
 0xa27   :  { %v1044_v26 = vpop.f32.mrf.mxu0  ;;  %1506 = vmatprep.mubr.bf16.mxu0 %v8045_v23 }
 0xa29   :  { %v7478_v27 = vpop.f32.mrf.mxu0 }
 0xa2c   :  { %v1211_v51 = vld [vmem:[%s9951_s28 + $0x80] sm:$0xff]  ;;  %v1212_v4 = vld [vmem:[%s9951_s28 + $0x88] sm:$0xff]  ;;  %v1213_v22 = vld [vmem:[%s9951_s28 + $0x90] sm:$0xff] }
 0xa2d   :  { %v1219_v52 = vld [vmem:[%s9951_s28 + $0xc0] sm:$0xff]  ;;  %v1220_v6 = vld [vmem:[%s9951_s28 + $0xc8] sm:$0xff]  ;;  %v1221_v19 = vld [vmem:[%s9951_s28 + $0xd0] sm:$0xff] }
 0xa2e   :  { %v6589_v5 = vcombine.high %v1211_v51, %v1219_v52  ;;  %v6588_v7 = vcombine.low %v1211_v51, %v1219_v52  ;;  %v6590_v8 = vcombine.low %v1212_v4, %v1220_v6  ;;  %v6591_v9 = vcombine.high %v1212_v4, %v1220_v6  ;;  %v1195_v11 = vld [vmem:[%s9951_s28] sm:$0xff]  ;;  %v1196_v13 = vld [vmem:[%s9951_s28 + $0x8] sm:$0xff]  ;;  %v1214_v21 = vld [vmem:[%s9951_s28 + $0x98] sm:$0xff] }
 0xa2f   :  { %v1203_v12 = vld [vmem:[%s9951_s28 + $0x40] sm:$0xff]  ;;  %v1204_v16 = vld [vmem:[%s9951_s28 + $0x48] sm:$0xff]  ;;  %v6593_v24 = vcombine.high %v1213_v22, %v1221_v19  ;;  %v1222_v25 = vld [vmem:[%s9951_s28 + $0xd8] sm:$0xff]  ;;  %v6592_v26 = vcombine.low %v1213_v22, %v1221_v19 }
 0xa30   :  { %1486 = vmatprep.subr.bf16.mxu0 %v6589_v5  ;;  %1529 = vmatprep.subr.bf16.mxu1 %v6591_v9  ;;  %v6573_v15 = vcombine.high %v1195_v11, %v1203_v12  ;;  %v6572_v14 = vcombine.low %v1195_v11, %v1203_v12  ;;  %v6574_v17 = vcombine.low %v1196_v13, %v1204_v16  ;;  %v1217_v52 = vld [vmem:[%s9951_s28 + $0xb0] sm:$0xff]  ;;  %v1218_v5 = vld [vmem:[%s9951_s28 + $0xb8] sm:$0xff] }
 0xa31   :  { %1487 = vmatpush1.bf16.msra.mxu0 %v6588_v7  ;;  %v6575_v18 = vcombine.high %v1196_v13, %v1204_v16  ;;  %v6594_v27 = vcombine.low %v1214_v21, %v1222_v25  ;;  %v6595_v28 = vcombine.high %v1214_v21, %v1222_v25  ;;  %v1225_v4 = vld [vmem:[%s9951_s28 + $0xf0] sm:$0xff]  ;;  %v1226_v6 = vld [vmem:[%s9951_s28 + $0xf8] sm:$0xff] }
 0xa32   :  { %1488 = vmatprep.subr.bf16.mxu0 %v6573_v15  ;;  %v6601_v9 = vcombine.high %v1217_v52, %v1225_v4  ;;  %v6603_v11 = vcombine.high %v1218_v5, %v1226_v6  ;;  %v1201_v12 = vld [vmem:[%s9951_s28 + $0x30] sm:$0xff]  ;;  %v1202_v15 = vld [vmem:[%s9951_s28 + $0x38] sm:$0xff] }
 0xa33   :  { %v1209_v13 = vld [vmem:[%s9951_s28 + $0x70] sm:$0xff]  ;;  %v1210_v16 = vld [vmem:[%s9951_s28 + $0x78] sm:$0xff] }
 0xa34   :  { %v6587_v22 = vcombine.high %v1202_v15, %v1210_v16  ;;  %v6584_v19 = vcombine.low %v1201_v12, %v1209_v13  ;;  %v6586_v21 = vcombine.low %v1202_v15, %v1210_v16  ;;  %v7660_v25 = vld [vmem:[%s9954_s11 + $0xf8] sm:$0xff]  }
 0xa35   :  { %1489 = vmatpush1.bf16.msra.mxu0 %v6572_v14  ;;  %v6600_v14 = vcombine.low %v1217_v52, %v1225_v4 }
 0xa36   :  { %1572 = vmatprep.subr.bf16.mxu0 %v6593_v24  ;;  %v7659_v24 = vld [vmem:[%s9954_s11 + $0x78] sm:$0xff]  }
 0xa98   :  { %v7637_v33 = vpop.permute.xlu0 %7636 }
 0xa99   :  { %v7639_v36 = vunpack.i.h.bf16 %v7637_v33  ;;  %v7638_v37 = vunpack.i.l.bf16 %v7637_v33 }
 0xa9b   :  { %v1078_v40 = vsel %vm1076_vm5, %v1075_v39, %v7639_v36  ;;  %v1077_v41 = vsel %vm1076_vm5, %v1074_v38, %v7638_v37  ;;  %v6570_v36 = vld [vmem:[%s9952_s10] ss:$0 sm:$0xff] }
 0xa9c   :  { %v1079_v42 = vpack.c.bf16 %v1078_v40, %v1077_v41  ;;  %v6571_v40 = vld [vmem:[%s9953_s6] ss:$0 sm:$0xff] }
 0xa9e   :  { %7484 = vmatmul.mubr.msk.bf16.vlgmr.msra.gmra.mxu1 %vm114_vm1, %v1079_v42  ;;  %v1197_v42 = vld [vmem:[%s9951_s28 + $0x10] sm:$0xff] }
 0xa9f   :  { %1530 = vmatpush1.bf16.msra.mxu1 %v6590_v8  ;;  %1549 = vmatprep.mubr.bf16.mxu1 %v8045_v23 }
 0xaa0   :  { %1531 = vmatprep.subr.bf16.mxu1 %v6575_v18  ;;  %v6585_v18 = vcombine.high %v1201_v12, %v1209_v13 }
 0xaa3   :  { %1532 = vmatpush1.bf16.msra.mxu1 %v6574_v17  ;;  %v6602_v17 = vcombine.low %v1218_v5, %v1226_v6 }
 0xaa4   :  { %1615 = vmatprep.subr.bf16.mxu1 %v6595_v28  ;;  %v7663_v28 = vld [vmem:[%s9954_s11 + $0x70] sm:$0xff]  }
 0xb5e   :  { %v1140_v43 = vpop.f32.mrf.mxu1 }
 0xb5f   :  { %v1141_v44 = vadd.f32 %v6566_v0, %v1140_v43  ;;  %v1198_v43 = vld [vmem:[%s9951_s28 + $0x18] sm:$0xff] }
 0xb60   :  { %v7485_v61 = vpop.f32.mrf.mxu1 }
 0xb61   :  { %v1147_v46 = vadd.f32 %v8005_v45, %v1141_v44  ;;  %v1206_v44 = vld [vmem:[%s9951_s28 + $0x58] sm:$0xff] }
 0xb62   :  { %v1143_v47 = vpop.f32.mrf.mxu1 }
 0xb63   :  { %v1144_v49 = vadd.f32 %v6566_v0, %v1143_v47  ;;  %v1151_v50 = vsel %vm114_vm1, %v1147_v46, 0.0  ;;  %v1205_v0 = vld [vmem:[%s9951_s28 + $0x50] sm:$0xff] }
 0xb64   :  { %1152 = vadd.xlane.f32.xlu1 %v1151_v50  ;;  %v7486_v53 = vpop.f32.mrf.mxu1  ;;  %v6577_v47 = vcombine.high %v1197_v42, %v1205_v0  ;;  %v1215_v50 = vld [vmem:[%s9951_s28 + $0xa0] sm:$0xff] }
 0xb65   :  { %v1148_v55 = vadd.f32 %v8006_v54, %v1144_v49  ;;  %v6579_v49 = vcombine.high %v1198_v43, %v1206_v44  ;;  %v1223_v53 = vld [vmem:[%s9951_s28 + $0xe0] sm:$0xff]  ;;  %v1216_v54 = vld [vmem:[%s9951_s28 + $0xa8] sm:$0xff] }
 0xb67   :  { %v1154_v56 = vsel %vm114_vm1, %v1148_v55, 0.0 }
 0xb68   :  { %1155 = vadd.xlane.f32.xlu0 %v1154_v56  ;;  %v6576_v56 = vcombine.low %v1197_v42, %v1205_v0  ;;  %v7678_v42 = vld [vmem:[%s9954_s11 + $0x98] sm:$0xff]   ;;  %v7679_v0 = vld [vmem:[%s9954_s11 + $0x50] sm:$0xff]  }
 0xbed   :  { %v1153_v57 = vpop.xlane.xlu1 %1152 }
 0xbee   :  { %v1158_v58 = vmul.f32 0.03125, %v1153_v57  ;;  %v6578_v57 = vcombine.low %v1198_v43, %v1206_v44  ;;  %v7680_v43 = vld [vmem:[%s9954_s11 + $0xd0] sm:$0xff]  }
 0xbef   :  { %v7681_v44 = vld [vmem:[%s9954_s11 + $0x10] sm:$0xff]  }
 0xbf0   :  { %v1160_v59 = vsub.f32 %v1147_v46, %v1158_v58  ;;  %v6597_v58 = vcombine.high %v1215_v50, %v1223_v53 }
 0xbf1   :  { %v1156_v60 = vpop.xlane.xlu0 %1155 }
 0xbf2   :  { %v1159_v62 = vmul.f32 0.03125, %v1156_v60  ;;  %v1162_v63 = vmul.f32 %v1160_v59, %v1160_v59  ;;  %v1199_v60 = vld [vmem:[%s9951_s28 + $0x20] sm:$0xff] }
 0xbf4   :  { %v1161_v2 = vsub.f32 %v1148_v55, %v1159_v62  ;;  %v1164_v3 = vsel %vm114_vm1, %v1162_v63, 0.0  ;;  %v1224_v55 = vld [vmem:[%s9951_s28 + $0xe8] sm:$0xff]  ;;  %v1207_v62 = vld [vmem:[%s9951_s28 + $0x60] sm:$0xff] }
 0xbf5   :  { %1165 = vadd.xlane.f32.xlu0 %v1164_v3  ;;  %v1200_v63 = vld [vmem:[%s9951_s28 + $0x28] sm:$0xff]  ;;  %v6596_v3 = vcombine.low %v1215_v50, %v1223_v53  ;;  %v6580_v7 = vcombine.low %v1199_v60, %v1207_v62 }
 0xbf6   :  { %v1163_v10 = vmul.f32 %v1161_v2, %v1161_v2  ;;  %v7685_v50 = vld [vmem:[%s9954_s11 + $0x8] sm:$0xff]  }
 0xbf7   :  { %v7686_v53 = vld [vmem:[%s9954_s11 + $0x88] sm:$0xff]  }
 0xbf8   :  { %v1167_v48 = vsel %vm114_vm1, %v1163_v10, 0.0  ;;  %v6598_v10 = vcombine.low %v1216_v54, %v1224_v55 }
 0xbf9   :  { %1168 = vadd.xlane.f32.xlu1 %v1167_v48  ;;  %v6581_v48 = vcombine.high %v1199_v60, %v1207_v62  ;;  %v1231_v60 = vlaneseq }
 0xbfb   :  { %v8641_v62 = vshrl.u32 %v1231_v60, 7  ;;  %v7698_v60 = vld [vmem:[%s9954_s11 + $0x1b0] sm:$0xff]  }
 0xbfd   :  { %v8669_v13 = vsub.s32 5, %v8641_v62  ;;  %v8672_v15 = vsub.s32 7, %v8641_v62 }
 0xc7e   :  { %v1166_v29 = vpop.xlane.xlu0 %1165 }
 0xc7f   :  { %v1170_v30 = vmul.f32 0.03125, %v1166_v29  ;;  %v7664_v29 = vld [vmem:[%s9954_s11 + $0xf0] sm:$0xff]  }
 0xc81   :  { %v1172_v20 = vadd.f32 1e-05, %v1170_v30  ;;  %v7665_v30 = vld [vmem:[%s9954_s11 + $0x30] sm:$0xff]  }
 0xc82   :  { %v1169_v31 = vpop.xlane.xlu1 %1168 }
 0xc83   :  { %7953 = vrsqrt.f32 %v1172_v20  ;;  %v1171_v32 = vmul.f32 0.03125, %v1169_v31  ;;  %v7666_v20 = vld [vmem:[%s9954_s11 + $0xb0] sm:$0xff]   ;;  %v7667_v31 = vld [vmem:[%s9954_s11 + $0x68] sm:$0xff]  }
 0xc85   :  { %v1173_v33 = vadd.f32 1e-05, %v1171_v32  ;;  %v7668_v32 = vld [vmem:[%s9954_s11 + $0xe8] sm:$0xff]  }
 0xc87   :  { %7955 = vrsqrt.f32 %v1173_v33  ;;  %v7669_v33 = vld [vmem:[%s9954_s11 + $0x28] sm:$0xff]  }
 0xc90   :  { %v7954_v34 = vpop.eup %7953 }
 0xc91   :  { %v1176_v35 = vmul.f32 %v7954_v34, %v1160_v59  ;;  %v6599_v59 = vcombine.high %v1216_v54, %v1224_v55  ;;  %v7670_v34 = vld [vmem:[%s9954_s11 + $0xa8] sm:$0xff]   ;;  %v7687_v54 = vld [vmem:[%s9954_s11 + $0x40] sm:$0xff]  }
 0xc92   :  { %v7688_v55 = vld [vmem:[%s9954_s11 + $0xc0] sm:$0xff]  }
 0xc93   :  { %v1184_v38 = vmul.f32 %v6570_v36, %v1176_v35  ;;  %v7671_v35 = vld [vmem:[%s9954_s11 + $0x60] sm:$0xff]  }
 0xc94   :  { %v7956_v37 = vpop.eup %7955 }
 0xc95   :  { %v1177_v39 = vmul.f32 %v7956_v37, %v1161_v2  ;;  %v8461_v61 = vadd.f32 %v6571_v40, %v1184_v38  ;;  %v1208_v2 = vld [vmem:[%s9951_s28 + $0x68] sm:$0xff]  ;;  %v7673_v37 = vld [vmem:[%s9954_s11 + $0x20] sm:$0xff]  }
 0xc96   :  { %v6583_v51 = vcombine.high %v1200_v63, %v1208_v2  ;;  %v6582_v8 = vcombine.low %v1200_v63, %v1208_v2  ;;  %v7674_v38 = vld [vmem:[%s9954_s11 + $0xa0] sm:$0xff]   ;;  %v8644_v63 = vsub.s32 1, %v8641_v62  ;;  %v8647_v2 = vsub.s32 3, %v8641_v62 }
 0xc97   :  { %v1185_v41 = vmul.f32 %v6570_v36, %v1177_v39  ;;  %v7672_v36 = vld [vmem:[%s9954_s11 + $0xe0] sm:$0xff]   ;;  %v7675_v39 = vld [vmem:[%s9954_s11 + $0x58] sm:$0xff]  }
 0xc99   :  { %v8463_v45 = vadd.f32 %v6571_v40, %v1185_v41  ;;  %v7676_v40 = vld [vmem:[%s9954_s11 + $0xd8] sm:$0xff]  }
 0xc9a   :  { %v7677_v41 = vld [vmem:[%s9954_s11 + $0x18] sm:$0xff]  }
 0xc9b   :  { %v8467_v46 = vpack.c.bf16 %v8463_v45, %v8461_v61 }
 0xc9d   :  { %6604 = vmatmul.mubr.msk.bf16.vlgmr.msra.gmra.mxu0 %vm114_vm1, %v8467_v46  ;;  %6605 = vmatmul.mubr.msk.bf16.vlgmr.msra.gmra.mxu1 %vm114_vm1, %v8467_v46 }
 0xc9e   :  { %1573 = vmatpush1.bf16.msra.mxu0 %v6592_v26  ;;  %1616 = vmatpush1.bf16.msra.mxu1 %v6594_v27  ;;  %v7661_v26 = vld [vmem:[%s9954_s11 + $0x38] sm:$0xff]  }
 0xc9f   :  { %1574 = vmatprep.subr.bf16.mxu0 %v6577_v47  ;;  %1617 = vmatprep.subr.bf16.mxu1 %v6579_v49  ;;  %v7662_v27 = vld [vmem:[%s9954_s11 + $0xb8] sm:$0xff]   ;;  %v7683_v47 = vld [vmem:[%s9954_s11 + $0x48] sm:$0xff]  }
 0xca0   :  { %1592 = vmatprep.mubr.bf16.mxu0 %v8045_v23  ;;  %1635 = vmatprep.mubr.bf16.mxu1 %v8045_v23  ;;  %v7684_v49 = vld [vmem:[%s9954_s11 + $0xc8] sm:$0xff]  }
 0xca2   :  { %1575 = vmatpush1.bf16.msra.mxu0 %v6576_v56  ;;  %1618 = vmatpush1.bf16.msra.mxu1 %v6578_v57  ;;  %v7689_v56 = vld [vmem:[%s9954_s11] sm:$0xff]  }
 0xca3   :  { %1658 = vmatprep.subr.bf16.mxu0 %v6597_v58  ;;  %1701 = vmatprep.subr.bf16.mxu1 %v6599_v59  ;;  %v7690_v57 = vld [vmem:[%s9954_s11 + $0x80] sm:$0xff]   ;;  %v7691_v58 = vld [vmem:[%s9954_s11 + $0x178] sm:$0xff]  }
 0xca4   :  { %v7692_v59 = vld [vmem:[%s9954_s11 + $0x1f8] sm:$0xff]  }
 0xca5   :  { %6606 = vmatmul.mubr.msk.bf16.vlgmr.msra.gmra.mxu0 %vm114_vm1, %v8467_v46  ;;  %6607 = vmatmul.mubr.msk.bf16.vlgmr.msra.gmra.mxu1 %vm114_vm1, %v8467_v46 }
 0xca6   :  { %1659 = vmatpush1.bf16.msra.mxu0 %v6596_v3  ;;  %1702 = vmatpush1.bf16.msra.mxu1 %v6598_v10  ;;  %v8650_v3 = vsub.s32 0, %v8641_v62  ;;  %v8653_v10 = vsub.s32 2, %v8641_v62 }
 0xca7   :  { %1660 = vmatprep.subr.bf16.mxu0 %v6581_v48  ;;  %1703 = vmatprep.subr.bf16.mxu1 %v6583_v51  ;;  %v8658_v48 = vld [vmem:[%s9955_s1] sm:$0xff] }
 0xca8   :  { %1678 = vmatprep.mubr.bf16.mxu0 %v8045_v23  ;;  %1721 = vmatprep.mubr.bf16.mxu1 %v8045_v23  ;;  %v1238_v4 = vrot.slane %v8658_v48, %v8644_v63  ;;  %v1246_v5 = vrot.slane %v8658_v48, %v8647_v2  ;;  %v1234_v6 = vrot.slane %v8658_v48, %v8650_v3 }
 0xcaa   :  { %1661 = vmatpush1.bf16.msra.mxu0 %v6580_v7  ;;  %1704 = vmatpush1.bf16.msra.mxu1 %v6582_v8  ;;  %v1242_v7 = vrot.slane %v8658_v48, %v8653_v10 }
 0xcab   :  { %1744 = vmatprep.subr.bf16.mxu0 %v6601_v9  ;;  %1787 = vmatprep.subr.bf16.mxu1 %v6603_v11 }
 0xcad   :  { %6608 = vmatmul.mubr.msk.bf16.vlgmr.msra.gmra.mxu0 %vm114_vm1, %v8467_v46  ;;  %6609 = vmatmul.mubr.msk.bf16.vlgmr.msra.gmra.mxu1 %vm114_vm1, %v8467_v46 }
 0xcae   :  { %1745 = vmatpush1.bf16.msra.mxu0 %v6600_v14  ;;  %1788 = vmatpush1.bf16.msra.mxu1 %v6602_v17 }
 0xcaf   :  { %1746 = vmatprep.subr.bf16.mxu0 %v6585_v18  ;;  %1789 = vmatprep.subr.bf16.mxu1 %v6587_v22 }
 0xcb0   :  { %1764 = vmatprep.mubr.bf16.mxu0 %v8045_v23  ;;  %1807 = vmatprep.mubr.bf16.mxu1 %v8045_v23 }
 0xcb2   :  { %1747 = vmatpush1.bf16.msra.mxu0 %v6584_v19  ;;  %1790 = vmatpush1.bf16.msra.mxu1 %v6586_v21 }
 0xcb3   :  { %6982 = vmatprep.subr.bf16.mxu0 %v7659_v24  ;;  %7004 = vmatprep.subr.bf16.mxu1 %v7660_v25 }
 0xcb5   :  { %6610 = vmatmul.mubr.msk.bf16.vlgmr.msra.gmra.mxu0 %vm114_vm1, %v8467_v46  ;;  %6611 = vmatmul.mubr.msk.bf16.vlgmr.msra.gmra.mxu1 %vm114_vm1, %v8467_v46  ;;  %v7682_v46 = vld [vmem:[%s9954_s11 + $0x90] sm:$0xff]  }
 0xcb6   :  { %6983 = vmatpush3.bf16.msra.mxu0 %v7661_v26  ;;  %7005 = vmatpush3.bf16.msra.mxu1 %v7662_v27 }
 0xcb7   :  { %6984 = vmatprep.subr.bf16.mxu0 %v7663_v28  ;;  %7006 = vmatprep.subr.bf16.mxu1 %v7664_v29 }
 0xcba   :  { %6985 = vmatpush3.bf16.msra.mxu0 %v7665_v30  ;;  %7007 = vmatpush3.bf16.msra.mxu1 %v7666_v20  ;;  %v1254_v20 = vrot.slane %v8658_v48, %v8669_v13 }
 0xcbb   :  { %6986 = vmatprep.subr.bf16.mxu0 %v7667_v31  ;;  %7008 = vmatprep.subr.bf16.mxu1 %v7668_v32  ;;  %v1262_v31 = vrot.slane %v8658_v48, %v8672_v15 }
 0xcbe   :  { %6987 = vmatpush3.bf16.msra.mxu0 %v7669_v33  ;;  %7009 = vmatpush3.bf16.msra.mxu1 %v7670_v34 }
 0xcbf   :  { %6988 = vmatprep.subr.bf16.mxu0 %v7671_v35  ;;  %7010 = vmatprep.subr.bf16.mxu1 %v7672_v36 }
 0xcc2   :  { %6989 = vmatpush3.bf16.msra.mxu0 %v7673_v37  ;;  %7011 = vmatpush3.bf16.msra.mxu1 %v7674_v38 }
 0xcc3   :  { %6990 = vmatprep.subr.bf16.mxu0 %v7675_v39  ;;  %7012 = vmatprep.subr.bf16.mxu1 %v7676_v40 }
 0xcc6   :  { %6991 = vmatpush3.bf16.msra.mxu0 %v7677_v41  ;;  %7013 = vmatpush3.bf16.msra.mxu1 %v7678_v42  ;;  %v7693_v42 = vld [vmem:[%s9954_s11 + $0x138] sm:$0xff]  }
 0xcc7   :  { %6992 = vmatprep.subr.bf16.mxu0 %v7679_v0  ;;  %7014 = vmatprep.subr.bf16.mxu1 %v7680_v43  ;;  %v7694_v0 = vld [vmem:[%s9954_s11 + $0x1b8] sm:$0xff]  }
 0xcca   :  { %6993 = vmatpush3.bf16.msra.mxu0 %v7681_v44  ;;  %7015 = vmatpush3.bf16.msra.mxu1 %v7682_v46 }
 0xccb   :  { %6994 = vmatprep.subr.bf16.mxu0 %v7683_v47  ;;  %7016 = vmatprep.subr.bf16.mxu1 %v7684_v49  ;;  %v7695_v49 = vld [vmem:[%s9954_s11 + $0x170] sm:$0xff]  }
 0xcce   :  { %6995 = vmatpush3.bf16.msra.mxu0 %v7685_v50  ;;  %7017 = vmatpush3.bf16.msra.mxu1 %v7686_v53  ;;  %v7696_v50 = vld [vmem:[%s9954_s11 + $0x1f0] sm:$0xff]  }
 0xccf   :  { %6996 = vmatprep.subr.bf16.mxu0 %v7687_v54  ;;  %7018 = vmatprep.subr.bf16.mxu1 %v7688_v55 }
 0xcd2   :  { %6997 = vmatpush3.bf16.msra.mxu0 %v7689_v56  ;;  %7019 = vmatpush3.bf16.msra.mxu1 %v7690_v57 }
 0xcd3   :  { %7026 = vmatprep.subr.bf16.mxu0 %v7691_v58  ;;  %7048 = vmatprep.subr.bf16.mxu1 %v7692_v59  ;;  %v7697_v59 = vld [vmem:[%s9954_s11 + $0x130] sm:$0xff]  }
 0xd5d   :  { %v1508_v51 = vpop.f32.mrf.mxu0  ;;  %v1551_v52 = vpop.f32.mrf.mxu1 }
 0xd5e   :  { %v1509_v22 = vadd.f32 %v1508_v51, %v1234_v6  ;;  %v1552_v19 = vadd.f32 %v1551_v52, %v1242_v7  ;;  %v7699_v51 = vld [vmem:[%s9954_s11 + $0x168] sm:$0xff]  }
 0xd5f   :  { %v1510_v8 = vpop.f32.mrf.mxu0  ;;  %v1553_v9 = vpop.f32.mrf.mxu1 }
 0xd60   :  { %v1511_v16 = vadd.f32 %v1510_v8, %v1238_v4  ;;  %v1554_v14 = vadd.f32 %v1553_v9, %v1246_v5  ;;  %v1818_v36 = vmax.f32 %v1509_v22, 0.0  ;;  %v1820_v37 = vmax.f32 %v1552_v19, 0.0  ;;  %v7706_v19 = vld [vmem:[%s9954_s11 + $0x1a0] sm:$0xff]  }
 0xd61   :  { %v1512_v11 = vpop.f32.mrf.mxu0  ;;  %v1555_v12 = vpop.f32.mrf.mxu1 }
 0xd62   :  { %v1513_v17 = vadd.f32 %v1512_v11, %v1234_v6  ;;  %v1556_v18 = vadd.f32 %v1555_v12, %v1242_v7  ;;  %v1819_v32 = vmax.f32 %v1511_v16, 0.0  ;;  %v1821_v33 = vmax.f32 %v1554_v14, 0.0  ;;  %v7700_v7 = vld [vmem:[%s9954_s11 + $0x1e8] sm:$0xff]   ;;  %v7703_v16 = vld [vmem:[%s9954_s11 + $0x160] sm:$0xff]  }
 0xd63   :  { %v1514_v21 = vpop.f32.mrf.mxu0  ;;  %v1557_v24 = vpop.f32.mrf.mxu1  ;;  %v7701_v11 = vld [vmem:[%s9954_s11 + $0x128] sm:$0xff]   ;;  %v7704_v14 = vld [vmem:[%s9954_s11 + $0x1e0] sm:$0xff]  }
 0xd64   :  { %v1515_v25 = vadd.f32 %v1514_v21, %v1238_v4  ;;  %v1558_v26 = vadd.f32 %v1557_v24, %v1246_v5  ;;  %v1834_v27 = vmax.f32 %v1513_v17, 0.0  ;;  %v1836_v28 = vmax.f32 %v1556_v18, 0.0  ;;  %v7702_v12 = vld [vmem:[%s9954_s11 + $0x1a8] sm:$0xff]   ;;  %v7705_v18 = vld [vmem:[%s9954_s11 + $0x120] sm:$0xff]   ;;  %v7707_v21 = vld [vmem:[%s9954_s11 + $0x158] sm:$0xff]  }
 0xd65   :  { %v8674_v29 = vpop.f32.mrf.mxu0  ;;  %v8676_v30 = vpop.f32.mrf.mxu1  ;;  %v7708_v24 = vld [vmem:[%s9954_s11 + $0x1d8] sm:$0xff]  }
 0xd66   :  { %v1835_v34 = vmax.f32 %v1515_v25, 0.0  ;;  %v1837_v35 = vmax.f32 %v1558_v26, 0.0  ;;  %v1850_v43 = vpack.c.bf16 %v1834_v27, %v1818_v36  ;;  %v1852_v44 = vpack.c.bf16 %v1836_v28, %v1820_v37  ;;  %v7709_v26 = vld [vmem:[%s9954_s11 + $0x118] sm:$0xff]   ;;  %v7714_v37 = vld [vmem:[%s9954_s11 + $0x190] sm:$0xff]  }
 0xd67   :  { %v1596_v38 = vpop.f32.mrf.mxu0  ;;  %v1639_v39 = vpop.f32.mrf.mxu1  ;;  %v7710_v28 = vld [vmem:[%s9954_s11 + $0x198] sm:$0xff]  }
 0xd68   :  { %v1851_v40 = vpack.c.bf16 %v1835_v34, %v1819_v32  ;;  %v1853_v41 = vpack.c.bf16 %v1837_v35, %v1821_v33  ;;  %v1597_v53 = vadd.f32 %v1596_v38, %v1254_v20  ;;  %v1640_v54 = vadd.f32 %v1639_v39, %v1262_v31  ;;  %v7713_v35 = vld [vmem:[%s9954_s11 + $0x110] sm:$0xff]   ;;  %v7716_v38 = vld [vmem:[%s9954_s11 + $0x1c8] sm:$0xff]  }
 0xd69   :  { %v8688_v46 = vpop.f32.mrf.mxu0  ;;  %v8690_v47 = vpop.f32.mrf.mxu1  ;;  %v8751_v32 = vsub.s32 4, %v8641_v62  ;;  %v8754_v33 = vsub.s32 6, %v8641_v62  ;;  %v7715_v62 = vld [vmem:[%s9954_s11 + $0x148] sm:$0xff]  }
 0xd6a   :  { %2929 = vmatprep.mubr.bf16.mxu0 %v1851_v40  ;;  %2970 = vmatprep.mubr.bf16.mxu1 %v1853_v41  ;;  %v1823_v52 = vmax.f32 %v1597_v53, 0.0  ;;  %v1825_v4 = vmax.f32 %v1640_v54, 0.0  ;;  %v8779_v41 = vld [vmem:[%s9955_s1 + $0x8] sm:$0xff]  ;;  %s9957_s1 = sld [smem:[#allocation16_spill]] }
 0xd6b   :  { %v1600_v55 = vpop.f32.mrf.mxu0  ;;  %v1643_v56 = vpop.f32.mrf.mxu1  ;;  %2930 = vmatmul.mubr.bf16.vlgmr.msra.gmra.mxu0 %v1850_v43  ;;  %2971 = vmatmul.mubr.bf16.vlgmr.msra.gmra.mxu1 %v1852_v44  ;;  %v1250_v39 = vrot.slane %v8658_v48, %v8751_v32  ;;  %v1258_v40 = vrot.slane %v8658_v48, %v8754_v33  ;;  %v1270_v44 = vrot.slane %v8779_v41, %v8644_v63  ;;  %v7718_v48 = vld [vmem:[%s9954_s11 + $0x188] sm:$0xff]  }
 0xd6c   :  { %v1601_v57 = vadd.f32 %v1600_v55, %v1254_v20  ;;  %v1644_v58 = vadd.f32 %v1643_v56, %v1262_v31  ;;  %7027 = vmatpush3.bf16.msra.mxu0 %v7693_v42  ;;  %7049 = vmatpush3.bf16.msra.mxu1 %v7694_v0  ;;  %v7711_v20 = vld [vmem:[%s9954_s11 + $0x150] sm:$0xff]   ;;  %v7717_v0 = vld [vmem:[%s9954_s11 + $0x108] sm:$0xff]   ;;  %v1278_v54 = vrot.slane %v8779_v41, %v8647_v2 }
 0xd6d   :  { %7028 = vmatprep.subr.bf16.mxu0 %v7695_v49  ;;  %7050 = vmatprep.subr.bf16.mxu1 %v7696_v50  ;;  %v8722_v17 = vpop.f32.mrf.mxu0  ;;  %v8727_v22 = vpop.f32.mrf.mxu1  ;;  %v7712_v31 = vld [vmem:[%s9954_s11 + $0x1d0] sm:$0xff]   ;;  %v1599_v43 = vadd.f32 %v8688_v46, %v1250_v39  ;;  %v7719_v50 = vld [vmem:[%s9954_s11 + $0x140] sm:$0xff]   ;;  %v1642_v53 = vadd.f32 %v8690_v47, %v1258_v40  ;;  %v1595_v55 = vadd.f32 %v8674_v29, %v1250_v39  ;;  %v7723_v29 = vld [vmem:[%s9954_s11 + $0x278] sm:$0xff]  }
 0xd6e   :  { %v1839_v5 = vmax.f32 %v1601_v57, 0.0  ;;  %v1841_v6 = vmax.f32 %v1644_v58, 0.0  ;;  %v7720_v46 = vld [vmem:[%s9954_s11 + $0x1c0] sm:$0xff]   ;;  %v1638_v57 = vadd.f32 %v8676_v30, %v1258_v40 }
 0xd6f   :  { %v1682_v25 = vpop.f32.mrf.mxu0  ;;  %v1725_v27 = vpop.f32.mrf.mxu1  ;;  %v1838_v47 = vmax.f32 %v1599_v43, 0.0  ;;  %v7737_v39 = vld [vmem:[%s9954_s11 + $0x220] sm:$0xff]   ;;  %v7740_v43 = vld [vmem:[%s9954_s11 + $0x2d8] sm:$0xff]  }
 0xd70   :  { %v1855_v8 = vpack.c.bf16 %v1839_v5, %v1823_v52  ;;  %v1857_v9 = vpack.c.bf16 %v1841_v6, %v1825_v4  ;;  %7029 = vmatpush3.bf16.msra.mxu0 %v7697_v59  ;;  %7051 = vmatpush3.bf16.msra.mxu1 %v7698_v60  ;;  %v7721_v59 = vld [vmem:[%s9954_s11 + $0x100] sm:$0xff]   ;;  %v1683_v60 = vadd.f32 %v1682_v25, %v1270_v44  ;;  %v1840_v52 = vmax.f32 %v1642_v53, 0.0  ;;  %v7724_v4 = vld [vmem:[%s9954_s11 + $0x2f8] sm:$0xff]   ;;  %v7743_v53 = vld [vmem:[%s9954_s11 + $0x250] sm:$0xff]  }
 0xd71   :  { %7030 = vmatprep.subr.bf16.mxu0 %v7699_v51  ;;  %7052 = vmatprep.subr.bf16.mxu1 %v7700_v7  ;;  %v8756_v34 = vpop.f32.mrf.mxu0  ;;  %v8761_v36 = vpop.f32.mrf.mxu1  ;;  %v7722_v51 = vld [vmem:[%s9954_s11 + $0x180] sm:$0xff]   ;;  %v1726_v30 = vadd.f32 %v1725_v27, %v1278_v54  ;;  %v1822_v5 = vmax.f32 %v1595_v55, 0.0  ;;  %v1824_v7 = vmax.f32 %v1638_v57, 0.0  ;;  %v7730_v27 = vld [vmem:[%s9954_s11 + $0x2b0] sm:$0xff]  }
 0xd72   :  { %3011 = vmatprep.mubr.bf16.mxu0 %v1855_v8  ;;  %3052 = vmatprep.mubr.bf16.mxu1 %v1857_v9  ;;  %v7725_v9 = vld [vmem:[%s9954_s11 + $0x238] sm:$0xff]   ;;  %v7745_v55 = vld [vmem:[%s9954_s11 + $0x210] sm:$0xff]  }
 0xd73   :  { %v1686_v42 = vpop.f32.mrf.mxu0  ;;  %v1729_v49 = vpop.f32.mrf.mxu1  ;;  %v7746_v57 = vld [vmem:[%s9954_s11 + $0x290] sm:$0xff]  }
 0xd74   :  { %7031 = vmatpush3.bf16.msra.mxu0 %v7701_v11  ;;  %7053 = vmatpush3.bf16.msra.mxu1 %v7702_v12  ;;  %v1687_v56 = vadd.f32 %v1686_v42, %v1270_v44  ;;  %v1730_v58 = vadd.f32 %v1729_v49, %v1278_v54  ;;  %v1854_v11 = vpack.c.bf16 %v1838_v47, %v1822_v5  ;;  %v1827_v12 = vmax.f32 %v1683_v60, 0.0  ;;  %v7738_v42 = vld [vmem:[%s9954_s11 + $0x2a0] sm:$0xff]   ;;  %v7741_v49 = vld [vmem:[%s9954_s11 + $0x218] sm:$0xff]   ;;  %v7744_v54 = vld [vmem:[%s9954_s11 + $0x2d0] sm:$0xff]  }
 0xd75   :  { %7032 = vmatprep.subr.bf16.mxu0 %v7703_v16  ;;  %7054 = vmatprep.subr.bf16.mxu1 %v7704_v14  ;;  %v7726_v16 = vld [vmem:[%s9954_s11 + $0x2b8] sm:$0xff]   ;;  %v1856_v14 = vpack.c.bf16 %v1840_v52, %v1824_v7  ;;  %v8854_v40 = vpop.f32.mrf.mxu1  ;;  %v1266_v47 = vrot.slane %v8779_v41, %v8650_v3  ;;  %v1274_v60 = vrot.slane %v8779_v41, %v8653_v10  ;;  %v7750_v5 = vld [vmem:[%s9954_s11 + $0x288] sm:$0xff]  }
 0xd76   :  { %v1843_v6 = vmax.f32 %v1687_v56, 0.0  ;;  %v1845_v8 = vmax.f32 %v1730_v58, 0.0  ;;  %v7747_v58 = vld [vmem:[%s9954_s11 + $0x248] sm:$0xff]  }
 0xd77   :  { %v1685_v52 = vadd.f32 %v8756_v34, %v1266_v47  ;;  %v1728_v7 = vadd.f32 %v8761_v36, %v1274_v60  ;;  %v7752_v34 = vld [vmem:[%s9954_s11 + $0x2c0] sm:$0xff]  }
 0xd78   :  { %7033 = vmatpush3.bf16.msra.mxu0 %v7705_v18  ;;  %7055 = vmatpush3.bf16.msra.mxu1 %v7706_v19  ;;  %v1829_v18 = vmax.f32 %v1726_v30, 0.0  ;;  %v7727_v19 = vld [vmem:[%s9954_s11 + $0x270] sm:$0xff]   ;;  %v1286_v30 = vrot.slane %v8779_v41, %v8669_v13 }
 0xd79   :  { %7034 = vmatprep.subr.bf16.mxu0 %v7707_v21  ;;  %7056 = vmatprep.subr.bf16.mxu1 %v7708_v24  ;;  %v1859_v21 = vpack.c.bf16 %v1843_v6, %v1827_v12  ;;  %v7728_v24 = vld [vmem:[%s9954_s11 + $0x2f0] sm:$0xff]   ;;  %v7751_v6 = vld [vmem:[%s9954_s11 + $0x240] sm:$0xff]   ;;  %v1724_v12 = vadd.f32 %v8727_v22, %v1274_v60  ;;  %v1842_v36 = vmax.f32 %v1685_v52, 0.0  ;;  %v7771_v60 = vld [vmem:[%s9954_s11 + $0x358] sm:$0xff]  }
 0xd7a   :  { %v1861_v25 = vpack.c.bf16 %v1845_v8, %v1829_v18  ;;  %v1294_v8 = vrot.slane %v8779_v41, %v8672_v15  ;;  %v7774_v52 = vld [vmem:[%s9954_s11 + $0x398] sm:$0xff]  }
 0xd7c   :  { %7035 = vmatpush3.bf16.msra.mxu0 %v7709_v26  ;;  %7057 = vmatpush3.bf16.msra.mxu1 %v7710_v28  ;;  %v7729_v26 = vld [vmem:[%s9954_s11 + $0x230] sm:$0xff]   ;;  %v7731_v28 = vld [vmem:[%s9954_s11 + $0x268] sm:$0xff]  }
 0xd7d   :  { %7036 = vmatprep.subr.bf16.mxu0 %v7711_v20  ;;  %7058 = vmatprep.subr.bf16.mxu1 %v7712_v31  ;;  %v7732_v20 = vld [vmem:[%s9954_s11 + $0x2e8] sm:$0xff]  }
 0xd7e   :  { %v7733_v31 = vld [vmem:[%s9954_s11 + $0x228] sm:$0xff]  }
 0xd80   :  { %7037 = vmatpush3.bf16.msra.mxu0 %v7713_v35  ;;  %7059 = vmatpush3.bf16.msra.mxu1 %v7714_v37  ;;  %v7734_v35 = vld [vmem:[%s9954_s11 + $0x2a8] sm:$0xff]   ;;  %v7735_v37 = vld [vmem:[%s9954_s11 + $0x260] sm:$0xff]  }
 0xd81   :  { %7038 = vmatprep.subr.bf16.mxu0 %v7715_v62  ;;  %7060 = vmatprep.subr.bf16.mxu1 %v7716_v38  ;;  %v7736_v62 = vld [vmem:[%s9954_s11 + $0x2e0] sm:$0xff]   ;;  %v8849_v38 = vpop.f32.mrf.mxu0 }
 0xd83   :  { %v1768_v44 = vpop.f32.mrf.mxu0 }
 0xd84   :  { %7039 = vmatpush3.bf16.msra.mxu0 %v7717_v0  ;;  %7061 = vmatpush3.bf16.msra.mxu1 %v7718_v48  ;;  %v7739_v0 = vld [vmem:[%s9954_s11 + $0x258] sm:$0xff]   ;;  %v1811_v48 = vpop.f32.mrf.mxu1  ;;  %v1769_v18 = vadd.f32 %v1768_v44, %v1286_v30 }
 0xd85   :  { %7040 = vmatprep.subr.bf16.mxu0 %v7719_v50  ;;  %7062 = vmatprep.subr.bf16.mxu1 %v7720_v46  ;;  %v7742_v50 = vld [vmem:[%s9954_s11 + $0x298] sm:$0xff]   ;;  %v8877_v46 = vpop.f32.mrf.mxu0  ;;  %v1812_v22 = vadd.f32 %v1811_v48, %v1294_v8  ;;  %v7762_v48 = vld [vmem:[%s9954_s11 + $0x3b0] sm:$0xff]  }
 0xd86   :  { %v8882_v56 = vpop.f32.mrf.mxu1 }
 0xd88   :  { %7041 = vmatpush3.bf16.msra.mxu0 %v7721_v59  ;;  %7063 = vmatpush3.bf16.msra.mxu1 %v7722_v51  ;;  %v7748_v59 = vld [vmem:[%s9954_s11 + $0x2c8] sm:$0xff]   ;;  %v1772_v51 = vpop.f32.mrf.mxu0 }
 0xd89   :  { %7070 = vmatprep.subr.bf16.mxu0 %v7723_v29  ;;  %7092 = vmatprep.subr.bf16.mxu1 %v7724_v4  ;;  %v7749_v29 = vld [vmem:[%s9954_s11 + $0x208] sm:$0xff]   ;;  %v1815_v4 = vpop.f32.mrf.mxu1 }
 0xd8b   :  { %3012 = vmatmul.mubr.bf16.vlgmr.msra.gmra.mxu0 %v1854_v11  ;;  %3053 = vmatmul.mubr.bf16.vlgmr.msra.gmra.mxu1 %v1856_v14  ;;  %v1773_v11 = vadd.f32 %v1772_v51, %v1286_v30  ;;  %v7753_v14 = vld [vmem:[%s9954_s11 + $0x200] sm:$0xff]   ;;  %v7772_v51 = vld [vmem:[%s9954_s11 + $0x3d8] sm:$0xff]   ;;  %v7775_v30 = vld [vmem:[%s9954_s11 + $0x350] sm:$0xff]  }
 0xd8c   :  { %7071 = vmatpush3.bf16.msra.mxu0 %v7725_v9  ;;  %3093 = vmatprep.mubr.bf16.mxu0 %v1859_v21  ;;  %v1681_v9 = vadd.f32 %v8722_v17, %v1266_v47  ;;  %v7755_v17 = vld [vmem:[%s9954_s11 + $0x378] sm:$0xff]   ;;  %v1844_v21 = vmax.f32 %v1728_v7, 0.0  ;;  %v7770_v47 = vld [vmem:[%s9954_s11 + $0x3a0] sm:$0xff]   ;;  %v7779_v7 = vld [vmem:[%s9954_s11 + $0x348] sm:$0xff]  }
 0xd8d   :  { %7093 = vmatpush3.bf16.msra.mxu1 %v7726_v16  ;;  %3134 = vmatprep.mubr.bf16.mxu1 %v1861_v25  ;;  %v1816_v16 = vadd.f32 %v1815_v4, %v1294_v8  ;;  %v7776_v4 = vld [vmem:[%s9954_s11 + $0x3d0] sm:$0xff]   ;;  %v7780_v8 = vld [vmem:[%s9954_s11 + $0x3c8] sm:$0xff]  }
 0xd8e   :  { %7072 = vmatprep.subr.bf16.mxu0 %v7727_v19  ;;  %7094 = vmatprep.subr.bf16.mxu1 %v7728_v24  ;;  %v7754_v19 = vld [vmem:[%s9954_s11 + $0x280] sm:$0xff]   ;;  %v7756_v24 = vld [vmem:[%s9954_s11 + $0x3f8] sm:$0xff]   ;;  %v1826_v25 = vmax.f32 %v1681_v9, 0.0  ;;  %v1290_v9 = vrot.slane %v8779_v41, %v8754_v33 }
 0xd90   :  { %7073 = vmatpush3.bf16.msra.mxu0 %v7729_v26  ;;  %v1847_v26 = vmax.f32 %v1773_v11, 0.0  ;;  %v7781_v11 = vld [vmem:[%s9954_s11 + $0x308] sm:$0xff]  }
 0xd91   :  { %7095 = vmatpush3.bf16.msra.mxu1 %v7730_v27  ;;  %7074 = vmatprep.subr.bf16.mxu0 %v7731_v28  ;;  %v1828_v27 = vmax.f32 %v1724_v12, 0.0  ;;  %v1849_v28 = vmax.f32 %v1816_v16, 0.0  ;;  %v7782_v16 = vld [vmem:[%s9954_s11 + $0x388] sm:$0xff]  }
 0xd92   :  { %7096 = vmatprep.subr.bf16.mxu1 %v7732_v20  ;;  %v7757_v20 = vld [vmem:[%s9954_s11 + $0x338] sm:$0xff]  }
 0xd94   :  { %7075 = vmatpush3.bf16.msra.mxu0 %v7733_v31  ;;  %v1858_v31 = vpack.c.bf16 %v1842_v36, %v1826_v25  ;;  %v1814_v36 = vadd.f32 %v8882_v56, %v1290_v9  ;;  %v7786_v56 = vld [vmem:[%s9954_s11 + $0x380] sm:$0xff]  }
 0xd95   :  { %7097 = vmatpush3.bf16.msra.mxu1 %v7734_v35  ;;  %7076 = vmatprep.subr.bf16.mxu0 %v7735_v37  ;;  %v1831_v35 = vmax.f32 %v1769_v18, 0.0  ;;  %v7758_v37 = vld [vmem:[%s9954_s11 + $0x3b8] sm:$0xff]  }
 0xd96   :  { %7098 = vmatprep.subr.bf16.mxu1 %v7736_v62  ;;  %v1860_v62 = vpack.c.bf16 %v1844_v21, %v1828_v27  ;;  %v1848_v21 = vmax.f32 %v1814_v36, 0.0 }
 0xd98   :  { %7077 = vmatpush3.bf16.msra.mxu0 %v7737_v39  ;;  %v1833_v39 = vmax.f32 %v1812_v22, 0.0 }
 0xd99   :  { %7099 = vmatpush3.bf16.msra.mxu1 %v7738_v42  ;;  %7078 = vmatprep.subr.bf16.mxu0 %v7739_v0  ;;  %v7759_v42 = vld [vmem:[%s9954_s11 + $0x370] sm:$0xff]   ;;  %v1863_v0 = vpack.c.bf16 %v1847_v26, %v1831_v35 }
 0xd9a   :  { %7100 = vmatprep.subr.bf16.mxu1 %v7740_v43  ;;  %v7760_v43 = vld [vmem:[%s9954_s11 + $0x3f0] sm:$0xff]   ;;  %v1865_v44 = vpack.c.bf16 %v1849_v28, %v1833_v39 }
 0xd9c   :  { %7079 = vmatpush3.bf16.msra.mxu0 %v7741_v49  ;;  %v7761_v49 = vld [vmem:[%s9954_s11 + $0x330] sm:$0xff]  }
 0xd9d   :  { %7101 = vmatpush3.bf16.msra.mxu1 %v7742_v50  ;;  %7080 = vmatprep.subr.bf16.mxu0 %v7743_v53  ;;  %v7763_v50 = vld [vmem:[%s9954_s11 + $0x368] sm:$0xff]  }
 0xd9e   :  { %7102 = vmatprep.subr.bf16.mxu1 %v7744_v54  ;;  %v7764_v53 = vld [vmem:[%s9954_s11 + $0x3e8] sm:$0xff]  }
 0xd9f   :  { %v7765_v54 = vld [vmem:[%s9954_s11 + $0x328] sm:$0xff]  }
 0xda0   :  { %7081 = vmatpush3.bf16.msra.mxu0 %v7745_v55  ;;  %v7766_v55 = vld [vmem:[%s9954_s11 + $0x3a8] sm:$0xff]  }
 0xda1   :  { %7103 = vmatpush3.bf16.msra.mxu1 %v7746_v57  ;;  %7082 = vmatprep.subr.bf16.mxu0 %v7747_v58  ;;  %v7767_v57 = vld [vmem:[%s9954_s11 + $0x360] sm:$0xff]  }
 0xda2   :  { %7104 = vmatprep.subr.bf16.mxu1 %v7748_v59  ;;  %v7768_v58 = vld [vmem:[%s9954_s11 + $0x3e0] sm:$0xff]  }
 0xda3   :  { %v7769_v59 = vld [vmem:[%s9954_s11 + $0x320] sm:$0xff]  }
 0xda4   :  { %7083 = vmatpush3.bf16.msra.mxu0 %v7749_v29  ;;  %v7773_v29 = vld [vmem:[%s9954_s11 + $0x318] sm:$0xff]  }
 0xda5   :  { %7105 = vmatpush3.bf16.msra.mxu1 %v7750_v5  ;;  %7084 = vmatprep.subr.bf16.mxu0 %v7751_v6  ;;  %v7777_v5 = vld [vmem:[%s9954_s11 + $0x310] sm:$0xff]  }
 0xda6   :  { %7106 = vmatprep.subr.bf16.mxu1 %v7752_v34  ;;  %v7778_v6 = vld [vmem:[%s9954_s11 + $0x390] sm:$0xff]   ;;  %v1282_v34 = vrot.slane %v8779_v41, %v8751_v32  ;;  %v7784_v41 = vld [vmem:[%s9954_s11 + $0x3c0] sm:$0xff]  }
 0xda8   :  { %7085 = vmatpush3.bf16.msra.mxu0 %v7753_v14  ;;  %v1771_v12 = vadd.f32 %v8877_v46, %v1282_v34  ;;  %v7783_v14 = vld [vmem:[%s9954_s11 + $0x340] sm:$0xff]   ;;  %v1767_v18 = vadd.f32 %v8849_v38, %v1282_v34  ;;  %v1810_v46 = vadd.f32 %v8854_v40, %v1290_v9 }
 0xda9   :  { %7107 = vmatpush3.bf16.msra.mxu1 %v7754_v19  ;;  %7114 = vmatprep.subr.bf16.mxu0 %v7755_v17  ;;  %v7785_v19 = vld [vmem:[%s9954_s11 + $0x300] sm:$0xff]   ;;  %s9962_s11 = smov 112  }
 0xdaa   :  { %7136 = vmatprep.subr.bf16.mxu1 %v7756_v24  ;;  %v1846_v17 = vmax.f32 %v1771_v12, 0.0  ;;  %v1830_v22 = vmax.f32 %v1767_v18, 0.0  ;;  %v1832_v24 = vmax.f32 %v1810_v46, 0.0 }
 0xdab   :  { %3094 = vmatmul.mubr.bf16.vlgmr.msra.gmra.mxu0 %v1858_v31 }
 0xdac   :  { %3135 = vmatmul.mubr.bf16.vlgmr.msra.gmra.mxu1 %v1860_v62  ;;  %7115 = vmatpush3.bf16.msra.mxu0 %v7757_v20  ;;  %v1862_v38 = vpack.c.bf16 %v1846_v17, %v1830_v22  ;;  %v1864_v40 = vpack.c.bf16 %v1848_v21, %v1832_v24 }
 0xdad   :  { %3175 = vmatprep.mubr.bf16.mxu0 %v1863_v0  ;;  %7137 = vmatpush3.bf16.msra.mxu1 %v7758_v37 }
 0xdae   :  { %3216 = vmatprep.mubr.bf16.mxu1 %v1865_v44  ;;  %7116 = vmatprep.subr.bf16.mxu0 %v7759_v42 }
 0xdaf   :  { %7138 = vmatprep.subr.bf16.mxu1 %v7760_v43 }
 0xdb0   :  { %7117 = vmatpush3.bf16.msra.mxu0 %v7761_v49 }
 0xdb1   :  { %7139 = vmatpush3.bf16.msra.mxu1 %v7762_v48  ;;  %7118 = vmatprep.subr.bf16.mxu0 %v7763_v50  ;;  %v6612_v50 = vld [vmem:[%s9956_s5] ss:$0 sm:$0xff]  ;;  %s9964_s5 = smov 72  }
 0xdb2   :  { %7140 = vmatprep.subr.bf16.mxu1 %v7764_v53 }
 0xdb4   :  { %7119 = vmatpush3.bf16.msra.mxu0 %v7765_v54 }
 0xdb5   :  { %7141 = vmatpush3.bf16.msra.mxu1 %v7766_v55  ;;  %7120 = vmatprep.subr.bf16.mxu0 %v7767_v57 }
 0xdb6   :  { %7142 = vmatprep.subr.bf16.mxu1 %v7768_v58 }
 0xdb8   :  { %7121 = vmatpush3.bf16.msra.mxu0 %v7769_v59 }
 0xdb9   :  { %7143 = vmatpush3.bf16.msra.mxu1 %v7770_v47  ;;  %7122 = vmatprep.subr.bf16.mxu0 %v7771_v60 }
 0xdba   :  { %7144 = vmatprep.subr.bf16.mxu1 %v7772_v51 }
 0xdbc   :  { %7123 = vmatpush3.bf16.msra.mxu0 %v7773_v29 }
 0xdbd   :  { %7145 = vmatpush3.bf16.msra.mxu1 %v7774_v52  ;;  %7124 = vmatprep.subr.bf16.mxu0 %v7775_v30 }
 0xdbe   :  { %7146 = vmatprep.subr.bf16.mxu1 %v7776_v4 }
 0xdc0   :  { %7125 = vmatpush3.bf16.msra.mxu0 %v7777_v5 }
 0xdc1   :  { %7147 = vmatpush3.bf16.msra.mxu1 %v7778_v6  ;;  %7126 = vmatprep.subr.bf16.mxu0 %v7779_v7 }
 0xdc2   :  { %7148 = vmatprep.subr.bf16.mxu1 %v7780_v8 }
 0xdc4   :  { %7127 = vmatpush3.bf16.msra.mxu0 %v7781_v11 }
 0xdc5   :  { %7149 = vmatpush3.bf16.msra.mxu1 %v7782_v16  ;;  %7128 = vmatprep.subr.bf16.mxu0 %v7783_v14 }
 0xdc6   :  { %7150 = vmatprep.subr.bf16.mxu1 %v7784_v41 }
 0xdc8   :  { %7129 = vmatpush3.bf16.msra.mxu0 %v7785_v19 }
 0xdc9   :  { %7151 = vmatpush3.bf16.msra.mxu1 %v7786_v56  ;;  %7487 = vmatprep.subr.bf16.mxu0 %v8029_v1 }
 0xdca   :  { %7495 = vmatprep.subr.bf16.mxu1 %v8029_v1 }
 0xdcb   :  { %3176 = vmatmul.mubr.bf16.vlgmr.msra.gmra.mxu0 %v1862_v38 }
 0xdcc   :  { %3217 = vmatmul.mubr.bf16.vlgmr.msra.gmra.mxu1 %v1864_v40  ;;  %7491 = vmatprep.mubr.msk.bf16.mxu0 %vm8030_vm0, %v8029_v1 }
 0xdcd   :  { %7497 = vmatprep.mubr.msk.bf16.mxu1 %vm8030_vm0, %v8029_v1 }
 0xe2b   :  { %v6998_v25 = vpop.f32.mrf.mxu0  ;;  %v7020_v26 = vpop.f32.mrf.mxu1 }
 0xe2d   :  { %v6999_v27 = vpop.f32.mrf.mxu0  ;;  %v7021_v28 = vpop.f32.mrf.mxu1 }
 0xe2e   :  { %v7000_v48 = vadd.f32 %v6999_v27, %v6998_v25  ;;  %v7022_v47 = vadd.f32 %v7021_v28, %v7020_v26 }
 0xe2f   :  { %v7001_v20 = vpop.f32.mrf.mxu0  ;;  %v7023_v31 = vpop.f32.mrf.mxu1 }
 0xe30   :  { %v2932_v55 = vadd.f32 %v7000_v48, %v6612_v50 }
 0xe31   :  { %v7002_v35 = vpop.f32.mrf.mxu0  ;;  %v7024_v62 = vpop.f32.mrf.mxu1 }
 0xe32   :  { %v7003_v57 = vadd.f32 %v7002_v35, %v7001_v20  ;;  %v2973_v51 = vadd.f32 %v7022_v47, %v2932_v55  ;;  %v7025_v4 = vadd.f32 %v7024_v62, %v7023_v31 }
 0xe34   :  { %v2935_v29 = vadd.f32 %v7003_v57, %v6612_v50 }
 0xe36   :  { %v2976_v7 = vadd.f32 %v7025_v4, %v2935_v29  ;;  %v7788_v29 = vld [vmem:[%s9892_s13] sm:$0xff]  }
 0xe4b   :  { %v7042_v37 = vpop.f32.mrf.mxu0  ;;  %v7064_v39 = vpop.f32.mrf.mxu1 }
 0xe4d   :  { %v7043_v42 = vpop.f32.mrf.mxu0  ;;  %v7065_v0 = vpop.f32.mrf.mxu1 }
 0xe4e   :  { %v7044_v60 = vadd.f32 %v7043_v42, %v7042_v37  ;;  %v7066_v8 = vadd.f32 %v7065_v0, %v7064_v39 }
 0xe4f   :  { %v7045_v43 = vpop.f32.mrf.mxu0  ;;  %v7067_v44 = vpop.f32.mrf.mxu1 }
 0xe50   :  { %v3014_v5 = vadd.f32 %v7044_v60, %v2973_v51 }
 0xe51   :  { %v7046_v49 = vpop.f32.mrf.mxu0  ;;  %v7068_v54 = vpop.f32.mrf.mxu1 }
 0xe52   :  { %v7047_v6 = vadd.f32 %v7046_v49, %v7045_v43  ;;  %v3055_v12 = vadd.f32 %v7066_v8, %v3014_v5  ;;  %v7069_v14 = vadd.f32 %v7068_v54, %v7067_v44 }
 0xe54   :  { %v3017_v16 = vadd.f32 %v7047_v6, %v2976_v7 }
 0xe56   :  { %v3058_v19 = vadd.f32 %v7069_v14, %v3017_v16  ;;  %v6742_v14 = vld [vmem:[%s9891_s12] ss:$0 sm:$0xff]  ;;  %s9958_s12 = smov 88  }
 0xe6b   :  { %v7086_v53 = vpop.f32.mrf.mxu0 }
 0xe6c   :  { %v7108_v58 = vpop.f32.mrf.mxu1 }
 0xe6d   :  { %v7087_v59 = vpop.f32.mrf.mxu0 }
 0xe6e   :  { %v7109_v52 = vpop.f32.mrf.mxu1  ;;  %v7088_v34 = vadd.f32 %v7087_v59, %v7086_v53 }
 0xe6f   :  { %v7089_v30 = vpop.f32.mrf.mxu0  ;;  %v7110_v17 = vadd.f32 %v7109_v52, %v7108_v58 }
 0xe70   :  { %v7111_v9 = vpop.f32.mrf.mxu1  ;;  %v3096_v36 = vadd.f32 %v7088_v34, %v3055_v12 }
 0xe71   :  { %v7090_v11 = vpop.f32.mrf.mxu0 }
 0xe72   :  { %v7091_v41 = vadd.f32 %v7090_v11, %v7089_v30  ;;  %v7112_v18 = vpop.f32.mrf.mxu1  ;;  %v3137_v22 = vadd.f32 %v7110_v17, %v3096_v36 }
 0xe73   :  { %v7113_v26 = vadd.f32 %v7112_v18, %v7111_v9  ;;  %v6741_v9 = vld [vmem:[%s9957_s1] ss:$0 sm:$0xff] }
 0xe74   :  { %v3099_v24 = vadd.f32 %v7091_v41, %v3058_v19  ;;  %v6743_v19 = vld [vmem:[%s9893_s14] ss:$0 sm:$0xff]  ;;  %s9959_s14 = smov 120  }
 0xe76   :  { %v3140_v35 = vadd.f32 %v7113_v26, %v3099_v24 }
 0xe8b   :  { %v7130_v46 = vpop.f32.mrf.mxu0 }
 0xe8c   :  { %v7152_v56 = vpop.f32.mrf.mxu1 }
 0xe8d   :  { %v7131_v21 = vpop.f32.mrf.mxu0 }
 0xe8e   :  { %v7132_v38 = vadd.f32 %v7131_v21, %v7130_v46  ;;  %v7153_v40 = vpop.f32.mrf.mxu1 }
 0xe8f   :  { %v7133_v25 = vpop.f32.mrf.mxu0  ;;  %v7154_v28 = vadd.f32 %v7153_v40, %v7152_v56 }
 0xe90   :  { %v3178_v27 = vadd.f32 %v7132_v38, %v3137_v22  ;;  %v7155_v20 = vpop.f32.mrf.mxu1 }
 0xe91   :  { %v7134_v31 = vpop.f32.mrf.mxu0 }
 0xe92   :  { %v3219_v37 = vadd.f32 %v7154_v28, %v3178_v27  ;;  %v7135_v62 = vadd.f32 %v7134_v31, %v7133_v25  ;;  %v7156_v39 = vpop.f32.mrf.mxu1 }
 0xe93   :  { %v7157_v0 = vadd.f32 %v7156_v39, %v7155_v20 }
 0xe94   :  { %v3181_v42 = vadd.f32 %v7135_v62, %v3140_v35  ;;  %v3225_v43 = vadd.f32 %v3219_v37, %v8461_v61 }
 0xe96   :  { %v3222_v44 = vadd.f32 %v7157_v0, %v3181_v42  ;;  %v3229_v49 = vsel %vm114_vm1, %v3225_v43, 0.0 }
 0xe97   :  { %3230 = vadd.xlane.f32.xlu0 %v3229_v49 }
 0xe98   :  { %v3226_v48 = vadd.f32 %v3222_v44, %v8463_v45  ;;  %v7787_v45 = vld [vmem:[%s9892_s13 + $0x8] sm:$0xff]  }
 0xe99   :  { %7488 = vmatpush3.bf16.msra.mxu0 %v7787_v45 }
 0xe9a   :  { %v3232_v50 = vsel %vm114_vm1, %v3226_v48, 0.0  ;;  %7489 = vmatprep.subr.bf16.mxu0 %v8029_v1 }
 0xe9b   :  { %3233 = vadd.xlane.f32.xlu1 %v3232_v50 }
 0xe9d   :  { %7490 = vmatpush3.bf16.msra.mxu0 %v7788_v29 }
 0xe9e   :  { %7501 = vmatprep.subr.bf16.mxu0 %v8029_v1 }
 0xf20   :  { %v3231_v53 = vpop.xlane.xlu0 %3230 }
 0xf21   :  { %v3235_v54 = vmul.f32 0.03125, %v3231_v53 }
 0xf23   :  { %v3237_v55 = vsub.f32 %v3225_v43, %v3235_v54 }
 0xf24   :  { %v3234_v57 = vpop.xlane.xlu1 %3233 }
 0xf25   :  { %v3236_v58 = vmul.f32 0.03125, %v3234_v57  ;;  %v3239_v59 = vmul.f32 %v3237_v55, %v3237_v55 }
 0xf27   :  { %v3238_v47 = vsub.f32 %v3226_v48, %v3236_v58  ;;  %v3241_v60 = vsel %vm114_vm1, %v3239_v59, 0.0 }
 0xf28   :  { %3242 = vadd.xlane.f32.xlu0 %v3241_v60 }
 0xf29   :  { %v3240_v61 = vmul.f32 %v3238_v47, %v3238_v47 }
 0xf2b   :  { %v3244_v51 = vsel %vm114_vm1, %v3240_v61, 0.0 }
 0xf2c   :  { %3245 = vadd.xlane.f32.xlu1 %v3244_v51 }
 0xfb1   :  { %v3243_v52 = vpop.xlane.xlu0 %3242 }
 0xfb2   :  { %v3247_v30 = vmul.f32 0.03125, %v3243_v52 }
 0xfb4   :  { %v3249_v4 = vadd.f32 1e-05, %v3247_v30 }
 0xfb5   :  { %v3246_v5 = vpop.xlane.xlu1 %3245 }
 0xfb6   :  { %7957 = vrsqrt.f32 %v3249_v4  ;;  %v3248_v6 = vmul.f32 0.03125, %v3246_v5 }
 0xfb8   :  { %v3250_v7 = vadd.f32 1e-05, %v3248_v6 }
 0xfba   :  { %7959 = vrsqrt.f32 %v3250_v7 }
 0xfc3   :  { %v7958_v8 = vpop.eup %7957 }
 0xfc4   :  { %v3253_v34 = vmul.f32 %v7958_v8, %v3237_v55 }
 0xfc6   :  { %v3261_v16 = vmul.f32 %v6741_v9, %v3253_v34 }
 0xfc7   :  { %v7960_v11 = vpop.eup %7959 }
 0xfc8   :  { %v3254_v12 = vmul.f32 %v7960_v11, %v3238_v47  ;;  %v9056_v41 = vadd.f32 %v6742_v14, %v3261_v16 }
 0xfca   :  { %v3262_v36 = vmul.f32 %v6741_v9, %v3254_v12 }
 0xfcc   :  { %v9058_v18 = vadd.f32 %v6742_v14, %v3262_v36 }
 0xfce   :  { %v3271_v46 = vpack.c.bf16 %v9058_v18, %v9056_v41 }
 0xfd0   :  { %7492 = vmatmul.mubr.msk.bf16.vlgmr.msra.gmra.mxu0 %vm114_vm1, %v3271_v46 }
 0xfd1   :  { %7503 = vmatprep.mubr.msk.bf16.mxu0 %vm8030_vm0, %v8029_v1 }
0x1090   :  { %v3332_v17 = vpop.f32.mrf.mxu0 }
0x1091   :  { %v3333_v56 = vadd.f32 %v6743_v19, %v3332_v17 }
0x1092   :  { %v7493_v21 = vpop.f32.mrf.mxu0 }
0x1093   :  { %v9068_v22 = vpack.c.bf16 %v3333_v56, %v3333_v56  ;;  %v3339_v28 = vmul.f32 0.35355338, %v3333_v56 }
0x1094   :  { %v3335_v24 = vpop.f32.mrf.mxu0 }
0x1095   :  { %v3336_v38 = vadd.f32 %v6743_v19, %v3335_v24  ;;  %3346 = vrot.lane.b32.xlu0 %v9068_v22, %s8031_s2  ;;  %v9079_v35 = vpack.c.bf16 %v3339_v28, %v3339_v28 }
0x1096   :  { %v7494_v40 = vpop.f32.mrf.mxu0 }
0x1097   :  { %v9072_v25 = vpack.c.bf16 %v3336_v38, %v3336_v38  ;;  %v3340_v37 = vmul.f32 0.35355338, %v3336_v38 }
0x1099   :  { %3395 = vrot.lane.b32.xlu1 %v9072_v25, %s8031_s2  ;;  %v9086_v62 = vpack.c.bf16 %v3340_v37, %v3340_v37  ;;  %s9960_s2 = smov 56  }
0x1107   :  { %v3347_v26 = vpop.permute.xlu0 %3346 }
0x1108   :  { %v3352_v27 = vsel %vm168_vm2, %v3347_v26, 0 }
0x1109   :  { %7496 = vmatpush3.bf16.xpose.msra.mxu1 %v3352_v27 }
0x110a   :  { %7507 = vmatprep.subr.bf16.mxu1 %v8029_v1 }
0x110b   :  { %v3396_v20 = vpop.permute.xlu1 %3395 }
0x110c   :  { %v3401_v31 = vsel %vm168_vm2, %v3396_v20, 0 }
0x110d   :  { %7502 = vmatpush3.bf16.xpose.msra.mxu0 %v3401_v31 }
0x110e   :  { %7513 = vmatprep.subr.bf16.mxu0 %v8029_v1 }
0x1110   :  { %7498 = vmatmul.mubr.msk.bf16.vlgmr.msra.gmra.mxu1 %vm168_vm2, %v9079_v35 }
0x1111   :  { %7509 = vmatprep.mubr.msk.bf16.mxu1 %vm8030_vm0, %v8029_v1 }
0x1114   :  { %7504 = vmatmul.mubr.msk.bf16.vlgmr.msra.gmra.mxu0 %vm168_vm2, %v9086_v62 }
0x1115   :  { %7515 = vmatprep.mubr.msk.bf16.mxu0 %vm8030_vm0, %v8029_v1 }
0x11d0   :  { %v3388_v39 = vpop.f32.mrf.mxu1 }
0x11d1   :  { %v3443_v42 = vsel %vm168_vm2, %v3388_v39, -inf }
0x11d2   :  { %v7499_v0 = vpop.f32.mrf.mxu1  ;;  %3444 = vmax.xlane.f32.xlu1 %v3443_v42 }
0x11d4   :  { %v3391_v43 = vpop.f32.mrf.mxu1  ;;  %v3437_v44 = vpop.f32.mrf.mxu0 }
0x11d5   :  { %v3446_v49 = vsel %vm168_vm2, %v3437_v44, -inf }
0x11d6   :  { %v7500_v48 = vpop.f32.mrf.mxu1  ;;  %3447 = vmax.xlane.f32.xlu0 %v3446_v49  ;;  %v7505_v50 = vpop.f32.mrf.mxu0 }
0x11d8   :  { %v3440_v53 = vpop.f32.mrf.mxu0 }
0x11da   :  { %v7506_v54 = vpop.f32.mrf.mxu0 }
0x11e3   :  { %3515 = vrot.lane.b32.xlu1 %v9072_v25, %s8032_s3 }
0x11ec   :  { %3467 = vrot.lane.b32.xlu0 %v9068_v22, %s8032_s3  ;;  %s9961_s3 = smov 80  }
0x125b   :  { %v3445_v55 = vpop.xlane.xlu1 %3444 }
0x125c   :  { %v3449_v57 = vsub.f32 %v3388_v39, %v3445_v55 }
0x125e   :  { %v3451_v58 = vmul.f32 1.442695, %v3449_v57 }
0x125f   :  { %v3516_v59 = vpop.permute.xlu1 %3515  ;;  %v3448_v47 = vpop.xlane.xlu0 %3447 }
0x1260   :  { %7961 = vpow2.f32 %v3451_v58  ;;  %v3521_v60 = vsel %vm293_vm3, %v3516_v59, 0  ;;  %v3450_v61 = vsub.f32 %v3437_v44, %v3448_v47 }
0x1261   :  { %7514 = vmatpush3.bf16.msra.mxu0 %v3521_v60 }
0x1262   :  { %v3453_v51 = vmul.f32 1.442695, %v3450_v61  ;;  %7525 = vmatprep.subr.bf16.mxu0 %v8029_v1 }
0x1263   :  { %v3468_v45 = vpop.permute.xlu0 %3467 }
0x1264   :  { %7963 = vpow2.f32 %v3453_v51  ;;  %v3473_v29 = vsel %vm293_vm3, %v3468_v45, 0 }
0x1265   :  { %7508 = vmatpush3.bf16.msra.mxu1 %v3473_v29 }
0x1266   :  { %7519 = vmatprep.subr.bf16.mxu1 %v8029_v1 }
0x126d   :  { %v7962_v52 = vpop.eup %7961 }
0x126e   :  { %v3455_v30 = vsel %vm168_vm2, %v7962_v52, 0.0 }
0x126f   :  { %3456 = vadd.xlane.f32.xlu0 %v3455_v30 }
0x1271   :  { %v7964_v4 = vpop.eup %7963 }
0x1272   :  { %v3458_v5 = vsel %vm168_vm2, %v7964_v4, 0.0 }
0x1273   :  { %3459 = vadd.xlane.f32.xlu1 %v3458_v5 }
0x1284   :  { %3566 = vrot.lane.b32.xlu1 %v9068_v22, %s9958_s12 }
0x1285   :  { %3617 = vrot.lane.b32.xlu0 %v9072_v25, %s9958_s12 }
0x1288   :  { %3564 = vrot.lane.b32.xlu1 %v9079_v35, %s9959_s14 }
0x1289   :  { %3615 = vrot.lane.b32.xlu0 %v9086_v62, %s9959_s14 }
0x12f8   :  { %v3457_v6 = vpop.xlane.xlu0 %3456 }
0x12f9   :  { %7965 = vrcp.f32 %v3457_v6 }
0x12fc   :  { %v3460_v7 = vpop.xlane.xlu1 %3459  ;;  %v3618_v36 = vpop.permute.xlu0 %3617 }
0x12fd   :  { %7967 = vrcp.f32 %v3460_v7  ;;  %v3623_v19 = vsel %vm168_vm2, %v3618_v36, 0 }
0x1300   :  { %v3567_v9 = vpop.permute.xlu1 %3566  ;;  %v3616_v56 = vpop.permute.xlu0 %3615 }
0x1301   :  { %v3572_v16 = vsel %vm168_vm2, %v3567_v9, 0 }
0x1304   :  { %v3565_v17 = vpop.permute.xlu1 %3564 }
0x1306   :  { %v7966_v8 = vpop.eup %7965 }
0x1307   :  { %v3463_v34 = vmul.f32 %v7966_v8, %v7962_v52 }
0x1309   :  { %v3465_v11 = vpack.c.bf16 %v3463_v34, %v3463_v34 }
0x130a   :  { %v7968_v12 = vpop.eup %7967 }
0x130b   :  { %7510 = vmatmul.mubr.msk.bf16.vlgmr.msra.gmra.mxu1 %vm168_vm2, %v3465_v11  ;;  %v3464_v14 = vmul.f32 %v7968_v12, %v7964_v4 }
0x130c   :  { %7520 = vmatpush3.bf16.xpose.msra.mxu1 %v3572_v16  ;;  %7521 = vmatprep.mubr.msk.bf16.mxu1 %vm8030_vm0, %v8029_v1 }
0x130d   :  { %v3466_v46 = vpack.c.bf16 %v3464_v14, %v3464_v14  ;;  %7531 = vmatprep.subr.bf16.mxu1 %v8029_v1 }
0x130f   :  { %7516 = vmatmul.mubr.msk.bf16.vlgmr.msra.gmra.mxu0 %vm168_vm2, %v3466_v46 }
0x1310   :  { %7526 = vmatpush3.bf16.xpose.msra.mxu0 %v3623_v19  ;;  %7527 = vmatprep.mubr.msk.bf16.mxu0 %vm8030_vm0, %v8029_v1 }
0x1311   :  { %7537 = vmatprep.subr.bf16.mxu0 %v8029_v1 }
0x1313   :  { %7522 = vmatmul.mubr.msk.bf16.vlgmr.msra.gmra.mxu1 %vm168_vm2, %v3565_v17 }
0x1314   :  { %7533 = vmatprep.mubr.msk.bf16.mxu1 %vm8030_vm0, %v8029_v1 }
0x1317   :  { %7528 = vmatmul.mubr.msk.bf16.vlgmr.msra.gmra.mxu0 %vm168_vm2, %v3616_v56 }
0x1318   :  { %7539 = vmatprep.mubr.msk.bf16.mxu0 %vm8030_vm0, %v8029_v1 }
0x13cb   :  { %v9128_v21 = vpop.f32.mrf.mxu1 }
0x13cd   :  { %v7511_v24 = vpop.f32.mrf.mxu1 }
0x13cf   :  { %v3512_v38 = vpop.f32.mrf.mxu1  ;;  %v9130_v40 = vpop.f32.mrf.mxu0 }
0x13d1   :  { %v7512_v26 = vpop.f32.mrf.mxu1  ;;  %v7517_v27 = vpop.f32.mrf.mxu0 }
0x13d3   :  { %v3560_v28 = vpop.f32.mrf.mxu0  ;;  %v3608_v20 = vpop.f32.mrf.mxu1 }
0x13d4   :  { %v3665_v31 = vsel %vm168_vm2, %v3608_v20, -inf }
0x13d5   :  { %3666 = vmax.xlane.f32.xlu1 %v3665_v31  ;;  %v7518_v37 = vpop.f32.mrf.mxu0  ;;  %v7523_v39 = vpop.f32.mrf.mxu1 }
0x13d7   :  { %v3611_v42 = vpop.f32.mrf.mxu1  ;;  %v3659_v0 = vpop.f32.mrf.mxu0 }
0x13d8   :  { %v3668_v43 = vsel %vm168_vm2, %v3659_v0, -inf }
0x13d9   :  { %v7524_v44 = vpop.f32.mrf.mxu1  ;;  %3669 = vmax.xlane.f32.xlu0 %v3668_v43  ;;  %v7529_v49 = vpop.f32.mrf.mxu0 }
0x13db   :  { %v3662_v48 = vpop.f32.mrf.mxu0 }
0x13dd   :  { %v7530_v50 = vpop.f32.mrf.mxu0 }
0x13e6   :  { %3737 = vrot.lane.b32.xlu1 %v9072_v25, %s9960_s2 }
0x13ef   :  { %3689 = vrot.lane.b32.xlu0 %v9068_v22, %s9960_s2 }
0x145e   :  { %v3667_v53 = vpop.xlane.xlu1 %3666 }
0x145f   :  { %v3671_v54 = vsub.f32 %v3608_v20, %v3667_v53 }
0x1461   :  { %v3673_v55 = vmul.f32 1.442695, %v3671_v54 }
0x1462   :  { %v3738_v57 = vpop.permute.xlu1 %3737  ;;  %v3670_v58 = vpop.xlane.xlu0 %3669 }
0x1463   :  { %7969 = vpow2.f32 %v3673_v55  ;;  %v3743_v59 = vsel %vm293_vm3, %v3738_v57, 0  ;;  %v3672_v47 = vsub.f32 %v3659_v0, %v3670_v58 }
0x1464   :  { %7538 = vmatpush3.bf16.msra.mxu0 %v3743_v59 }
0x1465   :  { %v3675_v60 = vmul.f32 1.442695, %v3672_v47  ;;  %7549 = vmatprep.subr.bf16.mxu0 %v8029_v1 }
0x1466   :  { %v3690_v61 = vpop.permute.xlu0 %3689 }
0x1467   :  { %7971 = vpow2.f32 %v3675_v60  ;;  %v3695_v51 = vsel %vm293_vm3, %v3690_v61, 0 }
0x1468   :  { %7532 = vmatpush3.bf16.msra.mxu1 %v3695_v51 }
0x1469   :  { %7543 = vmatprep.subr.bf16.mxu1 %v8029_v1 }
0x1470   :  { %v7970_v45 = vpop.eup %7969 }
0x1471   :  { %v3677_v29 = vsel %vm168_vm2, %v7970_v45, 0.0 }
0x1472   :  { %3678 = vadd.xlane.f32.xlu0 %v3677_v29 }
0x1474   :  { %v7972_v52 = vpop.eup %7971 }
0x1475   :  { %v3680_v30 = vsel %vm168_vm2, %v7972_v52, 0.0 }
0x1476   :  { %3681 = vadd.xlane.f32.xlu1 %v3680_v30 }
0x1487   :  { %3787 = vrot.lane.b32.xlu1 %v9068_v22, %s9961_s3 }
0x1488   :  { %3837 = vrot.lane.b32.xlu0 %v9072_v25, %s9961_s3 }
0x148b   :  { %3785 = vrot.lane.b32.xlu1 %v9079_v35, %s9962_s11 }
0x148c   :  { %3835 = vrot.lane.b32.xlu0 %v9086_v62, %s9962_s11 }
0x14fb   :  { %v3679_v4 = vpop.xlane.xlu0 %3678 }
0x14fc   :  { %7973 = vrcp.f32 %v3679_v4 }
0x14ff   :  { %v3682_v5 = vpop.xlane.xlu1 %3681  ;;  %v3838_v16 = vpop.permute.xlu0 %3837 }
0x1500   :  { %7975 = vrcp.f32 %v3682_v5  ;;  %v3843_v36 = vsel %vm168_vm2, %v3838_v16, 0 }
0x1503   :  { %v3788_v8 = vpop.permute.xlu1 %3787  ;;  %v3836_v19 = vpop.permute.xlu0 %3835 }
0x1504   :  { %v3793_v11 = vsel %vm168_vm2, %v3788_v8, 0 }
0x1507   :  { %v3786_v46 = vpop.permute.xlu1 %3785 }
0x1509   :  { %v7974_v6 = vpop.eup %7973 }
0x150a   :  { %v3685_v7 = vmul.f32 %v7974_v6, %v7970_v45 }
0x150c   :  { %v3687_v34 = vpack.c.bf16 %v3685_v7, %v3685_v7 }
0x150d   :  { %v7976_v9 = vpop.eup %7975 }
0x150e   :  { %7534 = vmatmul.mubr.msk.bf16.vlgmr.msra.gmra.mxu1 %vm168_vm2, %v3687_v34  ;;  %v3686_v12 = vmul.f32 %v7976_v9, %v7972_v52 }
0x150f   :  { %7544 = vmatpush3.bf16.xpose.msra.mxu1 %v3793_v11  ;;  %7545 = vmatprep.mubr.msk.bf16.mxu1 %vm8030_vm0, %v8029_v1 }
0x1510   :  { %v3688_v14 = vpack.c.bf16 %v3686_v12, %v3686_v12  ;;  %7555 = vmatprep.subr.bf16.mxu1 %v8029_v1 }
0x1512   :  { %7540 = vmatmul.mubr.msk.bf16.vlgmr.msra.gmra.mxu0 %vm168_vm2, %v3688_v14 }
0x1513   :  { %7550 = vmatpush3.bf16.xpose.msra.mxu0 %v3843_v36  ;;  %7551 = vmatprep.mubr.msk.bf16.mxu0 %vm8030_vm0, %v8029_v1 }
0x1514   :  { %7561 = vmatprep.subr.bf16.mxu0 %v8029_v1 }
0x1516   :  { %7546 = vmatmul.mubr.msk.bf16.vlgmr.msra.gmra.mxu1 %vm168_vm2, %v3786_v46 }
0x1517   :  { %7557 = vmatprep.mubr.msk.bf16.mxu1 %vm8030_vm0, %v8029_v1 }
0x151a   :  { %7552 = vmatmul.mubr.msk.bf16.vlgmr.msra.gmra.mxu0 %vm168_vm2, %v3836_v19 }
0x151b   :  { %7563 = vmatprep.mubr.msk.bf16.mxu0 %vm8030_vm0, %v8029_v1 }
0x15ce   :  { %v9168_v17 = vpop.f32.mrf.mxu1 }
0x15d0   :  { %v7535_v56 = vpop.f32.mrf.mxu1 }
0x15d2   :  { %v3734_v24 = vpop.f32.mrf.mxu1  ;;  %v9170_v38 = vpop.f32.mrf.mxu0 }
0x15d3   :  { %v7640_v26 = vpack.i.bf16 %v9170_v38, %v9168_v17 }
0x15d4   :  { %v7536_v27 = vpop.f32.mrf.mxu1  ;;  %v7541_v28 = vpop.f32.mrf.mxu0 }
0x15d6   :  { %v3782_v20 = vpop.f32.mrf.mxu0  ;;  %v3829_v31 = vpop.f32.mrf.mxu1 }
0x15d7   :  { %v3885_v37 = vsel %vm168_vm2, %v3829_v31, -inf }
0x15d8   :  { %3886 = vmax.xlane.f32.xlu1 %v3885_v37  ;;  %v7542_v39 = vpop.f32.mrf.mxu0  ;;  %v7547_v42 = vpop.f32.mrf.mxu1 }
0x15da   :  { %v3832_v0 = vpop.f32.mrf.mxu1  ;;  %v3879_v43 = vpop.f32.mrf.mxu0 }
0x15db   :  { %v3888_v44 = vsel %vm168_vm2, %v3879_v43, -inf }
0x15dc   :  { %v7548_v49 = vpop.f32.mrf.mxu1  ;;  %3889 = vmax.xlane.f32.xlu0 %v3888_v44  ;;  %v7553_v48 = vpop.f32.mrf.mxu0 }
0x15de   :  { %v3882_v50 = vpop.f32.mrf.mxu0 }
0x15e0   :  { %v7554_v53 = vpop.f32.mrf.mxu0 }
0x15e9   :  { %3957 = vrot.lane.b32.xlu1 %v9072_v25, %s9963_s9 }
0x15f2   :  { %3909 = vrot.lane.b32.xlu0 %v9068_v22, %s9963_s9 }
0x1661   :  { %v3887_v54 = vpop.xlane.xlu1 %3886 }
0x1662   :  { %v3891_v55 = vsub.f32 %v3829_v31, %v3887_v54 }
0x1664   :  { %v3893_v57 = vmul.f32 1.442695, %v3891_v55 }
0x1665   :  { %v3958_v58 = vpop.permute.xlu1 %3957  ;;  %v3890_v59 = vpop.xlane.xlu0 %3889 }
0x1666   :  { %7977 = vpow2.f32 %v3893_v57  ;;  %v3963_v47 = vsel %vm293_vm3, %v3958_v58, 0  ;;  %v3892_v60 = vsub.f32 %v3879_v43, %v3890_v59 }
0x1667   :  { %7562 = vmatpush3.bf16.msra.mxu0 %v3963_v47 }
0x1668   :  { %v3895_v61 = vmul.f32 1.442695, %v3892_v60  ;;  %7573 = vmatprep.subr.bf16.mxu0 %v8029_v1 }
0x1669   :  { %v3910_v51 = vpop.permute.xlu0 %3909 }
0x166a   :  { %7979 = vpow2.f32 %v3895_v61  ;;  %v3915_v45 = vsel %vm293_vm3, %v3910_v51, 0 }
0x166b   :  { %7556 = vmatpush3.bf16.msra.mxu1 %v3915_v45 }
0x166c   :  { %7567 = vmatprep.subr.bf16.mxu1 %v8029_v1 }
0x1673   :  { %v7978_v29 = vpop.eup %7977 }
0x1674   :  { %v3897_v52 = vsel %vm168_vm2, %v7978_v29, 0.0 }
0x1675   :  { %3898 = vadd.xlane.f32.xlu0 %v3897_v52 }
0x1677   :  { %v7980_v30 = vpop.eup %7979 }
0x1678   :  { %v3900_v4 = vsel %vm168_vm2, %v7980_v30, 0.0 }
0x1679   :  { %3901 = vadd.xlane.f32.xlu1 %v3900_v4 }
0x168a   :  { %4007 = vrot.lane.b32.xlu1 %v9068_v22, %s9964_s5 }
0x168b   :  { %4057 = vrot.lane.b32.xlu0 %v9072_v25, %s9964_s5 }
0x168e   :  { %4005 = vrot.lane.b32.xlu1 %v9079_v35, %s9965_s0 }
0x168f   :  { %4055 = vrot.lane.b32.xlu0 %v9086_v62, %s9965_s0 }
0x16fe   :  { %v3899_v5 = vpop.xlane.xlu0 %3898 }
0x16ff   :  { %7981 = vrcp.f32 %v3899_v5 }
0x1702   :  { %v3902_v6 = vpop.xlane.xlu1 %3901  ;;  %v4058_v14 = vpop.permute.xlu0 %4057 }
0x1703   :  { %7983 = vrcp.f32 %v3902_v6  ;;  %v4063_v62 = vsel %vm168_vm2, %v4058_v14, 0 }
0x1706   :  { %v4008_v34 = vpop.permute.xlu1 %4007  ;;  %v4056_v46 = vpop.permute.xlu0 %4055 }
0x1707   :  { %v4013_v12 = vsel %vm168_vm2, %v4008_v34, 0 }
0x170a   :  { %v4006_v36 = vpop.permute.xlu1 %4005 }
0x170c   :  { %v7982_v7 = vpop.eup %7981 }
0x170d   :  { %v3905_v8 = vmul.f32 %v7982_v7, %v7978_v29 }
0x170f   :  { %v3907_v9 = vpack.c.bf16 %v3905_v8, %v3905_v8 }
0x1710   :  { %v7984_v11 = vpop.eup %7983 }
0x1711   :  { %7558 = vmatmul.mubr.msk.bf16.vlgmr.msra.gmra.mxu1 %vm168_vm2, %v3907_v9  ;;  %v3906_v16 = vmul.f32 %v7984_v11, %v7980_v30  ;;  %v7789_v9 = vld [vmem:[%s9894_s15 + $0x8] sm:$0xff]   ;;  %v7790_v11 = vld [vmem:[%s9894_s15] sm:$0xff]  }
0x1712   :  { %7568 = vmatpush3.bf16.xpose.msra.mxu1 %v4013_v12  ;;  %7569 = vmatprep.mubr.msk.bf16.mxu1 %vm8030_vm0, %v8029_v1 }
0x1713   :  { %v3908_v35 = vpack.c.bf16 %v3906_v16, %v3906_v16  ;;  %7579 = vmatprep.subr.bf16.mxu1 %v8029_v1 }
0x1715   :  { %7564 = vmatmul.mubr.msk.bf16.vlgmr.msra.gmra.mxu0 %vm168_vm2, %v3908_v35 }
0x1716   :  { %7574 = vmatpush3.bf16.xpose.msra.mxu0 %v4063_v62  ;;  %7575 = vmatprep.mubr.msk.bf16.mxu0 %vm8030_vm0, %v8029_v1 }
0x1717   :  { %7585 = vmatprep.subr.bf16.mxu0 %v8029_v1 }
0x1719   :  { %7570 = vmatmul.mubr.msk.bf16.vlgmr.msra.gmra.mxu1 %vm168_vm2, %v4006_v36 }
0x171a   :  { %7581 = vmatprep.mubr.msk.bf16.mxu1 %vm8030_vm0, %v8029_v1 }
0x171d   :  { %7576 = vmatmul.mubr.msk.bf16.vlgmr.msra.gmra.mxu0 %vm168_vm2, %v4056_v46 }
0x171e   :  { %7587 = vmatprep.mubr.msk.bf16.mxu0 %vm8030_vm0, %v8029_v1 }
0x17d1   :  { %v3951_v19 = vpop.f32.mrf.mxu1 }
0x17d3   :  { %v7559_v56 = vpop.f32.mrf.mxu1 }
0x17d5   :  { %v3954_v24 = vpop.f32.mrf.mxu1  ;;  %v3999_v27 = vpop.f32.mrf.mxu0 }
0x17d6   :  { %v7645_v28 = vpack.i.bf16 %v3999_v27, %v3951_v19 }
0x17d7   :  { %v7560_v20 = vpop.f32.mrf.mxu1  ;;  %v7565_v31 = vpop.f32.mrf.mxu0 }
0x17d9   :  { %v4002_v37 = vpop.f32.mrf.mxu0  ;;  %v4049_v39 = vpop.f32.mrf.mxu1 }
0x17da   :  { %v4105_v42 = vsel %vm168_vm2, %v4049_v39, -inf }
0x17db   :  { %4106 = vmax.xlane.f32.xlu1 %v4105_v42  ;;  %v7566_v0 = vpop.f32.mrf.mxu0  ;;  %v7571_v43 = vpop.f32.mrf.mxu1 }
0x17dd   :  { %v4052_v44 = vpop.f32.mrf.mxu1  ;;  %v4099_v49 = vpop.f32.mrf.mxu0 }
0x17de   :  { %v4108_v48 = vsel %vm168_vm2, %v4099_v49, -inf }
0x17df   :  { %v7572_v50 = vpop.f32.mrf.mxu1  ;;  %4109 = vmax.xlane.f32.xlu0 %v4108_v48  ;;  %v7577_v53 = vpop.f32.mrf.mxu0 }
0x17e1   :  { %v4102_v54 = vpop.f32.mrf.mxu0 }
0x17e3   :  { %v7578_v55 = vpop.f32.mrf.mxu0 }
0x1864   :  { %v4107_v57 = vpop.xlane.xlu1 %4106 }
0x1865   :  { %v4111_v58 = vsub.f32 %v4049_v39, %v4107_v57 }
0x1867   :  { %v4113_v59 = vmul.f32 1.442695, %v4111_v58 }
0x1868   :  { %v4110_v47 = vpop.xlane.xlu0 %4109 }
0x1869   :  { %7985 = vpow2.f32 %v4113_v59  ;;  %v4112_v60 = vsub.f32 %v4099_v49, %v4110_v47 }
0x186b   :  { %v4115_v61 = vmul.f32 1.442695, %v4112_v60 }
0x186d   :  { %7987 = vpow2.f32 %v4115_v61 }
0x1876   :  { %v7986_v51 = vpop.eup %7985 }
0x1877   :  { %v4117_v45 = vsel %vm168_vm2, %v7986_v51, 0.0 }
0x1878   :  { %4118 = vadd.xlane.f32.xlu0 %v4117_v45 }
0x187a   :  { %v7988_v29 = vpop.eup %7987 }
0x187b   :  { %v4120_v52 = vsel %vm168_vm2, %v7988_v29, 0.0 }
0x187c   :  { %4121 = vadd.xlane.f32.xlu1 %v4120_v52 }
0x188d   :  { %4177 = vrot.lane.b32.xlu1 %v9072_v25, %s9966_s8 }
0x188e   :  { %4129 = vrot.lane.b32.xlu0 %v9068_v22, %s9966_s8 }
0x1891   :  { %7641 = vrot.lane.b32.xlu1 %v7640_v26, %s9967_s30 }
0x1892   :  { %7646 = vrot.lane.b32.xlu0 %v7645_v28, %s9968_s7 }
0x1901   :  { %v4119_v30 = vpop.xlane.xlu0 %4118 }
0x1902   :  { %7989 = vrcp.f32 %v4119_v30 }
0x1905   :  { %v4122_v4 = vpop.xlane.xlu1 %4121  ;;  %v4130_v5 = vpop.permute.xlu0 %4129 }
0x1906   :  { %7991 = vrcp.f32 %v4122_v4  ;;  %v4135_v6 = vsel %vm293_vm3, %v4130_v5, 0 }
0x1907   :  { %7580 = vmatpush3.bf16.msra.mxu1 %v4135_v6 }
0x1908   :  { %7591 = vmatprep.subr.bf16.mxu1 %v8029_v1 }
0x1909   :  { %v4178_v25 = vpop.permute.xlu1 %4177  ;;  %v7647_v20 = vpop.permute.xlu0 %7646 }
0x190a   :  { %v4183_v22 = vsel %vm293_vm3, %v4178_v25, 0  ;;  %v7649_v39 = vunpack.i.h.bf16 %v7647_v20  ;;  %v7648_v42 = vunpack.i.l.bf16 %v7647_v20 }
0x190b   :  { %7586 = vmatpush3.bf16.msra.mxu0 %v4183_v22 }
0x190d   :  { %v7642_v24 = vpop.permute.xlu1 %7641 }
0x190e   :  { %v7644_v27 = vunpack.i.h.bf16 %v7642_v24  ;;  %v7643_v28 = vunpack.i.l.bf16 %v7642_v24  ;;  %v4397_v24 = vld [vmem:[%s9898_s19 + $0xd0] sm:$0xff] }
0x190f   :  { %v7990_v7 = vpop.eup %7989 }
0x1910   :  { %v4125_v8 = vmul.f32 %v7990_v7, %v7986_v51  ;;  %v4250_v31 = vsel %vm168_vm2, %v9130_v40, %v7644_v27  ;;  %v4249_v37 = vsel %vm168_vm2, %v9128_v21, %v7643_v28  ;;  %v6763_v21 = vld [vmem:[%s9895_s16] ss:$0 sm:$0xff]  ;;  %v4390_v27 = vld [vmem:[%s9898_s19 + $0x98] sm:$0xff] }
0x1911   :  { %v4251_v49 = vsel %vm1073_vm4, %v4249_v37, %v7648_v42  ;;  %v4252_v48 = vsel %vm1073_vm4, %v4250_v31, %v7649_v39  ;;  %v4398_v31 = vld [vmem:[%s9898_s19 + $0xd8] sm:$0xff] }
0x1912   :  { %v4127_v17 = vpack.c.bf16 %v4125_v8, %v4125_v8  ;;  %v4395_v8 = vld [vmem:[%s9898_s19 + $0xc0] sm:$0xff]  ;;  %v6791_v37 = vcombine.low %v4390_v27, %v4398_v31  ;;  %v6792_v39 = vcombine.high %v4390_v27, %v4398_v31  ;;  %v4394_v27 = vld [vmem:[%s9898_s19 + $0xb8] sm:$0xff] }
0x1913   :  { %v7992_v38 = vpop.eup %7991 }
0x1914   :  { %7582 = vmatmul.mubr.msk.bf16.vlgmr.msra.gmra.mxu1 %vm168_vm2, %v4127_v17  ;;  %v4126_v26 = vmul.f32 %v7992_v38, %v7988_v29  ;;  %v4388_v17 = vld [vmem:[%s9898_s19 + $0x88] sm:$0xff] }
0x1915   :  { %7595 = vmatprep.mubr.msk.bf16.mxu1 %vm8030_vm0, %v8029_v1  ;;  %7592 = vmatpush3.bf16.msra.mxu1 %v7789_v9 }
0x1916   :  { %v4128_v34 = vpack.c.bf16 %v4126_v26, %v4126_v26  ;;  %7593 = vmatprep.subr.bf16.mxu1 %v8029_v1  ;;  %v4396_v26 = vld [vmem:[%s9898_s19 + $0xc8] sm:$0xff] }
0x1917   :  { %v6787_v9 = vcombine.low %v4388_v17, %v4396_v26 }
0x1918   :  { %7588 = vmatmul.mubr.msk.bf16.vlgmr.msra.gmra.mxu0 %vm168_vm2, %v4128_v34 }
0x1919   :  { %4691 = vmatprep.mubr.bf16.mxu0 %v8045_v23  ;;  %7594 = vmatpush3.bf16.msra.mxu1 %v7790_v11  ;;  %v6788_v11 = vcombine.high %v4388_v17, %v4396_v26  ;;  %v4392_v17 = vld [vmem:[%s9898_s19 + $0xa8] sm:$0xff] }
0x191b   :  { %4712 = vmatprep.subr.bf16.mxu1 %v6788_v11 }
0x19d4   :  { %v4171_v12 = vpop.f32.mrf.mxu1 }
0x19d6   :  { %v7583_v16 = vpop.f32.mrf.mxu1 }
0x19d7   :  { %v4379_v16 = vld [vmem:[%s9898_s19 + $0x40] sm:$0xff] }
0x19d8   :  { %v4174_v14 = vpop.f32.mrf.mxu1  ;;  %v4219_v35 = vpop.f32.mrf.mxu0 }
0x19d9   :  { %v7650_v62 = vpack.i.bf16 %v4219_v35, %v4171_v12  ;;  %v4371_v12 = vld [vmem:[%s9898_s19] sm:$0xff]  ;;  %v4372_v14 = vld [vmem:[%s9898_s19 + $0x8] sm:$0xff] }
0x19da   :  { %v7584_v36 = vpop.f32.mrf.mxu1  ;;  %v7589_v46 = vpop.f32.mrf.mxu0  ;;  %v6770_v35 = vcombine.high %v4371_v12, %v4379_v16 }
0x19db   :  { %7651 = vrot.lane.b32.xlu1 %v7650_v62, %s9969_s29  ;;  %v4380_v62 = vld [vmem:[%s9898_s19 + $0x48] sm:$0xff]  ;;  %v6769_v36 = vcombine.low %v4371_v12, %v4379_v16  ;;  %v4375_v12 = vld [vmem:[%s9898_s19 + $0x20] sm:$0xff] }
0x19dc   :  { %v4222_v19 = vpop.f32.mrf.mxu0  ;;  %v6771_v46 = vcombine.low %v4372_v14, %v4380_v62  ;;  %v4383_v16 = vld [vmem:[%s9898_s19 + $0x60] sm:$0xff] }
0x19dd   :  { %v6772_v19 = vcombine.high %v4372_v14, %v4380_v62  ;;  %v4376_v14 = vld [vmem:[%s9898_s19 + $0x28] sm:$0xff] }
0x19de   :  { %v7590_v56 = vpop.f32.mrf.mxu0 }
0x19df   :  { %v4389_v56 = vld [vmem:[%s9898_s19 + $0x90] sm:$0xff] }
0x19e0   :  { %v6789_v28 = vcombine.low %v4389_v56, %v4397_v24  ;;  %v6790_v20 = vcombine.high %v4389_v56, %v4397_v24  ;;  %v4393_v56 = vld [vmem:[%s9898_s19 + $0xb0] sm:$0xff] }
0x19e1   :  { %v4401_v24 = vld [vmem:[%s9898_s19 + $0xf0] sm:$0xff] }
0x1a4d   :  { %v7652_v0 = vpop.permute.xlu1 %7651 }
0x1a4e   :  { %v7654_v43 = vunpack.i.h.bf16 %v7652_v0  ;;  %v7653_v44 = vunpack.i.l.bf16 %v7652_v0 }
0x1a50   :  { %v4254_v50 = vsel %vm1076_vm5, %v4252_v48, %v7654_v43  ;;  %v4253_v53 = vsel %vm1076_vm5, %v4251_v49, %v7653_v44 }
0x1a51   :  { %v4255_v54 = vpack.c.bf16 %v4254_v50, %v4253_v53  ;;  %v6767_v53 = vld [vmem:[%s9896_s17] ss:$0 sm:$0xff] }
0x1a53   :  { %7596 = vmatmul.mubr.msk.bf16.vlgmr.msra.gmra.mxu1 %vm114_vm1, %v4255_v54 }
0x1a54   :  { %4732 = vmatprep.mubr.bf16.mxu1 %v8045_v23  ;;  %4713 = vmatpush1.bf16.msra.mxu1 %v6787_v9 }
0x1a55   :  { %4714 = vmatprep.subr.bf16.mxu1 %v6772_v19 }
0x1a58   :  { %4715 = vmatpush1.bf16.msra.mxu1 %v6771_v46  ;;  %v6778_v46 = vcombine.high %v4375_v12, %v4383_v16 }
0x1a59   :  { %4794 = vmatprep.subr.bf16.mxu1 %v6792_v39 }
0x1b13   :  { %v4316_v40 = vpop.f32.mrf.mxu1 }
0x1b14   :  { %v4317_v55 = vadd.f32 %v6763_v21, %v4316_v40 }
0x1b15   :  { %v7597_v57 = vpop.f32.mrf.mxu1 }
0x1b16   :  { %v4323_v58 = vadd.f32 %v4317_v55, %v9056_v41 }
0x1b17   :  { %v4319_v59 = vpop.f32.mrf.mxu1 }
0x1b18   :  { %v4320_v47 = vadd.f32 %v6763_v21, %v4319_v59  ;;  %v4327_v60 = vsel %vm114_vm1, %v4323_v58, 0.0  ;;  %v6768_v21 = vld [vmem:[%s9897_s18] ss:$0 sm:$0xff] }
0x1b19   :  { %4328 = vadd.xlane.f32.xlu0 %v4327_v60  ;;  %v7598_v61 = vpop.f32.mrf.mxu1 }
0x1b1a   :  { %v4324_v51 = vadd.f32 %v4320_v47, %v9058_v18  ;;  %v4387_v18 = vld [vmem:[%s9898_s19 + $0x80] sm:$0xff] }
0x1b1b   :  { %v6786_v38 = vcombine.high %v4387_v18, %v4395_v8  ;;  %v6785_v34 = vcombine.low %v4387_v18, %v4395_v8  ;;  %v4391_v18 = vld [vmem:[%s9898_s19 + $0xa0] sm:$0xff] }
0x1b1c   :  { %v4330_v45 = vsel %vm114_vm1, %v4324_v51, 0.0  ;;  %v4399_v8 = vld [vmem:[%s9898_s19 + $0xe0] sm:$0xff] }
0x1b1d   :  { %4331 = vadd.xlane.f32.xlu1 %v4330_v45  ;;  %4671 = vmatprep.subr.bf16.mxu0 %v6786_v38  ;;  %v4400_v38 = vld [vmem:[%s9898_s19 + $0xe8] sm:$0xff]  ;;  %v6794_v9 = vcombine.high %v4391_v18, %v4399_v8  ;;  %v6793_v62 = vcombine.low %v4391_v18, %v4399_v8  ;;  %v7810_v18 = vld [vmem:[%s9900_s21 + $0x98] sm:$0xff]   ;;  %v7811_v8 = vld [vmem:[%s9900_s21 + $0x50] sm:$0xff]  }
0x1b1e   :  { %4672 = vmatpush1.bf16.msra.mxu0 %v6785_v34  ;;  %v6796_v11 = vcombine.high %v4392_v17, %v4400_v38 }
0x1b1f   :  { %4673 = vmatprep.subr.bf16.mxu0 %v6770_v35  ;;  %v4384_v35 = vld [vmem:[%s9898_s19 + $0x68] sm:$0xff] }
0x1b20   :  { %v6780_v19 = vcombine.high %v4376_v14, %v4384_v35  ;;  %v6779_v31 = vcombine.low %v4376_v14, %v4384_v35  ;;  %v7820_v14 = vld [vmem:[%s9900_s21 + $0xc0] sm:$0xff]  }
0x1b21   :  { %v7821_v35 = vld [vmem:[%s9900_s21] sm:$0xff]  }
0x1b22   :  { %4674 = vmatpush1.bf16.msra.mxu0 %v6769_v36  ;;  %v6795_v36 = vcombine.low %v4392_v17, %v4400_v38  ;;  %v7812_v17 = vld [vmem:[%s9900_s21 + $0xd0] sm:$0xff]  }
0x1b23   :  { %4753 = vmatprep.subr.bf16.mxu0 %v6790_v20  ;;  %v6777_v20 = vcombine.low %v4375_v12, %v4383_v16  ;;  %v7813_v38 = vld [vmem:[%s9900_s21 + $0x10] sm:$0xff]   ;;  %v7818_v12 = vld [vmem:[%s9900_s21 + $0x88] sm:$0xff]   ;;  %v7819_v16 = vld [vmem:[%s9900_s21 + $0x40] sm:$0xff]  }
0x1ba2   :  { %v4329_v29 = vpop.xlane.xlu0 %4328 }
0x1ba3   :  { %v4333_v52 = vmul.f32 0.03125, %v4329_v29  ;;  %v4373_v29 = vld [vmem:[%s9898_s19 + $0x10] sm:$0xff] }
0x1ba5   :  { %v4335_v30 = vsub.f32 %v4323_v58, %v4333_v52 }
0x1ba6   :  { %v4332_v4 = vpop.xlane.xlu1 %4331 }
0x1ba7   :  { %v4334_v5 = vmul.f32 0.03125, %v4332_v4  ;;  %v4337_v6 = vmul.f32 %v4335_v30, %v4335_v30  ;;  %v4381_v4 = vld [vmem:[%s9898_s19 + $0x50] sm:$0xff] }
0x1ba8   :  { %v6773_v26 = vcombine.low %v4373_v29, %v4381_v4 }
0x1ba9   :  { %v4336_v25 = vsub.f32 %v4324_v51, %v4334_v5  ;;  %v4339_v41 = vsel %vm114_vm1, %v4337_v6, 0.0  ;;  %v4374_v5 = vld [vmem:[%s9898_s19 + $0x18] sm:$0xff] }
0x1baa   :  { %4340 = vadd.xlane.f32.xlu0 %v4339_v41  ;;  %v4382_v6 = vld [vmem:[%s9898_s19 + $0x58] sm:$0xff] }
0x1bab   :  { %v4338_v22 = vmul.f32 %v4336_v25, %v4336_v25  ;;  %v6775_v34 = vcombine.low %v4374_v5, %v4382_v6 }
0x1bad   :  { %v4342_v7 = vsel %vm114_vm1, %v4338_v22, 0.0  ;;  %v6774_v22 = vcombine.high %v4373_v29, %v4381_v4  ;;  %v7800_v29 = vld [vmem:[%s9900_s21 + $0xe8] sm:$0xff]   ;;  %v7803_v4 = vld [vmem:[%s9900_s21 + $0x60] sm:$0xff]  }
0x1bae   :  { %4343 = vadd.xlane.f32.xlu0 %v4342_v7  ;;  %v6776_v7 = vcombine.high %v4374_v5, %v4382_v6  ;;  %v7804_v5 = vld [vmem:[%s9900_s21 + $0xe0] sm:$0xff]  }
0x1baf   :  { %v7805_v6 = vld [vmem:[%s9900_s21 + $0x20] sm:$0xff]  }
0x1c33   :  { %v4341_v42 = vpop.xlane.xlu0 %4340 }
0x1c34   :  { %v4345_v0 = vmul.f32 0.03125, %v4341_v42  ;;  %v4377_v42 = vld [vmem:[%s9898_s19 + $0x30] sm:$0xff] }
0x1c36   :  { %v4347_v43 = vadd.f32 1e-05, %v4345_v0  ;;  %v4385_v0 = vld [vmem:[%s9898_s19 + $0x70] sm:$0xff] }
0x1c37   :  { %v4344_v44 = vpop.xlane.xlu0 %4343 }
0x1c38   :  { %7993 = vrsqrt.f32 %v4347_v43  ;;  %v4346_v49 = vmul.f32 0.03125, %v4344_v44  ;;  %v4378_v43 = vld [vmem:[%s9898_s19 + $0x38] sm:$0xff] }
0x1c39   :  { %v4386_v44 = vld [vmem:[%s9898_s19 + $0x78] sm:$0xff] }
0x1c3a   :  { %v4348_v48 = vadd.f32 1e-05, %v4346_v49  ;;  %v6797_v49 = vcombine.low %v4393_v56, %v4401_v24 }
0x1c3c   :  { %7995 = vrsqrt.f32 %v4348_v48 }
0x1c45   :  { %v7994_v50 = vpop.eup %7993 }
0x1c46   :  { %v4351_v54 = vmul.f32 %v7994_v50, %v4335_v30  ;;  %v6782_v50 = vcombine.high %v4377_v42, %v4385_v0 }
0x1c48   :  { %v4359_v40 = vmul.f32 %v6767_v53, %v4351_v54  ;;  %v6781_v54 = vcombine.low %v4377_v42, %v4385_v0 }
0x1c49   :  { %v7996_v55 = vpop.eup %7995 }
0x1c4a   :  { %v9300_v57 = vadd.f32 %v6768_v21, %v4359_v40  ;;  %v4352_v58 = vmul.f32 %v7996_v55, %v4336_v25  ;;  %v7791_v40 = vld [vmem:[%s9900_s21 + $0x78] sm:$0xff]  }
0x1c4b   :  { %v7792_v55 = vld [vmem:[%s9900_s21 + $0xf8] sm:$0xff]  }
0x1c4c   :  { %v4369_v59 = vpack.c.bf16 %v9300_v57, %v9300_v57  ;;  %v4360_v47 = vmul.f32 %v6767_v53, %v4352_v58  ;;  %v6784_v53 = vcombine.high %v4378_v43, %v4386_v44  ;;  %v7793_v58 = vld [vmem:[%s9900_s21 + $0x38] sm:$0xff]  }
0x1c4e   :  { %v9304_v60 = vadd.f32 %v6768_v21, %v4360_v47  ;;  %v4489_v61 = vunpack.c.l.b16 %v4369_v59  ;;  %v6783_v21 = vcombine.low %v4378_v43, %v4386_v44  ;;  %v7794_v59 = vld [vmem:[%s9900_s21 + $0xb8] sm:$0xff]   ;;  %v7795_v47 = vld [vmem:[%s9900_s21 + $0x70] sm:$0xff]  }
0x1c50   :  { %v4370_v51 = vpack.c.bf16 %v9304_v60, %v9304_v60  ;;  %v4491_v52 = vrot.slane %v4489_v61, 7  ;;  %v7797_v61 = vld [vmem:[%s9900_s21 + $0x30] sm:$0xff]  }
0x1c52   :  { %v4490_v45 = vunpack.c.l.b16 %v4370_v51  ;;  %v7798_v51 = vld [vmem:[%s9900_s21 + $0xb0] sm:$0xff]  }
0x1c54   :  { %v4492_v30 = vrot.slane %v4490_v45, 6  ;;  %v7799_v45 = vld [vmem:[%s9900_s21 + $0x68] sm:$0xff]  }
0x1c56   :  { %v4494_v25 = vsel %vm4493_vm6, %v4492_v30, %v4491_v52  ;;  %v7801_v52 = vld [vmem:[%s9900_s21 + $0x28] sm:$0xff]  }
0x1c57   :  { %v9321_v41 = vpack.c.b16 %v4494_v25, %v4494_v25  ;;  %v7802_v30 = vld [vmem:[%s9900_s21 + $0xa8] sm:$0xff]   ;;  %v7806_v25 = vld [vmem:[%s9900_s21 + $0xa0] sm:$0xff]  }
0x1c59   :  { %6801 = vmatmul.mubr.msk.bf16.vlgmr.msra.gmra.mxu0 %vm114_vm1, %v9321_v41  ;;  %6802 = vmatmul.mubr.msk.bf16.vlgmr.msra.gmra.mxu1 %vm114_vm1, %v9321_v41 }
0x1c5a   :  { %4754 = vmatpush1.bf16.msra.mxu0 %v6789_v28  ;;  %4795 = vmatpush1.bf16.msra.mxu1 %v6791_v37  ;;  %v4402_v28 = vld [vmem:[%s9898_s19 + $0xf8] sm:$0xff]  ;;  %v6798_v37 = vcombine.high %v4393_v56, %v4401_v24 }
0x1c5b   :  { %4755 = vmatprep.subr.bf16.mxu0 %v6774_v22  ;;  %4796 = vmatprep.subr.bf16.mxu1 %v6776_v7  ;;  %v6800_v39 = vcombine.high %v4394_v27, %v4402_v28  ;;  %v6799_v48 = vcombine.low %v4394_v27, %v4402_v28  ;;  %v7808_v22 = vld [vmem:[%s9900_s21 + $0xd8] sm:$0xff]  }
0x1c5c   :  { %4773 = vmatprep.mubr.bf16.mxu0 %v8045_v23  ;;  %4814 = vmatprep.mubr.bf16.mxu1 %v8045_v23  ;;  %v7809_v7 = vld [vmem:[%s9900_s21 + $0x18] sm:$0xff]  }
0x1c5e   :  { %4756 = vmatpush1.bf16.msra.mxu0 %v6773_v26  ;;  %4797 = vmatpush1.bf16.msra.mxu1 %v6775_v34  ;;  %v7814_v26 = vld [vmem:[%s9900_s21 + $0x90] sm:$0xff]   ;;  %v7815_v34 = vld [vmem:[%s9900_s21 + $0x48] sm:$0xff]  }
0x1c5f   :  { %4835 = vmatprep.subr.bf16.mxu0 %v6794_v9  ;;  %4876 = vmatprep.subr.bf16.mxu1 %v6796_v11  ;;  %v7816_v9 = vld [vmem:[%s9900_s21 + $0xc8] sm:$0xff]  }
0x1c60   :  { %v7817_v11 = vld [vmem:[%s9900_s21 + $0x8] sm:$0xff]  }
0x1c61   :  { %6803 = vmatmul.mubr.msk.bf16.vlgmr.msra.gmra.mxu0 %vm114_vm1, %v9321_v41  ;;  %6804 = vmatmul.mubr.msk.bf16.vlgmr.msra.gmra.mxu1 %vm114_vm1, %v9321_v41 }
0x1c62   :  { %4836 = vmatpush1.bf16.msra.mxu0 %v6793_v62  ;;  %4877 = vmatpush1.bf16.msra.mxu1 %v6795_v36  ;;  %v7822_v62 = vld [vmem:[%s9900_s21 + $0x80] sm:$0xff]   ;;  %v7823_v36 = vld [vmem:[%s9900_s21 + $0x178] sm:$0xff]  }
0x1c63   :  { %4837 = vmatprep.subr.bf16.mxu0 %v6778_v46  ;;  %4878 = vmatprep.subr.bf16.mxu1 %v6780_v19  ;;  %v7824_v46 = vld [vmem:[%s9900_s21 + $0x1f8] sm:$0xff]   ;;  %v9498_v19 = vld [vmem:[%s9899_s20] sm:$0xff] }
0x1c64   :  { %4855 = vmatprep.mubr.bf16.mxu0 %v8045_v23  ;;  %4896 = vmatprep.mubr.bf16.mxu1 %v8045_v23  ;;  %v4410_v56 = vrot.slane %v9498_v19, %v8650_v3  ;;  %v4418_v24 = vrot.slane %v9498_v19, %v8653_v10  ;;  %v4414_v27 = vrot.slane %v9498_v19, %v8644_v63 }
0x1c65   :  { %v4422_v28 = vrot.slane %v9498_v19, %v8647_v2 }
0x1c66   :  { %4838 = vmatpush1.bf16.msra.mxu0 %v6777_v20  ;;  %4879 = vmatpush1.bf16.msra.mxu1 %v6779_v31 }
0x1c67   :  { %4917 = vmatprep.subr.bf16.mxu0 %v6798_v37  ;;  %4958 = vmatprep.subr.bf16.mxu1 %v6800_v39 }
0x1c69   :  { %6805 = vmatmul.mubr.msk.bf16.vlgmr.msra.gmra.mxu0 %vm114_vm1, %v9321_v41  ;;  %6806 = vmatmul.mubr.msk.bf16.vlgmr.msra.gmra.mxu1 %vm114_vm1, %v9321_v41 }
0x1c6a   :  { %4918 = vmatpush1.bf16.msra.mxu0 %v6797_v49  ;;  %4959 = vmatpush1.bf16.msra.mxu1 %v6799_v48 }
0x1c6b   :  { %4919 = vmatprep.subr.bf16.mxu0 %v6782_v50  ;;  %4960 = vmatprep.subr.bf16.mxu1 %v6784_v53 }
0x1c6c   :  { %4937 = vmatprep.mubr.bf16.mxu0 %v8045_v23  ;;  %4978 = vmatprep.mubr.bf16.mxu1 %v8045_v23  ;;  %v7796_v23 = vld [vmem:[%s9900_s21 + $0xf0] sm:$0xff]  }
0x1c6e   :  { %4920 = vmatpush1.bf16.msra.mxu0 %v6781_v54  ;;  %4961 = vmatpush1.bf16.msra.mxu1 %v6783_v21 }
0x1c6f   :  { %7196 = vmatprep.subr.bf16.mxu0 %v7791_v40  ;;  %7218 = vmatprep.subr.bf16.mxu1 %v7792_v55 }
0x1c71   :  { %6807 = vmatmul.mubr.msk.bf16.vlgmr.msra.gmra.mxu0 %vm114_vm1, %v9321_v41  ;;  %6808 = vmatmul.mubr.msk.bf16.vlgmr.msra.gmra.mxu1 %vm114_vm1, %v9321_v41  ;;  %v7807_v41 = vld [vmem:[%s9900_s21 + $0x58] sm:$0xff]  }
0x1c72   :  { %7197 = vmatpush3.bf16.msra.mxu0 %v7793_v58  ;;  %7219 = vmatpush3.bf16.msra.mxu1 %v7794_v59 }
0x1c73   :  { %7198 = vmatprep.subr.bf16.mxu0 %v7795_v47  ;;  %7220 = vmatprep.subr.bf16.mxu1 %v7796_v23  ;;  %v4430_v47 = vrot.slane %v9498_v19, %v8669_v13  ;;  %v4438_v23 = vrot.slane %v9498_v19, %v8672_v15 }
0x1c76   :  { %7199 = vmatpush3.bf16.msra.mxu0 %v7797_v61  ;;  %7221 = vmatpush3.bf16.msra.mxu1 %v7798_v51  ;;  %v7825_v61 = vld [vmem:[%s9900_s21 + $0x138] sm:$0xff]  }
0x1c77   :  { %7200 = vmatprep.subr.bf16.mxu0 %v7799_v45  ;;  %7222 = vmatprep.subr.bf16.mxu1 %v7800_v29  ;;  %v7826_v51 = vld [vmem:[%s9900_s21 + $0x1b8] sm:$0xff]  }
0x1c7a   :  { %7201 = vmatpush3.bf16.msra.mxu0 %v7801_v52  ;;  %7223 = vmatpush3.bf16.msra.mxu1 %v7802_v30 }
0x1c7b   :  { %7202 = vmatprep.subr.bf16.mxu0 %v7803_v4  ;;  %7224 = vmatprep.subr.bf16.mxu1 %v7804_v5  ;;  %v7827_v4 = vld [vmem:[%s9900_s21 + $0x170] sm:$0xff]  }
0x1c7c   :  { %v7828_v5 = vld [vmem:[%s9900_s21 + $0x1f0] sm:$0xff]  }
0x1c7e   :  { %7203 = vmatpush3.bf16.msra.mxu0 %v7805_v6  ;;  %7225 = vmatpush3.bf16.msra.mxu1 %v7806_v25 }
0x1c7f   :  { %7204 = vmatprep.subr.bf16.mxu0 %v7807_v41  ;;  %7226 = vmatprep.subr.bf16.mxu1 %v7808_v22 }
0x1c82   :  { %7205 = vmatpush3.bf16.msra.mxu0 %v7809_v7  ;;  %7227 = vmatpush3.bf16.msra.mxu1 %v7810_v18  ;;  %v7829_v7 = vld [vmem:[%s9900_s21 + $0x130] sm:$0xff]  }
0x1c83   :  { %7206 = vmatprep.subr.bf16.mxu0 %v7811_v8  ;;  %7228 = vmatprep.subr.bf16.mxu1 %v7812_v17  ;;  %v7830_v18 = vld [vmem:[%s9900_s21 + $0x1b0] sm:$0xff]  }
0x1c86   :  { %7207 = vmatpush3.bf16.msra.mxu0 %v7813_v38  ;;  %7229 = vmatpush3.bf16.msra.mxu1 %v7814_v26  ;;  %v7831_v38 = vld [vmem:[%s9900_s21 + $0x168] sm:$0xff]  }
0x1c87   :  { %7208 = vmatprep.subr.bf16.mxu0 %v7815_v34  ;;  %7230 = vmatprep.subr.bf16.mxu1 %v7816_v9  ;;  %v7832_v26 = vld [vmem:[%s9900_s21 + $0x1e8] sm:$0xff]  }
0x1c8a   :  { %7209 = vmatpush3.bf16.msra.mxu0 %v7817_v11  ;;  %7231 = vmatpush3.bf16.msra.mxu1 %v7818_v12 }
0x1c8b   :  { %7210 = vmatprep.subr.bf16.mxu0 %v7819_v16  ;;  %7232 = vmatprep.subr.bf16.mxu1 %v7820_v14 }
0x1c8e   :  { %7211 = vmatpush3.bf16.msra.mxu0 %v7821_v35  ;;  %7233 = vmatpush3.bf16.msra.mxu1 %v7822_v62  ;;  %v7833_v35 = vld [vmem:[%s9900_s21 + $0x128] sm:$0xff]  }
0x1c8f   :  { %7240 = vmatprep.subr.bf16.mxu0 %v7823_v36  ;;  %7262 = vmatprep.subr.bf16.mxu1 %v7824_v46  ;;  %v7834_v62 = vld [vmem:[%s9900_s21 + $0x1a8] sm:$0xff]  }
0x1d19   :  { %v4693_v20 = vpop.f32.mrf.mxu0  ;;  %v4734_v31 = vpop.f32.mrf.mxu1 }
0x1d1a   :  { %v4694_v37 = vadd.f32 %v4693_v20, %v4410_v56  ;;  %v4735_v39 = vadd.f32 %v4734_v31, %v4418_v24  ;;  %v7835_v56 = vld [vmem:[%s9900_s21 + $0x160] sm:$0xff]  }
0x1d1b   :  { %v4695_v42 = vpop.f32.mrf.mxu0  ;;  %v4736_v0 = vpop.f32.mrf.mxu1  ;;  %v7836_v24 = vld [vmem:[%s9900_s21 + $0x1e0] sm:$0xff]  }
0x1d1c   :  { %v4696_v43 = vadd.f32 %v4695_v42, %v4414_v27  ;;  %v4737_v44 = vadd.f32 %v4736_v0, %v4422_v28  ;;  %v4987_v49 = vmax.f32 %v4694_v37, 0.0  ;;  %v4989_v48 = vmax.f32 %v4735_v39, 0.0  ;;  %v7837_v20 = vld [vmem:[%s9900_s21 + $0x120] sm:$0xff]   ;;  %v9565_v37 = vld [vmem:[%s9899_s20 + $0x8] sm:$0xff]  ;;  %v7839_v0 = vld [vmem:[%s9900_s21 + $0x158] sm:$0xff]  }
0x1d1d   :  { %v4697_v50 = vpop.f32.mrf.mxu0  ;;  %v4738_v53 = vpop.f32.mrf.mxu1  ;;  %v7838_v31 = vld [vmem:[%s9900_s21 + $0x1a0] sm:$0xff]  }
0x1d1e   :  { %v4988_v54 = vmax.f32 %v4696_v43, 0.0  ;;  %v4990_v21 = vmax.f32 %v4737_v44, 0.0  ;;  %v5003_v45 = vpack.c.bf16 %v4987_v49, %v4987_v49  ;;  %v5005_v29 = vpack.c.bf16 %v4989_v48, %v4989_v48  ;;  %v7840_v43 = vld [vmem:[%s9900_s21 + $0x1d8] sm:$0xff]  }
0x1d1f   :  { %v4698_v40 = vpop.f32.mrf.mxu0  ;;  %v4739_v55 = vpop.f32.mrf.mxu1  ;;  %v4466_v44 = vrot.slane %v9565_v37, %v8754_v33  ;;  %v7841_v50 = vld [vmem:[%s9900_s21 + $0x118] sm:$0xff]  }
0x1d20   :  { %v5004_v58 = vpack.c.bf16 %v4988_v54, %v4988_v54  ;;  %v5006_v59 = vpack.c.bf16 %v4990_v21, %v4990_v21  ;;  %v7842_v53 = vld [vmem:[%s9900_s21 + $0x198] sm:$0xff]   ;;  %v7843_v40 = vld [vmem:[%s9900_s21 + $0x150] sm:$0xff]  }
0x1d21   :  { %v9518_v52 = vpop.f32.mrf.mxu0  ;;  %v9520_v30 = vpop.f32.mrf.mxu1  ;;  %v7844_v55 = vld [vmem:[%s9900_s21 + $0x1d0] sm:$0xff]  }
0x1d22   :  { %6082 = vmatprep.mubr.bf16.mxu0 %v5004_v58  ;;  %6122 = vmatprep.mubr.bf16.mxu1 %v5006_v59 }
0x1d23   :  { %v4777_v6 = vpop.f32.mrf.mxu0  ;;  %v4818_v25 = vpop.f32.mrf.mxu1  ;;  %6083 = vmatmul.mubr.bf16.vlgmr.msra.gmra.mxu0 %v5003_v45  ;;  %6123 = vmatmul.mubr.bf16.vlgmr.msra.gmra.mxu1 %v5005_v29  ;;  %v4434_v45 = vrot.slane %v9498_v19, %v8754_v33 }
0x1d24   :  { %v4778_v41 = vadd.f32 %v4777_v6, %v4430_v47  ;;  %v4819_v22 = vadd.f32 %v4818_v25, %v4438_v23  ;;  %7241 = vmatpush3.bf16.msra.mxu0 %v7825_v61  ;;  %7263 = vmatpush3.bf16.msra.mxu1 %v7826_v51  ;;  %v7845_v23 = vld [vmem:[%s9900_s21 + $0x110] sm:$0xff]   ;;  %v4426_v51 = vrot.slane %v9498_v19, %v8751_v32  ;;  %v7848_v6 = vld [vmem:[%s9900_s21 + $0x1c8] sm:$0xff]  }
0x1d25   :  { %v4779_v8 = vpop.f32.mrf.mxu0  ;;  %v4820_v17 = vpop.f32.mrf.mxu1  ;;  %7242 = vmatprep.subr.bf16.mxu0 %v7827_v4  ;;  %7264 = vmatprep.subr.bf16.mxu1 %v7828_v5  ;;  %v7846_v61 = vld [vmem:[%s9900_s21 + $0x190] sm:$0xff]   ;;  %v7847_v5 = vld [vmem:[%s9900_s21 + $0x148] sm:$0xff]   ;;  %v4446_v25 = vrot.slane %v9565_v37, %v8644_v63  ;;  %v7851_v63 = vld [vmem:[%s9900_s21 + $0x140] sm:$0xff]  }
0x1d26   :  { %v4992_v34 = vmax.f32 %v4778_v41, 0.0  ;;  %v4994_v9 = vmax.f32 %v4819_v22, 0.0  ;;  %v4454_v41 = vrot.slane %v9565_v37, %v8647_v2  ;;  %v7849_v19 = vld [vmem:[%s9900_s21 + $0x108] sm:$0xff]   ;;  %v4817_v8 = vadd.f32 %v9520_v30, %v4434_v45  ;;  %v7852_v2 = vld [vmem:[%s9900_s21 + $0x1c0] sm:$0xff]   ;;  %v7877_v45 = vld [vmem:[%s9900_s21 + $0x210] sm:$0xff]  }
0x1d27   :  { %v4780_v11 = vpop.f32.mrf.mxu0  ;;  %v4821_v12 = vpop.f32.mrf.mxu1  ;;  %v7854_v30 = vld [vmem:[%s9900_s21 + $0x180] sm:$0xff]  }
0x1d28   :  { %v5008_v16 = vpack.c.bf16 %v4992_v34, %v4992_v34  ;;  %v5010_v14 = vpack.c.bf16 %v4994_v9, %v4994_v9  ;;  %7243 = vmatpush3.bf16.msra.mxu0 %v7829_v7  ;;  %7265 = vmatpush3.bf16.msra.mxu1 %v7830_v18  ;;  %v7850_v7 = vld [vmem:[%s9900_s21 + $0x188] sm:$0xff]   ;;  %v4776_v18 = vadd.f32 %v9518_v52, %v4426_v51  ;;  %v7853_v52 = vld [vmem:[%s9900_s21 + $0x100] sm:$0xff]   ;;  %v4993_v34 = vmax.f32 %v4817_v8, 0.0  ;;  %v7855_v9 = vld [vmem:[%s9900_s21 + $0x278] sm:$0xff]  }
0x1d29   :  { %v9546_v36 = vpop.f32.mrf.mxu0  ;;  %v9548_v46 = vpop.f32.mrf.mxu1  ;;  %7244 = vmatprep.subr.bf16.mxu0 %v7831_v38  ;;  %7266 = vmatprep.subr.bf16.mxu1 %v7832_v26  ;;  %v7856_v11 = vld [vmem:[%s9900_s21 + $0x2f8] sm:$0xff]   ;;  %v7876_v51 = vld [vmem:[%s9900_s21 + $0x2d0] sm:$0xff]  }
0x1d2a   :  { %6162 = vmatprep.mubr.bf16.mxu0 %v5008_v16  ;;  %6202 = vmatprep.mubr.bf16.mxu1 %v5010_v14  ;;  %v4991_v26 = vmax.f32 %v4776_v18, 0.0  ;;  %v7857_v14 = vld [vmem:[%s9900_s21 + $0x238] sm:$0xff]   ;;  %v7885_v18 = vld [vmem:[%s9900_s21 + $0x200] sm:$0xff]  }
0x1d2b   :  { %v4859_v27 = vpop.f32.mrf.mxu0  ;;  %v4900_v28 = vpop.f32.mrf.mxu1 }
0x1d2c   :  { %7245 = vmatpush3.bf16.msra.mxu0 %v7833_v35  ;;  %7267 = vmatpush3.bf16.msra.mxu1 %v7834_v62  ;;  %v4860_v17 = vadd.f32 %v4859_v27, %v4446_v25  ;;  %v4901_v38 = vadd.f32 %v4900_v28, %v4454_v41  ;;  %v5007_v35 = vpack.c.bf16 %v4991_v26, %v4991_v26  ;;  %v7859_v27 = vld [vmem:[%s9900_s21 + $0x270] sm:$0xff]   ;;  %v7880_v25 = vld [vmem:[%s9900_s21 + $0x2c8] sm:$0xff]  }
0x1d2d   :  { %v4861_v39 = vpop.f32.mrf.mxu0  ;;  %v4902_v42 = vpop.f32.mrf.mxu1  ;;  %7246 = vmatprep.subr.bf16.mxu0 %v7835_v56  ;;  %7268 = vmatprep.subr.bf16.mxu1 %v7836_v24  ;;  %v5009_v62 = vpack.c.bf16 %v4993_v34, %v4993_v34  ;;  %v7858_v56 = vld [vmem:[%s9900_s21 + $0x2b8] sm:$0xff]   ;;  %v7860_v28 = vld [vmem:[%s9900_s21 + $0x2f0] sm:$0xff]   ;;  %v4470_v41 = vrot.slane %v9565_v37, %v8672_v15  ;;  %v7884_v15 = vld [vmem:[%s9900_s21 + $0x2c0] sm:$0xff]  }
0x1d2e   :  { %v4996_v12 = vmax.f32 %v4860_v17, 0.0  ;;  %v4998_v16 = vmax.f32 %v4901_v38, 0.0  ;;  %v7862_v39 = vld [vmem:[%s9900_s21 + $0x2b0] sm:$0xff]   ;;  %v7863_v42 = vld [vmem:[%s9900_s21 + $0x268] sm:$0xff]   ;;  %v7889_v38 = vld [vmem:[%s9900_s21 + $0x338] sm:$0xff]  }
0x1d2f   :  { %v4862_v49 = vpop.f32.mrf.mxu0  ;;  %v4903_v48 = vpop.f32.mrf.mxu1  ;;  %v7891_v34 = vld [vmem:[%s9900_s21 + $0x370] sm:$0xff]  }
0x1d30   :  { %7247 = vmatpush3.bf16.msra.mxu0 %v7837_v20  ;;  %7269 = vmatpush3.bf16.msra.mxu1 %v7838_v31  ;;  %v5012_v24 = vpack.c.bf16 %v4996_v12, %v4996_v12  ;;  %v5014_v20 = vpack.c.bf16 %v4998_v16, %v4998_v16  ;;  %v7861_v31 = vld [vmem:[%s9900_s21 + $0x230] sm:$0xff]   ;;  %v7867_v49 = vld [vmem:[%s9900_s21 + $0x260] sm:$0xff]  }
0x1d31   :  { %v9581_v54 = vpop.f32.mrf.mxu0  ;;  %v4980_v21 = vpop.f32.mrf.mxu1  ;;  %7248 = vmatprep.subr.bf16.mxu0 %v7839_v0  ;;  %7270 = vmatprep.subr.bf16.mxu1 %v7840_v43  ;;  %v7864_v0 = vld [vmem:[%s9900_s21 + $0x2e8] sm:$0xff]   ;;  %v7868_v48 = vld [vmem:[%s9900_s21 + $0x2e0] sm:$0xff]   ;;  %v7893_v16 = vld [vmem:[%s9900_s21 + $0x330] sm:$0xff]  }
0x1d32   :  { %v9589_v58 = vadd.f32 %v4980_v21, %v4466_v44  ;;  %v7865_v43 = vld [vmem:[%s9900_s21 + $0x228] sm:$0xff]   ;;  %v7871_v21 = vld [vmem:[%s9900_s21 + $0x258] sm:$0xff]  }
0x1d33   :  { %v9591_v59 = vpop.f32.mrf.mxu0  ;;  %v9593_v47 = vpop.f32.mrf.mxu1  ;;  %v7866_v44 = vld [vmem:[%s9900_s21 + $0x2a8] sm:$0xff]  }
0x1d34   :  { %7249 = vmatpush3.bf16.msra.mxu0 %v7841_v50  ;;  %7271 = vmatpush3.bf16.msra.mxu1 %v7842_v53  ;;  %v7869_v50 = vld [vmem:[%s9900_s21 + $0x220] sm:$0xff]  }
0x1d35   :  { %v4943_v29 = vpop.f32.mrf.mxu0  ;;  %v4984_v4 = vpop.f32.mrf.mxu1  ;;  %7250 = vmatprep.subr.bf16.mxu0 %v7843_v40  ;;  %7272 = vmatprep.subr.bf16.mxu1 %v7844_v55  ;;  %v7870_v53 = vld [vmem:[%s9900_s21 + $0x2a0] sm:$0xff]   ;;  %v7872_v40 = vld [vmem:[%s9900_s21 + $0x2d8] sm:$0xff]  }
0x1d36   :  { %v7873_v55 = vld [vmem:[%s9900_s21 + $0x218] sm:$0xff]   ;;  %v4442_v29 = vrot.slane %v9565_v37, %v8650_v3  ;;  %v7878_v4 = vld [vmem:[%s9900_s21 + $0x290] sm:$0xff]   ;;  %v4462_v3 = vrot.slane %v9565_v37, %v8669_v13  ;;  %v7883_v13 = vld [vmem:[%s9900_s21 + $0x240] sm:$0xff]  }
0x1d37   :  { %v4944_v22 = vpop.f32.mrf.mxu0  ;;  %v4985_v33 = vpop.f32.mrf.mxu1 }
0x1d38   :  { %7251 = vmatpush3.bf16.msra.mxu0 %v7845_v23  ;;  %7273 = vmatpush3.bf16.msra.mxu1 %v7846_v61  ;;  %v7874_v23 = vld [vmem:[%s9900_s21 + $0x298] sm:$0xff]   ;;  %v7875_v61 = vld [vmem:[%s9900_s21 + $0x250] sm:$0xff]   ;;  %v7881_v22 = vld [vmem:[%s9900_s21 + $0x208] sm:$0xff]   ;;  %v4858_v33 = vadd.f32 %v9546_v36, %v4442_v29  ;;  %v4983_v36 = vadd.f32 %v9593_v47, %v4470_v41  ;;  %v5001_v29 = vmax.f32 %v9589_v58, 0.0 }
0x1d39   :  { %7252 = vmatprep.subr.bf16.mxu0 %v7847_v5  ;;  %7274 = vmatprep.subr.bf16.mxu1 %v7848_v6  ;;  %v7879_v5 = vld [vmem:[%s9900_s21 + $0x248] sm:$0xff]   ;;  %v4450_v6 = vrot.slane %v9565_v37, %v8653_v10 }
0x1d3a   :  { %v7882_v10 = vld [vmem:[%s9900_s21 + $0x288] sm:$0xff]   ;;  %v4995_v8 = vmax.f32 %v4858_v33, 0.0  ;;  %v5002_v17 = vmax.f32 %v4983_v36, 0.0 }
0x1d3c   :  { %7253 = vmatpush3.bf16.msra.mxu0 %v7849_v19  ;;  %7275 = vmatpush3.bf16.msra.mxu1 %v7850_v7  ;;  %v4899_v19 = vadd.f32 %v9548_v46, %v4450_v6  ;;  %v4942_v7 = vadd.f32 %v9591_v59, %v4462_v3  ;;  %v7886_v46 = vld [vmem:[%s9900_s21 + $0x280] sm:$0xff]   ;;  %v7888_v59 = vld [vmem:[%s9900_s21 + $0x3f8] sm:$0xff]   ;;  %v5018_v12 = vpack.c.bf16 %v5002_v17, %v5002_v17 }
0x1d3d   :  { %7254 = vmatprep.subr.bf16.mxu0 %v7851_v63  ;;  %7276 = vmatprep.subr.bf16.mxu1 %v7852_v2  ;;  %v7887_v63 = vld [vmem:[%s9900_s21 + $0x378] sm:$0xff]   ;;  %v6809_v3 = vld [vmem:[%s9901_s22] ss:$0 sm:$0xff] }
0x1d3e   :  { %v4997_v2 = vmax.f32 %v4899_v19, 0.0  ;;  %v5000_v47 = vmax.f32 %v4942_v7, 0.0 }
0x1d40   :  { %7255 = vmatpush3.bf16.msra.mxu0 %v7853_v52  ;;  %7277 = vmatpush3.bf16.msra.mxu1 %v7854_v30  ;;  %v5011_v52 = vpack.c.bf16 %v4995_v8, %v4995_v8  ;;  %v7890_v30 = vld [vmem:[%s9900_s21 + $0x3b8] sm:$0xff]   ;;  %v5013_v26 = vpack.c.bf16 %v4997_v2, %v4997_v2 }
0x1d41   :  { %7284 = vmatprep.subr.bf16.mxu0 %v7855_v9  ;;  %7306 = vmatprep.subr.bf16.mxu1 %v7856_v11  ;;  %v5016_v9 = vpack.c.bf16 %v5000_v47, %v5000_v47  ;;  %v7892_v11 = vld [vmem:[%s9900_s21 + $0x3f0] sm:$0xff]  }
0x1d43   :  { %6163 = vmatmul.mubr.bf16.vlgmr.msra.gmra.mxu0 %v5007_v35  ;;  %6203 = vmatmul.mubr.bf16.vlgmr.msra.gmra.mxu1 %v5009_v62  ;;  %v7895_v35 = vld [vmem:[%s9900_s21 + $0x368] sm:$0xff]  }
0x1d44   :  { %7285 = vmatpush3.bf16.msra.mxu0 %v7857_v14  ;;  %6242 = vmatprep.mubr.bf16.mxu0 %v5012_v24  ;;  %v7894_v14 = vld [vmem:[%s9900_s21 + $0x3b0] sm:$0xff]   ;;  %v7896_v62 = vld [vmem:[%s9900_s21 + $0x3e8] sm:$0xff]  }
0x1d45   :  { %7307 = vmatpush3.bf16.msra.mxu1 %v7858_v56  ;;  %6282 = vmatprep.mubr.bf16.mxu1 %v5014_v20  ;;  %v7897_v56 = vld [vmem:[%s9900_s21 + $0x328] sm:$0xff]   ;;  %v7901_v20 = vld [vmem:[%s9900_s21 + $0x320] sm:$0xff]  }
0x1d46   :  { %7286 = vmatprep.subr.bf16.mxu0 %v7859_v27  ;;  %7308 = vmatprep.subr.bf16.mxu1 %v7860_v28  ;;  %v7898_v24 = vld [vmem:[%s9900_s21 + $0x3a8] sm:$0xff]   ;;  %v7899_v27 = vld [vmem:[%s9900_s21 + $0x360] sm:$0xff]  }
0x1d47   :  { %v7900_v28 = vld [vmem:[%s9900_s21 + $0x3e0] sm:$0xff]  }
0x1d48   :  { %7287 = vmatpush3.bf16.msra.mxu0 %v7861_v31  ;;  %v7902_v31 = vld [vmem:[%s9900_s21 + $0x3a0] sm:$0xff]  }
0x1d49   :  { %7309 = vmatpush3.bf16.msra.mxu1 %v7862_v39  ;;  %7288 = vmatprep.subr.bf16.mxu0 %v7863_v42  ;;  %v7903_v39 = vld [vmem:[%s9900_s21 + $0x358] sm:$0xff]  }
0x1d4a   :  { %7310 = vmatprep.subr.bf16.mxu1 %v7864_v0  ;;  %v7904_v42 = vld [vmem:[%s9900_s21 + $0x3d8] sm:$0xff]  }
0x1d4b   :  { %v7905_v0 = vld [vmem:[%s9900_s21 + $0x318] sm:$0xff]  }
0x1d4c   :  { %7289 = vmatpush3.bf16.msra.mxu0 %v7865_v43  ;;  %v7906_v43 = vld [vmem:[%s9900_s21 + $0x398] sm:$0xff]  }
0x1d4d   :  { %7311 = vmatpush3.bf16.msra.mxu1 %v7866_v44  ;;  %7290 = vmatprep.subr.bf16.mxu0 %v7867_v49  ;;  %v7907_v44 = vld [vmem:[%s9900_s21 + $0x350] sm:$0xff]  }
0x1d4e   :  { %7312 = vmatprep.subr.bf16.mxu1 %v7868_v48  ;;  %v7908_v49 = vld [vmem:[%s9900_s21 + $0x3d0] sm:$0xff]  }
0x1d4f   :  { %v7909_v48 = vld [vmem:[%s9900_s21 + $0x310] sm:$0xff]  }
0x1d50   :  { %7291 = vmatpush3.bf16.msra.mxu0 %v7869_v50  ;;  %v4458_v50 = vrot.slane %v9565_v37, %v8751_v32  ;;  %v7913_v32 = vld [vmem:[%s9900_s21 + $0x308] sm:$0xff]  }
0x1d51   :  { %7313 = vmatpush3.bf16.msra.mxu1 %v7870_v53  ;;  %7292 = vmatprep.subr.bf16.mxu0 %v7871_v21  ;;  %v7910_v53 = vld [vmem:[%s9900_s21 + $0x390] sm:$0xff]   ;;  %v7911_v21 = vld [vmem:[%s9900_s21 + $0x348] sm:$0xff]  }
0x1d52   :  { %7314 = vmatprep.subr.bf16.mxu1 %v7872_v40  ;;  %v7912_v40 = vld [vmem:[%s9900_s21 + $0x3c8] sm:$0xff]   ;;  %v4940_v37 = vadd.f32 %v9581_v54, %v4458_v50  ;;  %v7917_v54 = vld [vmem:[%s9900_s21 + $0x300] sm:$0xff]  }
0x1d54   :  { %7293 = vmatpush3.bf16.msra.mxu0 %v7873_v55  ;;  %v7914_v55 = vld [vmem:[%s9900_s21 + $0x388] sm:$0xff]  }
0x1d55   :  { %7315 = vmatpush3.bf16.msra.mxu1 %v7874_v23  ;;  %7294 = vmatprep.subr.bf16.mxu0 %v7875_v61  ;;  %v7915_v23 = vld [vmem:[%s9900_s21 + $0x340] sm:$0xff]  }
0x1d56   :  { %7316 = vmatprep.subr.bf16.mxu1 %v7876_v51  ;;  %v7916_v61 = vld [vmem:[%s9900_s21 + $0x3c0] sm:$0xff]   ;;  %v4999_v51 = vmax.f32 %v4940_v37, 0.0 }
0x1d58   :  { %7295 = vmatpush3.bf16.msra.mxu0 %v7877_v45  ;;  %v7918_v45 = vld [vmem:[%s9900_s21 + $0x380] sm:$0xff]  }
0x1d59   :  { %7317 = vmatpush3.bf16.msra.mxu1 %v7878_v4  ;;  %7296 = vmatprep.subr.bf16.mxu0 %v7879_v5  ;;  %v5015_v4 = vpack.c.bf16 %v4999_v51, %v4999_v51  ;;  %v5017_v5 = vpack.c.bf16 %v5001_v29, %v5001_v29 }
0x1d5a   :  { %7318 = vmatprep.subr.bf16.mxu1 %v7880_v25 }
0x1d5c   :  { %7297 = vmatpush3.bf16.msra.mxu0 %v7881_v22 }
0x1d5d   :  { %7319 = vmatpush3.bf16.msra.mxu1 %v7882_v10  ;;  %7298 = vmatprep.subr.bf16.mxu0 %v7883_v13 }
0x1d5e   :  { %7320 = vmatprep.subr.bf16.mxu1 %v7884_v15 }
0x1d60   :  { %7299 = vmatpush3.bf16.msra.mxu0 %v7885_v18 }
0x1d61   :  { %7321 = vmatpush3.bf16.msra.mxu1 %v7886_v46  ;;  %7328 = vmatprep.subr.bf16.mxu0 %v7887_v63 }
0x1d62   :  { %7350 = vmatprep.subr.bf16.mxu1 %v7888_v59 }
0x1d63   :  { %6243 = vmatmul.mubr.bf16.vlgmr.msra.gmra.mxu0 %v5011_v52 }
0x1d64   :  { %6283 = vmatmul.mubr.bf16.vlgmr.msra.gmra.mxu1 %v5013_v26  ;;  %7329 = vmatpush3.bf16.msra.mxu0 %v7889_v38 }
0x1d65   :  { %6322 = vmatprep.mubr.bf16.mxu0 %v5016_v9  ;;  %7351 = vmatpush3.bf16.msra.mxu1 %v7890_v30 }
0x1d66   :  { %6362 = vmatprep.mubr.bf16.mxu1 %v5018_v12  ;;  %7330 = vmatprep.subr.bf16.mxu0 %v7891_v34 }
0x1d67   :  { %7352 = vmatprep.subr.bf16.mxu1 %v7892_v11 }
0x1d68   :  { %7331 = vmatpush3.bf16.msra.mxu0 %v7893_v16 }
0x1d69   :  { %7353 = vmatpush3.bf16.msra.mxu1 %v7894_v14  ;;  %7332 = vmatprep.subr.bf16.mxu0 %v7895_v35 }
0x1d6a   :  { %7354 = vmatprep.subr.bf16.mxu1 %v7896_v62 }
0x1d6c   :  { %7333 = vmatpush3.bf16.msra.mxu0 %v7897_v56 }
0x1d6d   :  { %7355 = vmatpush3.bf16.msra.mxu1 %v7898_v24  ;;  %7334 = vmatprep.subr.bf16.mxu0 %v7899_v27 }
0x1d6e   :  { %7356 = vmatprep.subr.bf16.mxu1 %v7900_v28 }
0x1d70   :  { %7335 = vmatpush3.bf16.msra.mxu0 %v7901_v20 }
0x1d71   :  { %7357 = vmatpush3.bf16.msra.mxu1 %v7902_v31  ;;  %7336 = vmatprep.subr.bf16.mxu0 %v7903_v39 }
0x1d72   :  { %7358 = vmatprep.subr.bf16.mxu1 %v7904_v42 }
0x1d74   :  { %7337 = vmatpush3.bf16.msra.mxu0 %v7905_v0 }
0x1d75   :  { %7359 = vmatpush3.bf16.msra.mxu1 %v7906_v43  ;;  %7338 = vmatprep.subr.bf16.mxu0 %v7907_v44 }
0x1d76   :  { %7360 = vmatprep.subr.bf16.mxu1 %v7908_v49 }
0x1d78   :  { %7339 = vmatpush3.bf16.msra.mxu0 %v7909_v48 }
0x1d79   :  { %7361 = vmatpush3.bf16.msra.mxu1 %v7910_v53  ;;  %7340 = vmatprep.subr.bf16.mxu0 %v7911_v21 }
0x1d7a   :  { %7362 = vmatprep.subr.bf16.mxu1 %v7912_v40 }
0x1d7c   :  { %7341 = vmatpush3.bf16.msra.mxu0 %v7913_v32 }
0x1d7d   :  { %7363 = vmatpush3.bf16.msra.mxu1 %v7914_v55  ;;  %7342 = vmatprep.subr.bf16.mxu0 %v7915_v23 }
0x1d7e   :  { %7364 = vmatprep.subr.bf16.mxu1 %v7916_v61 }
0x1d80   :  { %7343 = vmatpush3.bf16.msra.mxu0 %v7917_v54 }
0x1d81   :  { %7365 = vmatpush3.bf16.msra.mxu1 %v7918_v45  ;;  %7599 = vmatprep.subr.bf16.mxu0 %v8029_v1 }
0x1d83   :  { %6323 = vmatmul.mubr.bf16.vlgmr.msra.gmra.mxu0 %v5015_v4 }
0x1d84   :  { %6363 = vmatmul.mubr.bf16.vlgmr.msra.gmra.mxu1 %v5017_v5  ;;  %7603 = vmatprep.mubr.msk.bf16.mxu0 %vm8030_vm0, %v8029_v1 }
0x1de3   :  { %v7212_v6 = vpop.f32.mrf.mxu0  ;;  %v7234_v25 = vpop.f32.mrf.mxu1 }
0x1de5   :  { %v7213_v41 = vpop.f32.mrf.mxu0  ;;  %v7235_v58 = vpop.f32.mrf.mxu1 }
0x1de6   :  { %v7214_v22 = vadd.f32 %v7213_v41, %v7212_v6  ;;  %v7236_v33 = vadd.f32 %v7235_v58, %v7234_v25 }
0x1de7   :  { %v7215_v10 = vpop.f32.mrf.mxu0  ;;  %v7237_v13 = vpop.f32.mrf.mxu1 }
0x1de8   :  { %v6085_v19 = vadd.f32 %v7214_v22, %v6809_v3  ;;  %v7919_v22 = vld [vmem:[%s9904_s25 + $0x8] sm:$0xff]  }
0x1de9   :  { %v7216_v15 = vpop.f32.mrf.mxu0  ;;  %v7238_v7 = vpop.f32.mrf.mxu1  ;;  %7600 = vmatpush3.bf16.msra.mxu0 %v7919_v22 }
0x1dea   :  { %v6125_v36 = vadd.f32 %v7236_v33, %v6085_v19  ;;  %7601 = vmatprep.subr.bf16.mxu0 %v8029_v1  ;;  %v7920_v33 = vld [vmem:[%s9904_s25] sm:$0xff]  }
0x1ded   :  { %7602 = vmatpush3.bf16.msra.mxu0 %v7920_v33 }
0x1e03   :  { %v7256_v18 = vpop.f32.mrf.mxu0  ;;  %v7278_v8 = vpop.f32.mrf.mxu1 }
0x1e05   :  { %v7257_v46 = vpop.f32.mrf.mxu0  ;;  %v7279_v63 = vpop.f32.mrf.mxu1 }
0x1e06   :  { %v7258_v16 = vadd.f32 %v7257_v46, %v7256_v18  ;;  %v7280_v35 = vadd.f32 %v7279_v63, %v7278_v8  ;;  %v6938_v8 = vld [vmem:[%s9902_s23] ss:$0 sm:$0xff] }
0x1e07   :  { %v7259_v2 = vpop.f32.mrf.mxu0  ;;  %v7281_v59 = vpop.f32.mrf.mxu1  ;;  %v6939_v63 = vld [vmem:[%s9903_s24] ss:$0 sm:$0xff]  ;;  %s8046_s24 = smov [#allocation2]  }
0x1e08   :  { %v6165_v14 = vadd.f32 %v7258_v16, %v6125_v36 }
0x1e09   :  { %v7260_v47 = vpop.f32.mrf.mxu0  ;;  %v7282_v17 = vpop.f32.mrf.mxu1 }
0x1e0a   :  { %v6205_v56 = vadd.f32 %v7280_v35, %v6165_v14  ;;  %v6940_v35 = vld [vmem:[%s9905_s26] ss:$0 sm:$0xff]  ;;  %s6538_s26 = sshll.u32 %s8046_s24, 4  ;;  %s6539_s26 = int_to_ptr.vmem [resolvable:$true] %s6538_s26 }
0x1e0b   :  { %s8007_s0 = scalar_lea.vmem %s6539_s26, 32  ;;  %p8012_p1 = scmp.lt.s32.totalorder %s6539_s26, %s6539_s26 }
0x1e0c   :  { %p8008_p0 = scmp.ne.s32.totalorder %s6539_s26, %s8007_s0  ;;  %p8013_p2 = scmp.lt.s32.totalorder %s8007_s0, %s8007_s0 }
0x1e0e   :  { %p8014_p3 = por %p8013_p2, %p8012_p1 }
0x1e10   :  { %p8015_p4 = pnand %p8014_p3, %p8008_p0 }
0x1e23   :  { %v7300_v38 = vpop.f32.mrf.mxu0 }
0x1e24   :  { %v7322_v52 = vpop.f32.mrf.mxu1 }
0x1e25   :  { %v7301_v30 = vpop.f32.mrf.mxu0 }
0x1e26   :  { %v7323_v26 = vpop.f32.mrf.mxu1  ;;  %v7302_v62 = vadd.f32 %v7301_v30, %v7300_v38 }
0x1e27   :  { %v7303_v34 = vpop.f32.mrf.mxu0  ;;  %v7324_v28 = vadd.f32 %v7323_v26, %v7322_v52 }
0x1e28   :  { %v7325_v9 = vpop.f32.mrf.mxu1  ;;  %v6245_v24 = vadd.f32 %v7302_v62, %v6205_v56 }
0x1e29   :  { %v7304_v11 = vpop.f32.mrf.mxu0 }
0x1e2a   :  { %v7326_v12 = vpop.f32.mrf.mxu1  ;;  %v6285_v39 = vadd.f32 %v7324_v28, %v6245_v24 }
0x1e43   :  { %v7344_v27 = vpop.f32.mrf.mxu0 }
0x1e44   :  { %v7366_v20 = vpop.f32.mrf.mxu1 }
0x1e45   :  { %v7345_v31 = vpop.f32.mrf.mxu0 }
0x1e46   :  { %v7346_v42 = vadd.f32 %v7345_v31, %v7344_v27  ;;  %v7367_v0 = vpop.f32.mrf.mxu1 }
0x1e47   :  { %v7347_v43 = vpop.f32.mrf.mxu0  ;;  %v7368_v49 = vadd.f32 %v7367_v0, %v7366_v20 }
0x1e48   :  { %v6325_v44 = vadd.f32 %v7346_v42, %v6285_v39  ;;  %v7369_v48 = vpop.f32.mrf.mxu1 }
0x1e49   :  { %v7348_v50 = vpop.f32.mrf.mxu0 }
0x1e4a   :  { %v6365_v53 = vadd.f32 %v7368_v49, %v6325_v44  ;;  %v7370_v21 = vpop.f32.mrf.mxu1 }
0x1e4c   :  { %v6372_v40 = vrot.slane %v6365_v53, 2  ;;  %v6371_v32 = vrot.slane %v6365_v53, 1 }
0x1e4e   :  { %v6375_v37 = vadd.f32 %v6371_v32, %v9300_v57  ;;  %v6376_v55 = vadd.f32 %v6372_v40, %v9304_v60 }
0x1e50   :  { %v6385_v23 = vsel %vm6384_vm7, %v6375_v37, 0.0  ;;  %v6381_v61 = vrot.slane %v6376_v55, 7 }
0x1e51   :  { %6386 = vadd.xlane.f32.xlu0 %v6385_v23 }
0x1e52   :  { %v6389_v54 = vsel %vm6388_vm8, %v6381_v61, 0.0 }
0x1e53   :  { %6390 = vadd.xlane.f32.xlu1 %v6389_v54 }
0x1eda   :  { %v6387_v51 = vpop.xlane.xlu0 %6386 }
0x1edb   :  { %v6392_v45 = vmul.f32 0.03125, %v6387_v51 }
0x1edc   :  { %v6391_v29 = vpop.xlane.xlu1 %6390 }
0x1edd   :  { %v6399_v4 = vsub.f32 %v6375_v37, %v6392_v45  ;;  %v6393_v5 = vmul.f32 0.03125, %v6391_v29 }
0x1edf   :  { %v6396_v6 = vrot.slane %v6393_v5, 1  ;;  %v6401_v25 = vmul.f32 %v6399_v4, %v6399_v4 }
0x1ee1   :  { %v6400_v3 = vsub.f32 %v6376_v55, %v6396_v6  ;;  %v6408_v57 = vsel %vm6384_vm7, %v6401_v25, 0.0 }
0x1ee2   :  { %6409 = vadd.xlane.f32.xlu0 %v6408_v57 }
0x1ee3   :  { %v6402_v60 = vmul.f32 %v6400_v3, %v6400_v3 }
0x1ee5   :  { %v6405_v41 = vrot.slane %v6402_v60, 7 }
0x1ee7   :  { %v6411_v58 = vsel %vm6388_vm8, %v6405_v41, 0.0 }
0x1ee8   :  { %6412 = vadd.xlane.f32.xlu1 %v6411_v58 }
0x1f6b   :  { %v6410_v10 = vpop.xlane.xlu0 %6409 }
0x1f6c   :  { %v6414_v13 = vmul.f32 0.03125, %v6410_v10 }
0x1f6e   :  { %v6416_v19 = vadd.f32 1e-05, %v6414_v13 }
0x1f70   :  { %7997 = vrsqrt.f32 %v6416_v19 }
0x1f71   :  { %v6413_v15 = vpop.xlane.xlu1 %6412 }
0x1f72   :  { %v6415_v7 = vmul.f32 0.03125, %v6413_v15 }
0x1f74   :  { %v6417_v36 = vadd.f32 1e-05, %v6415_v7 }
0x1f76   :  { %7999 = vrsqrt.f32 %v6417_v36 }
0x1f7d   :  { %v7998_v18 = vpop.eup %7997 }
0x1f7e   :  { %v6425_v46 = vmul.f32 %v7998_v18, %v6399_v4 }
0x1f80   :  { %v6433_v1 = vmul.f32 %v6938_v8, %v6425_v46 }
0x1f82   :  { %v6441_v47 = vadd.f32 %v6939_v63, %v6433_v1 }
0x1f83   :  { %v8000_v2 = vpop.eup %7999 }
0x1f84   :  { %v6422_v59 = vrot.slane %v8000_v2, 1  ;;  %v6443_v52 = vpack.c.bf16 %v6441_v47, %v6441_v47 }
0x1f86   :  { %v6426_v17 = vmul.f32 %v6422_v59, %v6400_v3  ;;  %v6458_v34 = vunpack.c.l.b16 %v6443_v52 }
0x1f88   :  { %v6434_v38 = vmul.f32 %v6938_v8, %v6426_v17  ;;  %v6460_v11 = vrot.slane %v6458_v34, 7 }
0x1f8a   :  { %v6442_v30 = vadd.f32 %v6939_v63, %v6434_v38 }
0x1f8c   :  { %v6444_v26 = vpack.c.bf16 %v6442_v30, %v6442_v30 }
0x1f8e   :  { %v6459_v9 = vunpack.c.l.b16 %v6444_v26 }
0x1f90   :  { %v6461_v12 = vrot.slane %v6459_v9, 6 }
0x1f92   :  { %v6462_v16 = vsel %vm4493_vm6, %v6461_v12, %v6460_v11 }
0x1f93   :  { %v6463_v14 = vpack.c.b16 %v6462_v16, %v6462_v16 }
0x1f95   :  { %7604 = vmatmul.mubr.msk.bf16.vlgmr.msra.gmra.mxu0 %vm114_vm1, %v6463_v14 }
0x2055   :  { %v6513_v62 = vpop.f32.mrf.mxu0 }
0x2056   :  { %v6514_v56 = vadd.f32 %v6940_v35, %v6513_v62 }
0x2057   :  { %v7605_v24 = vpop.f32.mrf.mxu0 }
0x2058   :  { %v6520_v27 = vsel %vm6519_vm9, %v6514_v56, -inf }
0x2059   :  { %6521 = vmax.xlane.f32.xlu1 %v6520_v27  ;;  %v6516_v28 = vpop.f32.mrf.mxu0 }
0x205b   :  { %v7606_v20 = vpop.f32.mrf.mxu0 }
0x20e2   :  { %v6522_v31 = vpop.xlane.xlu1 %6521 }
0x20e3   :  { %v6523_v39 = vsub.f32 %v6514_v56, %v6522_v31 }
0x20e5   :  { %v6524_v42 = vmul.f32 1.442695, %v6523_v39 }
0x20e7   :  { %8001 = vpow2.f32 %v6524_v42 }
0x20f4   :  { %v8002_v0 = vpop.eup %8001 }
0x20f5   :  { %v6526_v43 = vsel %vm6519_vm9, %v8002_v0, 0.0 }
0x20f6   :  { %6527 = vadd.xlane.f32.xlu0 %v6526_v43 }
0x217f   :  { %v6528_v44 = vpop.xlane.xlu0 %6527 }
0x2180   :  { %8003 = vrcp.f32 %v6528_v44 }
0x218d   :  { %v8004_v49 = vpop.eup %8003 }
0x218e   :  { %v6530_v48 = vmul.f32 %v8004_v49, %v8002_v0 }
0x2190   :  { %6531 = vst.msk [vmem:[#allocation2] sm:$0x3] %vm6519_vm9, %v6530_v48 }
0x2191   :  { %8018 = shalt.err (!%p8015_p4)
}
0x2192   :  { %6541 = dma.vmem_to_hbm [thread:$0]  %s6539_s26, 32, %s9906_s27, [#allocation3]  }
0x2193   :  { %8027 = dma.done.wait [#allocation3], 32  }
0x2194   :  { %8028 = vsyncadd [#allocation3], 4294967264 }
0x2195   :  { %6545 = vsyncpa [#allocation3], 1 }

</bundles_post_ra>
